<compile_context>
chip_gen: v6e
topology: v6e:2x2x1
jax: 0.10.0
libtpu: 0.0.40
codegen_flags: <defaults>
</compile_context>

<pallas_src>
import functools

import jax
import jax.numpy as jnp
import numpy as np
from jax import lax
from jax.experimental import pallas as pl
from jax.experimental.pallas import tpu as pltpu


def calc_same_padding(kernel_size):
    pad = kernel_size // 2
    return (pad, pad - (kernel_size + 1) % 2)


def _cfn_conv_kernel(
    xl_ref,    # (1, HALO, D)    previous 16 rows of x (clamped at t == 0)
    xc_ref,    # (1, T_TILE, D)  current x tile
    xr_ref,    # (1, HALO, D)    next 16 rows of x (clamped at last tile)
    w1_ref,    # (D, 2*inner)    bf16  pointwise conv #1
    b1_ref,    # (1, 2*inner)    f32
    wdw_ref,   # (K, inner)      f32   depthwise taps
    bdw_ref,   # (1, inner)      f32
    a_ref,     # (1, inner)      f32   PReLU slope
    w3_ref,    # (inner, D)      bf16  pointwise conv #2
    b3_ref,    # (1, D)          f32
    o_ref,     # (1, T_TILE, D)
    h_ref,     # VMEM scratch (T_TILE + 2*HALO, inner) f32 : SwiGLU output (+halo)
    z_ref,     # VMEM scratch (T_TILE, inner) bf16        : depthwise+PReLU output
    *, t_tile, inner, kernel_size, halo, r_blk,
):
    t = pl.program_id(1)
    nt = pl.num_programs(1)

    # --- pointwise conv #1 (1x1 conv == matmul) on the MXU + SwiGLU ------------
    w1 = w1_ref[...]
    b1 = b1_ref[...]

    def swiglu(x_rows):                       # (n, D) f32 -> (n, inner) f32
        y = jnp.dot(x_rows.astype(jnp.bfloat16), w1,
                    preferred_element_type=jnp.float32) + b1
        out = y[:, :inner]
        gate = y[:, inner:]
        return out * (gate * jax.nn.sigmoid(gate))

    # three aligned segment stores (no concat copy)
    h_ref[halo:halo + t_tile, :] = swiglu(xc_ref[0])
    h_ref[:halo, :] = swiglu(xl_ref[0])
    h_ref[halo + t_tile:, :] = swiglu(xr_ref[0])

    # --- 'same' padding: zero halo rows that fall outside [0, T).
    # Only boundary tiles pay for this; interior tiles skip it entirely.
    @pl.when(t == 0)
    def _():
        h_ref[:halo, :] = jnp.zeros((halo, inner), jnp.float32)

    @pl.when(t == nt - 1)
    def _():
        h_ref[halo + t_tile:, :] = jnp.zeros((halo, inner), jnp.float32)

    # --- depthwise conv (K taps) + bias + PReLU: row-blocked sliding window ----
    taps = wdw_ref[...]                       # (K, inner), loaded once
    bdw = bdw_ref[...]                        # (1, inner)
    alpha = a_ref[...]                        # (1, inner)
    off = halo - kernel_size // 2             # = 1 for K = 31

    def block(b, carry):
        start = pl.multiple_of(b * r_blk, r_blk)
        # one aligned load of the (r_blk + 2*halo) rows this block needs
        win = h_ref[pl.ds(start, r_blk + 2 * halo), :]       # (r_blk+32, inner)
        # output row i of this block needs window rows i+off .. i+off+K-1;
        # shifted slabs come from in-register slices of `win`, single accumulator.
        acc = win[off:off + r_blk] * taps[0:1, :]
        for k in range(1, kernel_size):
            acc = acc + win[k + off:k + off + r_blk] * taps[k:k + 1, :]
        z = acc + bdw
        z = jnp.where(z > 0, z, alpha * z)                   # PReLU
        z_ref[pl.ds(start, r_blk), :] = z.astype(jnp.bfloat16)
        return carry

    lax.fori_loop(0, t_tile // r_blk, block, 0)

    # --- pointwise conv #2 on the MXU + residual (x = x + conformer(x)) --------
    o = jnp.dot(z_ref[...], w3_ref[...],
                preferred_element_type=jnp.float32) + b3_ref[...]
    o_ref[0] = (xc_ref[0] + o).astype(o_ref.dtype)


def _pick_t_tile(B, T, halo, requested):
    cands = sorted(c for c in range(halo, T + 1, halo) if T % c == 0)
    if not cands:
        raise ValueError("T must be a positive multiple of 16")
    fitting = [c for c in cands if c <= requested]
    t_tile = fitting[-1] if fitting else cands[0]
    # v7x has two TensorCores: keep >= 4 parallel grid slices when we can do so
    # without shrinking tiles below 128 rows (halo recompute stays <= ~12%).
    while B * (T // t_tile) < 4:
        smaller = [c for c in cands if 128 <= c < t_tile]
        if not smaller:
            break
        t_tile = smaller[-1]
    return t_tile


def cfn_encoder_layer(x, params, *, kernel_size=31, t_tile=512):
    """x: (B, T, D) float32. params: see init_params. Returns x + conv_module(x)."""
    B, T, D = x.shape
    inner = params["w3"].shape[0]
    K = kernel_size
    pad = calc_same_padding(K)[0]
    halo = 16                                 # sublane-aligned halo (>= pad = 15)
    assert pad <= halo
    assert T % halo == 0, "T must be a multiple of 16"

    t_tile = _pick_t_tile(B, T, halo, t_tile)
    nt = T // t_tile
    r16 = t_tile // halo                      # halo-sized blocks per time tile
    nblk16 = T // halo                        # halo-sized blocks in T
    r_blk = 32 if t_tile % 32 == 0 else 16    # depthwise output row-block size
    assert t_tile % r_blk == 0

    kernel = functools.partial(
        _cfn_conv_kernel,
        t_tile=t_tile, inner=inner, kernel_size=K, halo=halo, r_blk=r_blk)

    def full2d(a):
        return pl.BlockSpec(a.shape, lambda b, t: (0, 0))

    grid_spec = pltpu.PrefetchScalarGridSpec(
        num_scalar_prefetch=0,
        grid=(B, nt),
        in_specs=[
            # previous 16 rows of x (clamped to block 0 at t == 0; zeroed in-kernel)
            pl.BlockSpec((1, halo, D),
                         lambda b, t: (b, jnp.maximum(t * r16 - 1, 0), 0)),
            # current time tile
            pl.BlockSpec((1, t_tile, D), lambda b, t: (b, t, 0)),
            # next 16 rows of x (clamped at the last tile; zeroed in-kernel)
            pl.BlockSpec((1, halo, D),
                         lambda b, t: (b, jnp.minimum((t + 1) * r16, nblk16 - 1), 0)),
            full2d(params["w1"]), full2d(params["b1"]),
            full2d(params["wdw"]), full2d(params["bdw"]),
            full2d(params["a"]),
            full2d(params["w3"]), full2d(params["b3"]),
        ],
        out_specs=pl.BlockSpec((1, t_tile, D), lambda b, t: (b, t, 0)),
        scratch_shapes=[
            pltpu.VMEM((t_tile + 2 * halo, inner), jnp.float32),
            pltpu.VMEM((t_tile, inner), jnp.bfloat16),
        ],
    )

    return pl.pallas_call(
        kernel,
        out_shape=jax.ShapeDtypeStruct((B, T, D), x.dtype),
        grid_spec=grid_spec,
        compiler_params=pltpu.CompilerParams(
            dimension_semantics=("parallel", "parallel"),
            vmem_limit_bytes=16 * 1024 * 1024,
        ),
    )(
        x, x, x,
        params["w1"], params["b1"],
        params["wdw"], params["bdw"],
        params["a"],
        params["w3"], params["b3"],
    )


def init_params(key, dim, expansion_factor=2, kernel_size=31):
    """Deterministic synthetic parameters matching the nn.Module shapes.

    Matmul weights are stored in bf16 (full-rate MXU operands); everything else f32.
    """
    inner = dim * expansion_factor
    keys = jax.random.split(key, 6)

    # Conv1d(dim, 2*inner, 1): torch weight (2*inner, dim, 1); stored transposed.
    w1 = (jax.random.normal(keys[0], (dim, 2 * inner), jnp.float32) * 0.1
          ).astype(jnp.bfloat16)
    b1 = jax.random.normal(keys[1], (1, 2 * inner), jnp.float32) * 0.1
    # depthwise Conv1d(inner, inner, K, groups=inner): torch weight (inner, 1, K);
    # stored as (K, inner) so each tap broadcasts across the lane (channel) axis.
    wdw = jax.random.normal(keys[2], (kernel_size, inner), jnp.float32) * 0.1
    bdw = jax.random.normal(keys[3], (1, inner), jnp.float32) * 0.1
    # PReLU(num_parameters=inner): torch init value 0.25
    a = jnp.full((1, inner), 0.25, jnp.float32)
    # Conv1d(inner, dim, 1): torch weight (dim, inner, 1); stored transposed.
    w3 = (jax.random.normal(keys[4], (inner, dim), jnp.float32) * 0.1
          ).astype(jnp.bfloat16)
    b3 = jax.random.normal(keys[5], (1, dim), jnp.float32) * 0.1

    return dict(w1=w1, b1=b1, wdw=wdw, bdw=bdw, a=a, w3=w3, b3=b3)


def reference(x, params, *, kernel_size=31):
    """Pure-JAX reference of the same forward pass (bf16 matmuls, f32 accumulate)."""
    B, T, D = x.shape
    inner = params["w3"].shape[0]
    pad = calc_same_padding(kernel_size)[0]

    y = jnp.einsum("btd,dc->btc", x.astype(jnp.bfloat16), params["w1"],
                   preferred_element_type=jnp.float32) + params["b1"][None]
    out, gate = y[..., :inner], y[..., inner:]
    h = out * (gate * jax.nn.sigmoid(gate))
    hp = jnp.pad(h, ((0, 0), (pad, pad), (0, 0)))
    z = jnp.broadcast_to(params["bdw"][None], (B, T, inner))
    for k in range(kernel_size):
        z = z + hp[:, k:k + T, :] * params["wdw"][k][None, None, :]
    z = jnp.where(z > 0, z, params["a"][None] * z)
    o = jnp.einsum("btc,cd->btd", z.astype(jnp.bfloat16), params["w3"],
                   preferred_element_type=jnp.float32) + params["b3"][None]
    return x + o


if __name__ == "__main__":
    kernel_size = 31
    key = jax.random.PRNGKey(0)

    configs = [
        # (B, T, dim, requested t_tile)
        (2, 384, 128, 128),   # grid (2, 3): interior tile + both boundary tiles
        (1, 160, 128, 512),   # single time tile: both halos zero-padded in-kernel
    ]
    for (B, T, dim, tt) in configs:
        key, kx, kp = jax.random.split(key, 3)
        x = jax.random.normal(kx, (B, T, dim), jnp.float32)
        params = init_params(kp, dim, expansion_factor=2, kernel_size=kernel_size)

        out = jax.block_until_ready(
            cfn_encoder_layer(x, params, kernel_size=kernel_size, t_tile=tt))
        ref = jax.block_until_ready(reference(x, params, kernel_size=kernel_size))
        np.testing.assert_allclose(np.asarray(out), np.asarray(ref),
                                   rtol=2e-3, atol=2e-3)

    print("KERNEL_OK")
</pallas_src>

<mosaic_0001>
module attributes {stable_mosaic.version = 11 : i64} {
  func.func @_cfn_conv_kernel(%arg0: i32, %arg1: i32, %arg2: memref<1x16x128xf32, #tpu.memory_space<vmem>>, %arg3: memref<1x128x128xf32, #tpu.memory_space<vmem>>, %arg4: memref<1x16x128xf32, #tpu.memory_space<vmem>>, %arg5: memref<128x512xbf16, #tpu.memory_space<vmem>>, %arg6: memref<1x512xf32, #tpu.memory_space<vmem>>, %arg7: memref<31x256xf32, #tpu.memory_space<vmem>>, %arg8: memref<1x256xf32, #tpu.memory_space<vmem>>, %arg9: memref<1x256xf32, #tpu.memory_space<vmem>>, %arg10: memref<256x128xbf16, #tpu.memory_space<vmem>>, %arg11: memref<1x128xf32, #tpu.memory_space<vmem>>, %arg12: memref<1x128x128xf32, #tpu.memory_space<vmem>>, %arg13: memref<160x256xf32, #tpu.memory_space<vmem>>, %arg14: memref<128x256xbf16, #tpu.memory_space<vmem>>) attributes {dimension_semantics = [#tpu.dimension_semantics<parallel>, #tpu.dimension_semantics<parallel>], iteration_bounds = array<i64: 2, 3>, scalar_prefetch = 0 : i64, scratch_operands = 2 : i64, tpu.core_type = #tpu.core_type<tc>, window_params = [{transform_indices = @transform_0, window_bounds = array<i64: 1, 16, 128>}, {transform_indices = @transform_1, window_bounds = array<i64: 1, 128, 128>}, {transform_indices = @transform_2, window_bounds = array<i64: 1, 16, 128>}, {pipeline_mode = #tpu.pipeline_mode<synchronous>, transform_indices = @transform_3, window_bounds = array<i64: 128, 512>}, {pipeline_mode = #tpu.pipeline_mode<synchronous>, transform_indices = @transform_4, window_bounds = array<i64: 1, 512>}, {pipeline_mode = #tpu.pipeline_mode<synchronous>, transform_indices = @transform_5, window_bounds = array<i64: 31, 256>}, {pipeline_mode = #tpu.pipeline_mode<synchronous>, transform_indices = @transform_6, window_bounds = array<i64: 1, 256>}, {pipeline_mode = #tpu.pipeline_mode<synchronous>, transform_indices = @transform_7, window_bounds = array<i64: 1, 256>}, {pipeline_mode = #tpu.pipeline_mode<synchronous>, transform_indices = @transform_8, window_bounds = array<i64: 256, 128>}, {pipeline_mode = #tpu.pipeline_mode<synchronous>, transform_indices = @transform_9, window_bounds = array<i64: 1, 128>}, {transform_indices = @transform_10, window_bounds = array<i64: 1, 128, 128>}]} {
    %c0 = arith.constant 0 : index
    %c0_0 = arith.constant 0 : index
    %0 = vector.load %arg5[%c0, %c0_0] : memref<128x512xbf16, #tpu.memory_space<vmem>>, vector<128x512xbf16>
    %c0_1 = arith.constant 0 : index
    %c0_2 = arith.constant 0 : index
    %1 = vector.load %arg6[%c0_1, %c0_2] : memref<1x512xf32, #tpu.memory_space<vmem>>, vector<1x512xf32>
    %c0_3 = arith.constant 0 : index
    %c0_4 = arith.constant 0 : index
    %c0_5 = arith.constant 0 : index
    %2 = vector.load %arg3[%c0_3, %c0_4, %c0_5] : memref<1x128x128xf32, #tpu.memory_space<vmem>>, vector<1x128x128xf32>
    %3 = vector.shape_cast %2 : vector<1x128x128xf32> to vector<128x128xf32>
    %4 = arith.truncf %3 : vector<128x128xf32> to vector<128x128xbf16>
    %cst = arith.constant dense<0.000000e+00> : vector<128x512xf32>
    %5 = tpu.matmul %4, %0, %cst {dimension_numbers = #tpu.dot_dimension_numbers<[1], [0], [0], [1], [0, 0, 1, 1], [], []>} : vector<128x128xbf16>, vector<128x512xbf16>, vector<128x512xf32> -> vector<128x512xf32>
    %6 = vector.broadcast %1 : vector<1x512xf32> to vector<128x512xf32>
    %7 = arith.addf %5, %6 : vector<128x512xf32>
    %8 = vector.extract_strided_slice %7 {offsets = [0, 0], sizes = [128, 256], strides = [1, 1]} : vector<128x512xf32> to vector<128x256xf32>
    %9 = vector.extract_strided_slice %7 {offsets = [0, 256], sizes = [128, 256], strides = [1, 1]} : vector<128x512xf32> to vector<128x256xf32>
    %10 = arith.negf %9 : vector<128x256xf32>
    %11 = math.exp %10 : vector<128x256xf32>
    %cst_6 = arith.constant 1.000000e+00 : f32
    %12 = vector.broadcast %cst_6 : f32 to vector<128x256xf32>
    %13 = arith.addf %12, %11 : vector<128x256xf32>
    %14 = arith.divf %12, %13 : vector<128x256xf32>
    %15 = arith.mulf %9, %14 : vector<128x256xf32>
    %16 = arith.mulf %8, %15 : vector<128x256xf32>
    %c16 = arith.constant 16 : index
    %c0_7 = arith.constant 0 : index
    %17 = vector.load %arg13[%c16, %c0_7] : memref<160x256xf32, #tpu.memory_space<vmem>>, vector<128x256xf32>
    tpu.vector_store %arg13[%c16, %c0_7], %16 {strides = array<i32>} : memref<160x256xf32, #tpu.memory_space<vmem>>, vector<128x256xf32>,
    %c0_8 = arith.constant 0 : index
    %c0_9 = arith.constant 0 : index
    %c0_10 = arith.constant 0 : index
    %18 = vector.load %arg2[%c0_8, %c0_9, %c0_10] : memref<1x16x128xf32, #tpu.memory_space<vmem>>, vector<1x16x128xf32>
    %19 = vector.shape_cast %18 : vector<1x16x128xf32> to vector<16x128xf32>
    %20 = arith.truncf %19 : vector<16x128xf32> to vector<16x128xbf16>
    %cst_11 = arith.constant dense<0.000000e+00> : vector<16x512xf32>
    %21 = tpu.matmul %20, %0, %cst_11 {dimension_numbers = #tpu.dot_dimension_numbers<[1], [0], [0], [1], [0, 0, 1, 1], [], []>} : vector<16x128xbf16>, vector<128x512xbf16>, vector<16x512xf32> -> vector<16x512xf32>
    %22 = vector.broadcast %1 : vector<1x512xf32> to vector<16x512xf32>
    %23 = arith.addf %21, %22 : vector<16x512xf32>
    %24 = vector.extract_strided_slice %23 {offsets = [0, 0], sizes = [16, 256], strides = [1, 1]} : vector<16x512xf32> to vector<16x256xf32>
    %25 = vector.extract_strided_slice %23 {offsets = [0, 256], sizes = [16, 256], strides = [1, 1]} : vector<16x512xf32> to vector<16x256xf32>
    %26 = arith.negf %25 : vector<16x256xf32>
    %27 = math.exp %26 : vector<16x256xf32>
    %cst_12 = arith.constant 1.000000e+00 : f32
    %28 = vector.broadcast %cst_12 : f32 to vector<16x256xf32>
    %29 = arith.addf %28, %27 : vector<16x256xf32>
    %30 = arith.divf %28, %29 : vector<16x256xf32>
    %31 = arith.mulf %25, %30 : vector<16x256xf32>
    %32 = arith.mulf %24, %31 : vector<16x256xf32>
    %c0_13 = arith.constant 0 : index
    %c0_14 = arith.constant 0 : index
    %33 = vector.load %arg13[%c0_13, %c0_14] : memref<160x256xf32, #tpu.memory_space<vmem>>, vector<16x256xf32>
    tpu.vector_store %arg13[%c0_13, %c0_14], %32 {strides = array<i32>} : memref<160x256xf32, #tpu.memory_space<vmem>>, vector<16x256xf32>,
    %c0_15 = arith.constant 0 : index
    %c0_16 = arith.constant 0 : index
    %c0_17 = arith.constant 0 : index
    %34 = vector.load %arg4[%c0_15, %c0_16, %c0_17] : memref<1x16x128xf32, #tpu.memory_space<vmem>>, vector<1x16x128xf32>
    %35 = vector.shape_cast %34 : vector<1x16x128xf32> to vector<16x128xf32>
    %36 = arith.truncf %35 : vector<16x128xf32> to vector<16x128xbf16>
    %cst_18 = arith.constant dense<0.000000e+00> : vector<16x512xf32>
    %37 = tpu.matmul %36, %0, %cst_18 {dimension_numbers = #tpu.dot_dimension_numbers<[1], [0], [0], [1], [0, 0, 1, 1], [], []>} : vector<16x128xbf16>, vector<128x512xbf16>, vector<16x512xf32> -> vector<16x512xf32>
    %38 = vector.broadcast %1 : vector<1x512xf32> to vector<16x512xf32>
    %39 = arith.addf %37, %38 : vector<16x512xf32>
    %40 = vector.extract_strided_slice %39 {offsets = [0, 0], sizes = [16, 256], strides = [1, 1]} : vector<16x512xf32> to vector<16x256xf32>
    %41 = vector.extract_strided_slice %39 {offsets = [0, 256], sizes = [16, 256], strides = [1, 1]} : vector<16x512xf32> to vector<16x256xf32>
    %42 = arith.negf %41 : vector<16x256xf32>
    %43 = math.exp %42 : vector<16x256xf32>
    %cst_19 = arith.constant 1.000000e+00 : f32
    %44 = vector.broadcast %cst_19 : f32 to vector<16x256xf32>
    %45 = arith.addf %44, %43 : vector<16x256xf32>
    %46 = arith.divf %44, %45 : vector<16x256xf32>
    %47 = arith.mulf %41, %46 : vector<16x256xf32>
    %48 = arith.mulf %40, %47 : vector<16x256xf32>
    %c144 = arith.constant 144 : index
    %c0_20 = arith.constant 0 : index
    %49 = vector.load %arg13[%c144, %c0_20] : memref<160x256xf32, #tpu.memory_space<vmem>>, vector<16x256xf32>
    tpu.vector_store %arg13[%c144, %c0_20], %48 {strides = array<i32>} : memref<160x256xf32, #tpu.memory_space<vmem>>, vector<16x256xf32>,
    %c0_i32 = arith.constant 0 : i32
    %50 = arith.cmpi eq, %arg1, %c0_i32 : i32
    %51 = arith.extui %50 : i1 to i32
    %c0_i32_21 = arith.constant 0 : i32
    %52 = arith.cmpi ne, %51, %c0_i32_21 : i32
    scf.if %52 {
      %cst_44 = arith.constant 0.000000e+00 : f32
      %72 = vector.broadcast %cst_44 : f32 to vector<16x256xf32>
      %c0_45 = arith.constant 0 : index
      %c0_46 = arith.constant 0 : index
      %73 = vector.load %arg13[%c0_45, %c0_46] : memref<160x256xf32, #tpu.memory_space<vmem>>, vector<16x256xf32>
      tpu.vector_store %arg13[%c0_45, %c0_46], %72 {strides = array<i32>} : memref<160x256xf32, #tpu.memory_space<vmem>>, vector<16x256xf32>,
    } else {
    }
    %c2_i32 = arith.constant 2 : i32
    %53 = arith.cmpi eq, %arg1, %c2_i32 : i32
    %54 = arith.extui %53 : i1 to i32
    %c0_i32_22 = arith.constant 0 : i32
    %55 = arith.cmpi ne, %54, %c0_i32_22 : i32
    scf.if %55 {
      %cst_44 = arith.constant 0.000000e+00 : f32
      %72 = vector.broadcast %cst_44 : f32 to vector<16x256xf32>
      %c144_45 = arith.constant 144 : index
      %c0_46 = arith.constant 0 : index
      %73 = vector.load %arg13[%c144_45, %c0_46] : memref<160x256xf32, #tpu.memory_space<vmem>>, vector<16x256xf32>
      tpu.vector_store %arg13[%c144_45, %c0_46], %72 {strides = array<i32>} : memref<160x256xf32, #tpu.memory_space<vmem>>, vector<16x256xf32>,
    } else {
    }
    %c0_23 = arith.constant 0 : index
    %c0_24 = arith.constant 0 : index
    %56 = vector.load %arg7[%c0_23, %c0_24] : memref<31x256xf32, #tpu.memory_space<vmem>>, vector<31x256xf32>
    %c0_25 = arith.constant 0 : index
    %c0_26 = arith.constant 0 : index
    %57 = vector.load %arg8[%c0_25, %c0_26] : memref<1x256xf32, #tpu.memory_space<vmem>>, vector<1x256xf32>
    %c0_27 = arith.constant 0 : index
    %c0_28 = arith.constant 0 : index
    %58 = vector.load %arg9[%c0_27, %c0_28] : memref<1x256xf32, #tpu.memory_space<vmem>>, vector<1x256xf32>
    %c0_i32_29 = arith.constant 0 : i32
    %c4_i32 = arith.constant 4 : i32
    %59 = arith.addi %c0_i32_29, %c4_i32 : i32
    %c1_i32 = arith.constant 1 : i32
    scf.for %arg15 = %c0_i32_29 to %59 step %c1_i32  : i32 {
      %c32_i32 = arith.constant 32 : i32
      %72 = arith.muli %arg15, %c32_i32 : i32
      %73 = tpu.assume_multiple %72, 32 : i32
      %74 = arith.index_cast %73 : i32 to index
      %c0_44 = arith.constant 0 : index
      %75 = vector.load %arg13[%74, %c0_44] : memref<160x256xf32, #tpu.memory_space<vmem>>, vector<64x256xf32>
      %76 = vector.extract_strided_slice %75 {offsets = [1, 0], sizes = [32, 256], strides = [1, 1]} : vector<64x256xf32> to vector<32x256xf32>
      %77 = vector.extract_strided_slice %56 {offsets = [0, 0], sizes = [1, 256], strides = [1, 1]} : vector<31x256xf32> to vector<1x256xf32>
      %78 = vector.broadcast %77 : vector<1x256xf32> to vector<32x256xf32>
      %79 = arith.mulf %76, %78 : vector<32x256xf32>
      %80 = vector.extract_strided_slice %75 {offsets = [2, 0], sizes = [32, 256], strides = [1, 1]} : vector<64x256xf32> to vector<32x256xf32>
      %81 = vector.extract_strided_slice %56 {offsets = [1, 0], sizes = [1, 256], strides = [1, 1]} : vector<31x256xf32> to vector<1x256xf32>
      %82 = vector.broadcast %81 : vector<1x256xf32> to vector<32x256xf32>
      %83 = arith.mulf %80, %82 : vector<32x256xf32>
      %84 = arith.addf %79, %83 : vector<32x256xf32>
      %85 = vector.extract_strided_slice %75 {offsets = [3, 0], sizes = [32, 256], strides = [1, 1]} : vector<64x256xf32> to vector<32x256xf32>
      %86 = vector.extract_strided_slice %56 {offsets = [2, 0], sizes = [1, 256], strides = [1, 1]} : vector<31x256xf32> to vector<1x256xf32>
      %87 = vector.broadcast %86 : vector<1x256xf32> to vector<32x256xf32>
      %88 = arith.mulf %85, %87 : vector<32x256xf32>
      %89 = arith.addf %84, %88 : vector<32x256xf32>
      %90 = vector.extract_strided_slice %75 {offsets = [4, 0], sizes = [32, 256], strides = [1, 1]} : vector<64x256xf32> to vector<32x256xf32>
      %91 = vector.extract_strided_slice %56 {offsets = [3, 0], sizes = [1, 256], strides = [1, 1]} : vector<31x256xf32> to vector<1x256xf32>
      %92 = vector.broadcast %91 : vector<1x256xf32> to vector<32x256xf32>
      %93 = arith.mulf %90, %92 : vector<32x256xf32>
      %94 = arith.addf %89, %93 : vector<32x256xf32>
      %95 = vector.extract_strided_slice %75 {offsets = [5, 0], sizes = [32, 256], strides = [1, 1]} : vector<64x256xf32> to vector<32x256xf32>
      %96 = vector.extract_strided_slice %56 {offsets = [4, 0], sizes = [1, 256], strides = [1, 1]} : vector<31x256xf32> to vector<1x256xf32>
      %97 = vector.broadcast %96 : vector<1x256xf32> to vector<32x256xf32>
      %98 = arith.mulf %95, %97 : vector<32x256xf32>
      %99 = arith.addf %94, %98 : vector<32x256xf32>
      %100 = vector.extract_strided_slice %75 {offsets = [6, 0], sizes = [32, 256], strides = [1, 1]} : vector<64x256xf32> to vector<32x256xf32>
      %101 = vector.extract_strided_slice %56 {offsets = [5, 0], sizes = [1, 256], strides = [1, 1]} : vector<31x256xf32> to vector<1x256xf32>
      %102 = vector.broadcast %101 : vector<1x256xf32> to vector<32x256xf32>
      %103 = arith.mulf %100, %102 : vector<32x256xf32>
      %104 = arith.addf %99, %103 : vector<32x256xf32>
      %105 = vector.extract_strided_slice %75 {offsets = [7, 0], sizes = [32, 256], strides = [1, 1]} : vector<64x256xf32> to vector<32x256xf32>
      %106 = vector.extract_strided_slice %56 {offsets = [6, 0], sizes = [1, 256], strides = [1, 1]} : vector<31x256xf32> to vector<1x256xf32>
      %107 = vector.broadcast %106 : vector<1x256xf32> to vector<32x256xf32>
      %108 = arith.mulf %105, %107 : vector<32x256xf32>
      %109 = arith.addf %104, %108 : vector<32x256xf32>
      %110 = vector.extract_strided_slice %75 {offsets = [8, 0], sizes = [32, 256], strides = [1, 1]} : vector<64x256xf32> to vector<32x256xf32>
      %111 = vector.extract_strided_slice %56 {offsets = [7, 0], sizes = [1, 256], strides = [1, 1]} : vector<31x256xf32> to vector<1x256xf32>
      %112 = vector.broadcast %111 : vector<1x256xf32> to vector<32x256xf32>
      %113 = arith.mulf %110, %112 : vector<32x256xf32>
      %114 = arith.addf %109, %113 : vector<32x256xf32>
      %115 = vector.extract_strided_slice %75 {offsets = [9, 0], sizes = [32, 256], strides = [1, 1]} : vector<64x256xf32> to vector<32x256xf32>
      %116 = vector.extract_strided_slice %56 {offsets = [8, 0], sizes = [1, 256], strides = [1, 1]} : vector<31x256xf32> to vector<1x256xf32>
      %117 = vector.broadcast %116 : vector<1x256xf32> to vector<32x256xf32>
      %118 = arith.mulf %115, %117 : vector<32x256xf32>
      %119 = arith.addf %114, %118 : vector<32x256xf32>
      %120 = vector.extract_strided_slice %75 {offsets = [10, 0], sizes = [32, 256], strides = [1, 1]} : vector<64x256xf32> to vector<32x256xf32>
      %121 = vector.extract_strided_slice %56 {offsets = [9, 0], sizes = [1, 256], strides = [1, 1]} : vector<31x256xf32> to vector<1x256xf32>
      %122 = vector.broadcast %121 : vector<1x256xf32> to vector<32x256xf32>
      %123 = arith.mulf %120, %122 : vector<32x256xf32>
      %124 = arith.addf %119, %123 : vector<32x256xf32>
      %125 = vector.extract_strided_slice %75 {offsets = [11, 0], sizes = [32, 256], strides = [1, 1]} : vector<64x256xf32> to vector<32x256xf32>
      %126 = vector.extract_strided_slice %56 {offsets = [10, 0], sizes = [1, 256], strides = [1, 1]} : vector<31x256xf32> to vector<1x256xf32>
      %127 = vector.broadcast %126 : vector<1x256xf32> to vector<32x256xf32>
      %128 = arith.mulf %125, %127 : vector<32x256xf32>
      %129 = arith.addf %124, %128 : vector<32x256xf32>
      %130 = vector.extract_strided_slice %75 {offsets = [12, 0], sizes = [32, 256], strides = [1, 1]} : vector<64x256xf32> to vector<32x256xf32>
      %131 = vector.extract_strided_slice %56 {offsets = [11, 0], sizes = [1, 256], strides = [1, 1]} : vector<31x256xf32> to vector<1x256xf32>
      %132 = vector.broadcast %131 : vector<1x256xf32> to vector<32x256xf32>
      %133 = arith.mulf %130, %132 : vector<32x256xf32>
      %134 = arith.addf %129, %133 : vector<32x256xf32>
      %135 = vector.extract_strided_slice %75 {offsets = [13, 0], sizes = [32, 256], strides = [1, 1]} : vector<64x256xf32> to vector<32x256xf32>
      %136 = vector.extract_strided_slice %56 {offsets = [12, 0], sizes = [1, 256], strides = [1, 1]} : vector<31x256xf32> to vector<1x256xf32>
      %137 = vector.broadcast %136 : vector<1x256xf32> to vector<32x256xf32>
      %138 = arith.mulf %135, %137 : vector<32x256xf32>
      %139 = arith.addf %134, %138 : vector<32x256xf32>
      %140 = vector.extract_strided_slice %75 {offsets = [14, 0], sizes = [32, 256], strides = [1, 1]} : vector<64x256xf32> to vector<32x256xf32>
      %141 = vector.extract_strided_slice %56 {offsets = [13, 0], sizes = [1, 256], strides = [1, 1]} : vector<31x256xf32> to vector<1x256xf32>
      %142 = vector.broadcast %141 : vector<1x256xf32> to vector<32x256xf32>
      %143 = arith.mulf %140, %142 : vector<32x256xf32>
      %144 = arith.addf %139, %143 : vector<32x256xf32>
      %145 = vector.extract_strided_slice %75 {offsets = [15, 0], sizes = [32, 256], strides = [1, 1]} : vector<64x256xf32> to vector<32x256xf32>
      %146 = vector.extract_strided_slice %56 {offsets = [14, 0], sizes = [1, 256], strides = [1, 1]} : vector<31x256xf32> to vector<1x256xf32>
      %147 = vector.broadcast %146 : vector<1x256xf32> to vector<32x256xf32>
      %148 = arith.mulf %145, %147 : vector<32x256xf32>
      %149 = arith.addf %144, %148 : vector<32x256xf32>
      %150 = vector.extract_strided_slice %75 {offsets = [16, 0], sizes = [32, 256], strides = [1, 1]} : vector<64x256xf32> to vector<32x256xf32>
      %151 = vector.extract_strided_slice %56 {offsets = [15, 0], sizes = [1, 256], strides = [1, 1]} : vector<31x256xf32> to vector<1x256xf32>
      %152 = vector.broadcast %151 : vector<1x256xf32> to vector<32x256xf32>
      %153 = arith.mulf %150, %152 : vector<32x256xf32>
      %154 = arith.addf %149, %153 : vector<32x256xf32>
      %155 = vector.extract_strided_slice %75 {offsets = [17, 0], sizes = [32, 256], strides = [1, 1]} : vector<64x256xf32> to vector<32x256xf32>
      %156 = vector.extract_strided_slice %56 {offsets = [16, 0], sizes = [1, 256], strides = [1, 1]} : vector<31x256xf32> to vector<1x256xf32>
      %157 = vector.broadcast %156 : vector<1x256xf32> to vector<32x256xf32>
      %158 = arith.mulf %155, %157 : vector<32x256xf32>
      %159 = arith.addf %154, %158 : vector<32x256xf32>
      %160 = vector.extract_strided_slice %75 {offsets = [18, 0], sizes = [32, 256], strides = [1, 1]} : vector<64x256xf32> to vector<32x256xf32>
      %161 = vector.extract_strided_slice %56 {offsets = [17, 0], sizes = [1, 256], strides = [1, 1]} : vector<31x256xf32> to vector<1x256xf32>
      %162 = vector.broadcast %161 : vector<1x256xf32> to vector<32x256xf32>
      %163 = arith.mulf %160, %162 : vector<32x256xf32>
      %164 = arith.addf %159, %163 : vector<32x256xf32>
      %165 = vector.extract_strided_slice %75 {offsets = [19, 0], sizes = [32, 256], strides = [1, 1]} : vector<64x256xf32> to vector<32x256xf32>
      %166 = vector.extract_strided_slice %56 {offsets = [18, 0], sizes = [1, 256], strides = [1, 1]} : vector<31x256xf32> to vector<1x256xf32>
      %167 = vector.broadcast %166 : vector<1x256xf32> to vector<32x256xf32>
      %168 = arith.mulf %165, %167 : vector<32x256xf32>
      %169 = arith.addf %164, %168 : vector<32x256xf32>
      %170 = vector.extract_strided_slice %75 {offsets = [20, 0], sizes = [32, 256], strides = [1, 1]} : vector<64x256xf32> to vector<32x256xf32>
      %171 = vector.extract_strided_slice %56 {offsets = [19, 0], sizes = [1, 256], strides = [1, 1]} : vector<31x256xf32> to vector<1x256xf32>
      %172 = vector.broadcast %171 : vector<1x256xf32> to vector<32x256xf32>
      %173 = arith.mulf %170, %172 : vector<32x256xf32>
      %174 = arith.addf %169, %173 : vector<32x256xf32>
      %175 = vector.extract_strided_slice %75 {offsets = [21, 0], sizes = [32, 256], strides = [1, 1]} : vector<64x256xf32> to vector<32x256xf32>
      %176 = vector.extract_strided_slice %56 {offsets = [20, 0], sizes = [1, 256], strides = [1, 1]} : vector<31x256xf32> to vector<1x256xf32>
      %177 = vector.broadcast %176 : vector<1x256xf32> to vector<32x256xf32>
      %178 = arith.mulf %175, %177 : vector<32x256xf32>
      %179 = arith.addf %174, %178 : vector<32x256xf32>
      %180 = vector.extract_strided_slice %75 {offsets = [22, 0], sizes = [32, 256], strides = [1, 1]} : vector<64x256xf32> to vector<32x256xf32>
      %181 = vector.extract_strided_slice %56 {offsets = [21, 0], sizes = [1, 256], strides = [1, 1]} : vector<31x256xf32> to vector<1x256xf32>
      %182 = vector.broadcast %181 : vector<1x256xf32> to vector<32x256xf32>
      %183 = arith.mulf %180, %182 : vector<32x256xf32>
      %184 = arith.addf %179, %183 : vector<32x256xf32>
      %185 = vector.extract_strided_slice %75 {offsets = [23, 0], sizes = [32, 256], strides = [1, 1]} : vector<64x256xf32> to vector<32x256xf32>
      %186 = vector.extract_strided_slice %56 {offsets = [22, 0], sizes = [1, 256], strides = [1, 1]} : vector<31x256xf32> to vector<1x256xf32>
      %187 = vector.broadcast %186 : vector<1x256xf32> to vector<32x256xf32>
      %188 = arith.mulf %185, %187 : vector<32x256xf32>
      %189 = arith.addf %184, %188 : vector<32x256xf32>
      %190 = vector.extract_strided_slice %75 {offsets = [24, 0], sizes = [32, 256], strides = [1, 1]} : vector<64x256xf32> to vector<32x256xf32>
      %191 = vector.extract_strided_slice %56 {offsets = [23, 0], sizes = [1, 256], strides = [1, 1]} : vector<31x256xf32> to vector<1x256xf32>
      %192 = vector.broadcast %191 : vector<1x256xf32> to vector<32x256xf32>
      %193 = arith.mulf %190, %192 : vector<32x256xf32>
      %194 = arith.addf %189, %193 : vector<32x256xf32>
      %195 = vector.extract_strided_slice %75 {offsets = [25, 0], sizes = [32, 256], strides = [1, 1]} : vector<64x256xf32> to vector<32x256xf32>
      %196 = vector.extract_strided_slice %56 {offsets = [24, 0], sizes = [1, 256], strides = [1, 1]} : vector<31x256xf32> to vector<1x256xf32>
      %197 = vector.broadcast %196 : vector<1x256xf32> to vector<32x256xf32>
      %198 = arith.mulf %195, %197 : vector<32x256xf32>
      %199 = arith.addf %194, %198 : vector<32x256xf32>
      %200 = vector.extract_strided_slice %75 {offsets = [26, 0], sizes = [32, 256], strides = [1, 1]} : vector<64x256xf32> to vector<32x256xf32>
      %201 = vector.extract_strided_slice %56 {offsets = [25, 0], sizes = [1, 256], strides = [1, 1]} : vector<31x256xf32> to vector<1x256xf32>
      %202 = vector.broadcast %201 : vector<1x256xf32> to vector<32x256xf32>
      %203 = arith.mulf %200, %202 : vector<32x256xf32>
      %204 = arith.addf %199, %203 : vector<32x256xf32>
      %205 = vector.extract_strided_slice %75 {offsets = [27, 0], sizes = [32, 256], strides = [1, 1]} : vector<64x256xf32> to vector<32x256xf32>
      %206 = vector.extract_strided_slice %56 {offsets = [26, 0], sizes = [1, 256], strides = [1, 1]} : vector<31x256xf32> to vector<1x256xf32>
      %207 = vector.broadcast %206 : vector<1x256xf32> to vector<32x256xf32>
      %208 = arith.mulf %205, %207 : vector<32x256xf32>
      %209 = arith.addf %204, %208 : vector<32x256xf32>
      %210 = vector.extract_strided_slice %75 {offsets = [28, 0], sizes = [32, 256], strides = [1, 1]} : vector<64x256xf32> to vector<32x256xf32>
      %211 = vector.extract_strided_slice %56 {offsets = [27, 0], sizes = [1, 256], strides = [1, 1]} : vector<31x256xf32> to vector<1x256xf32>
      %212 = vector.broadcast %211 : vector<1x256xf32> to vector<32x256xf32>
      %213 = arith.mulf %210, %212 : vector<32x256xf32>
      %214 = arith.addf %209, %213 : vector<32x256xf32>
      %215 = vector.extract_strided_slice %75 {offsets = [29, 0], sizes = [32, 256], strides = [1, 1]} : vector<64x256xf32> to vector<32x256xf32>
      %216 = vector.extract_strided_slice %56 {offsets = [28, 0], sizes = [1, 256], strides = [1, 1]} : vector<31x256xf32> to vector<1x256xf32>
      %217 = vector.broadcast %216 : vector<1x256xf32> to vector<32x256xf32>
      %218 = arith.mulf %215, %217 : vector<32x256xf32>
      %219 = arith.addf %214, %218 : vector<32x256xf32>
      %220 = vector.extract_strided_slice %75 {offsets = [30, 0], sizes = [32, 256], strides = [1, 1]} : vector<64x256xf32> to vector<32x256xf32>
      %221 = vector.extract_strided_slice %56 {offsets = [29, 0], sizes = [1, 256], strides = [1, 1]} : vector<31x256xf32> to vector<1x256xf32>
      %222 = vector.broadcast %221 : vector<1x256xf32> to vector<32x256xf32>
      %223 = arith.mulf %220, %222 : vector<32x256xf32>
      %224 = arith.addf %219, %223 : vector<32x256xf32>
      %225 = vector.extract_strided_slice %75 {offsets = [31, 0], sizes = [32, 256], strides = [1, 1]} : vector<64x256xf32> to vector<32x256xf32>
      %226 = vector.extract_strided_slice %56 {offsets = [30, 0], sizes = [1, 256], strides = [1, 1]} : vector<31x256xf32> to vector<1x256xf32>
      %227 = vector.broadcast %226 : vector<1x256xf32> to vector<32x256xf32>
      %228 = arith.mulf %225, %227 : vector<32x256xf32>
      %229 = arith.addf %224, %228 : vector<32x256xf32>
      %230 = vector.broadcast %57 : vector<1x256xf32> to vector<32x256xf32>
      %231 = arith.addf %229, %230 : vector<32x256xf32>
      %cst_45 = arith.constant 0.000000e+00 : f32
      %232 = vector.broadcast %cst_45 : f32 to vector<32x256xf32>
      %233 = arith.cmpf ogt, %231, %232 : vector<32x256xf32>
      %234 = vector.broadcast %58 : vector<1x256xf32> to vector<32x256xf32>
      %235 = arith.mulf %234, %231 : vector<32x256xf32>
      %236 = arith.select %233, %231, %235 : vector<32x256xi1>, vector<32x256xf32>
      %237 = arith.truncf %236 : vector<32x256xf32> to vector<32x256xbf16>
      %238 = arith.index_cast %73 : i32 to index
      %c0_46 = arith.constant 0 : index
      %239 = vector.load %arg14[%238, %c0_46] : memref<128x256xbf16, #tpu.memory_space<vmem>>, vector<32x256xbf16>
      tpu.vector_store %arg14[%238, %c0_46], %237 {strides = array<i32>} : memref<128x256xbf16, #tpu.memory_space<vmem>>, vector<32x256xbf16>,
    }
    %c4_i32_30 = arith.constant 4 : i32
    %c0_31 = arith.constant 0 : index
    %c0_32 = arith.constant 0 : index
    %60 = vector.load %arg14[%c0_31, %c0_32] : memref<128x256xbf16, #tpu.memory_space<vmem>>, vector<128x256xbf16>
    %c0_33 = arith.constant 0 : index
    %c0_34 = arith.constant 0 : index
    %61 = vector.load %arg10[%c0_33, %c0_34] : memref<256x128xbf16, #tpu.memory_space<vmem>>, vector<256x128xbf16>
    %cst_35 = arith.constant dense<0.000000e+00> : vector<128x128xf32>
    %62 = tpu.matmul %60, %61, %cst_35 {dimension_numbers = #tpu.dot_dimension_numbers<[1], [0], [0], [1], [0, 0, 1, 1], [], []>} : vector<128x256xbf16>, vector<256x128xbf16>, vector<128x128xf32> -> vector<128x128xf32>
    %c0_36 = arith.constant 0 : index
    %c0_37 = arith.constant 0 : index
    %63 = vector.load %arg11[%c0_36, %c0_37] : memref<1x128xf32, #tpu.memory_space<vmem>>, vector<1x128xf32>
    %64 = vector.broadcast %63 : vector<1x128xf32> to vector<128x128xf32>
    %65 = arith.addf %62, %64 : vector<128x128xf32>
    %c0_38 = arith.constant 0 : index
    %c0_39 = arith.constant 0 : index
    %c0_40 = arith.constant 0 : index
    %66 = vector.load %arg3[%c0_38, %c0_39, %c0_40] : memref<1x128x128xf32, #tpu.memory_space<vmem>>, vector<1x128x128xf32>
    %67 = vector.shape_cast %66 : vector<1x128x128xf32> to vector<128x128xf32>
    %68 = arith.addf %67, %65 : vector<128x128xf32>
    %c0_41 = arith.constant 0 : index
    %c0_42 = arith.constant 0 : index
    %c0_43 = arith.constant 0 : index
    %69 = vector.load %arg12[%c0_41, %c0_42, %c0_43] : memref<1x128x128xf32, #tpu.memory_space<vmem>>, vector<1x128x128xf32>
    %70 = vector.shape_cast %69 : vector<1x128x128xf32> to vector<128x128xf32>
    %71 = vector.shape_cast %68 : vector<128x128xf32> to vector<1x128x128xf32>
    tpu.vector_store %arg12[%c0_41, %c0_42, %c0_43], %71 {strides = array<i32>} : memref<1x128x128xf32, #tpu.memory_space<vmem>>, vector<1x128x128xf32>,
    return
  }
  func.func @transform_0(%arg0: i32, %arg1: i32) -> (i32, i32, i32) {
    %c8_i32 = arith.constant 8 : i32
    %0 = arith.muli %arg1, %c8_i32 : i32
    %c1_i32 = arith.constant 1 : i32
    %1 = arith.subi %0, %c1_i32 : i32
    %c0_i32 = arith.constant 0 : i32
    %2 = arith.maxsi %1, %c0_i32 : i32
    %c0_i32_0 = arith.constant 0 : i32
    %c0_i32_1 = arith.constant 0 : i32
    return %arg0, %2, %c0_i32_0 : i32, i32, i32
  }
  func.func @transform_1(%arg0: i32, %arg1: i32) -> (i32, i32, i32) {
    %c0_i32 = arith.constant 0 : i32
    %c0_i32_0 = arith.constant 0 : i32
    return %arg0, %arg1, %c0_i32 : i32, i32, i32
  }
  func.func @transform_2(%arg0: i32, %arg1: i32) -> (i32, i32, i32) {
    %c1_i32 = arith.constant 1 : i32
    %0 = arith.addi %arg1, %c1_i32 : i32
    %c8_i32 = arith.constant 8 : i32
    %1 = arith.muli %0, %c8_i32 : i32
    %c23_i32 = arith.constant 23 : i32
    %2 = arith.minsi %1, %c23_i32 : i32
    %c0_i32 = arith.constant 0 : i32
    %c0_i32_0 = arith.constant 0 : i32
    return %arg0, %2, %c0_i32 : i32, i32, i32
  }
  func.func @transform_3(%arg0: i32, %arg1: i32) -> (i32, i32) {
    %c0_i32 = arith.constant 0 : i32
    %c0_i32_0 = arith.constant 0 : i32
    %c0_i32_1 = arith.constant 0 : i32
    return %c0_i32, %c0_i32_0 : i32, i32
  }
  func.func @transform_4(%arg0: i32, %arg1: i32) -> (i32, i32) {
    %c0_i32 = arith.constant 0 : i32
    %c0_i32_0 = arith.constant 0 : i32
    %c0_i32_1 = arith.constant 0 : i32
    return %c0_i32, %c0_i32_0 : i32, i32
  }
  func.func @transform_5(%arg0: i32, %arg1: i32) -> (i32, i32) {
    %c0_i32 = arith.constant 0 : i32
    %c0_i32_0 = arith.constant 0 : i32
    %c0_i32_1 = arith.constant 0 : i32
    return %c0_i32, %c0_i32_0 : i32, i32
  }
  func.func @transform_6(%arg0: i32, %arg1: i32) -> (i32, i32) {
    %c0_i32 = arith.constant 0 : i32
    %c0_i32_0 = arith.constant 0 : i32
    %c0_i32_1 = arith.constant 0 : i32
    return %c0_i32, %c0_i32_0 : i32, i32
  }
  func.func @transform_7(%arg0: i32, %arg1: i32) -> (i32, i32) {
    %c0_i32 = arith.constant 0 : i32
    %c0_i32_0 = arith.constant 0 : i32
    %c0_i32_1 = arith.constant 0 : i32
    return %c0_i32, %c0_i32_0 : i32, i32
  }
  func.func @transform_8(%arg0: i32, %arg1: i32) -> (i32, i32) {
    %c0_i32 = arith.constant 0 : i32
    %c0_i32_0 = arith.constant 0 : i32
    %c0_i32_1 = arith.constant 0 : i32
    return %c0_i32, %c0_i32_0 : i32, i32
  }
  func.func @transform_9(%arg0: i32, %arg1: i32) -> (i32, i32) {
    %c0_i32 = arith.constant 0 : i32
    %c0_i32_0 = arith.constant 0 : i32
    %c0_i32_1 = arith.constant 0 : i32
    return %c0_i32, %c0_i32_0 : i32, i32
  }
  func.func @transform_10(%arg0: i32, %arg1: i32) -> (i32, i32, i32) {
    %c0_i32 = arith.constant 0 : i32
    %c0_i32_0 = arith.constant 0 : i32
    return %arg0, %arg1, %c0_i32 : i32, i32, i32
  }
}

</mosaic_0001>

<bundles_post_ra>
// kernel: tpu_custom_call.1
= control target key start
LH: loop header
LB: loop body
LE: loop exit
PB: predicated region body
PF: predicated region fallthrough
CT: control target
= control target key end

     0   :  { %s7273_s0 = inlined_call_operand.hbm [shape: f32[2,384,128], index: 0, kind: input, shape index: {}]   ;;  %s7274_s1 = inlined_call_operand.hbm [shape: f32[2,384,128], index: 1, kind: input, shape index: {}]   ;;  %s7275_s2 = inlined_call_operand.hbm [shape: f32[2,384,128], index: 2, kind: input, shape index: {}]   ;;  %s7276_s3 = inlined_call_operand.hbm [shape: bf16[128,512], index: 3, kind: input, shape index: {}]   ;;  %s7277_s4 = inlined_call_operand.vmem [shape: f32[1,512], index: 4, kind: input, shape index: {}]   ;;  %s7278_s5 = inlined_call_operand.hbm [shape: f32[31,256], index: 5, kind: input, shape index: {}]   ;;  %s7279_s6 = inlined_call_operand.vmem [shape: f32[1,256], index: 6, kind: input, shape index: {}]   ;;  %s7280_s7 = inlined_call_operand.vmem [shape: f32[1,256], index: 7, kind: input, shape index: {}]   ;;  %s7281_s8 = inlined_call_operand.hbm [shape: bf16[256,128], index: 8, kind: input, shape index: {}]   ;;  %s7282_s9 = inlined_call_operand.vmem [shape: f32[1,128], index: 9, kind: input, shape index: {}]   ;;  %s7283_s10 = inlined_call_operand.hbm [shape: f32[2,384,128], index: 10, kind: output, shape index: {}]  }
   0x1   :  { %7335 = sst [smem:[#allocation51_spill]] %s7273_s0 }
   0x2   :  { %7336 = sst [smem:[#allocation52_spill]] %s7274_s1 }
   0x3   :  { %7337 = sst [smem:[#allocation53_spill]] %s7275_s2 }
   0x4   :  { %7338 = sst [smem:[#allocation54_spill]] %s7276_s3 }
   0x5   :  { %7339 = sst [smem:[#allocation55_spill]] %s7277_s4 }
   0x6   :  { %7340 = sst [smem:[#allocation56_spill]] %s7278_s5 }
   0x7   :  { %7341 = sst [smem:[#allocation57_spill]] %s7279_s6 }
   0x8   :  { %7342 = sst [smem:[#allocation58_spill]] %s7280_s7 }
   0x9   :  { %7343 = sst [smem:[#allocation59_spill]] %s7281_s8 }
   0xa   :  { %7344 = sst [smem:[#allocation60_spill]] %s7282_s9 }
   0xb   :  { %7345 = sst [smem:[#allocation61_spill]] %s7283_s10 }
   0xc   :  { %15 = vsyncpa [#allocation5], 0 }
   0xd   :  { %17 = vsyncpa [#allocation5 + $0x1], 0 }
   0xe   :  { %18 = vsyncpa [#allocation8], 0 }
   0xf   :  { %20 = vsyncpa [#allocation8 + $0x1], 0 }
  0x10   :  { %21 = vsyncpa [#allocation11], 0 }
  0x11   :  { %22 = vsyncpa [#allocation14], 0 }
  0x12   :  { %23 = vsyncpa [#allocation6], 0 }
  0x13   :  { %25 = vsyncpa [#allocation6 + $0x1], 0  ;;  %s5305_s13 = smov 0   ;;  %s5307_s14 = smov 0  }
  0x14   :  { %s5309_s15 = smov 0   ;;  %s5311_s16 = smov 0  }
  0x15   :  { %s5313_s17 = smov 0   ;;  %s5315_s18 = smov 0  }
  0x16   :  { %s5317_s19 = smov 0   ;;  %s5319_s20 = smov 0  }
  0x17   :  { %s5321_s21 = smov 0   ;;  %s5323_s22 = smov 0  }
  0x18   :  { %s5325_s23 = smov 0   ;;  %s5327_s24 = smov 0  }
  0x19   :  { %s5329_s25 = smov 0   ;;  %s5331_s26 = smov 0  }
  0x1a LB: > { %7346 = sst [smem:[#allocation22_spill]] %s5174_s13  ;;  %s5376_s27 = sadd.s32 4294967295, %s5226_s26   ;;  %s5226_s26 = sphi %s5331_s26, %s31_s26   ;;  %s5222_s25 = sphi %s5329_s25, %s7473_s25   ;;  %s5218_s24 = sphi %s5327_s24, %s7472_s24   ;;  %s5214_s23 = sphi %s5325_s23, %s7471_s23   ;;  %s5210_s22 = sphi %s5323_s22, %s7470_s22   ;;  %s5206_s21 = sphi %s5321_s21, %s7469_s21   ;;  %s5202_s20 = sphi %s5319_s20, %s7468_s20   ;;  %s5198_s19 = sphi %s5317_s19, %s7467_s19   ;;  %s5194_s18 = sphi %s5315_s18, %s7466_s18   ;;  %s5190_s17 = sphi %s5313_s17, %s7465_s17   ;;  %s5186_s16 = sphi %s5311_s16, %s7464_s16   ;;  %s5182_s15 = sphi %s5309_s15, %s7463_s15   ;;  %s5178_s14 = sphi %s5307_s14, %s7462_s14   ;;  %s5174_s13 = sphi %s5305_s13, %s7455_s13  }
  0x1b   : > { %7347 = sst [smem:[#allocation23_spill]] %s5178_s14  ;;  %p4208_p0 = scmp.ge.s32.totalorder %s5226_s26, 1 }
  0x1c   : > { %7348 = sst [smem:[#allocation24_spill]] %s5182_s15  ;;  %p7299_p1 = scmp.eq.s32.totalorder %s5376_s27, 0 }
  0x1d   : > { %7349 = sst [smem:[#allocation25_spill]] %s5186_s16  ;;  %p310_p2 = scmp.eq.s32.totalorder %s5376_s27, 5 }
  0x1e   : > { %7350 = sst [smem:[#allocation26_spill]] %s5190_s17  ;;  %p323_p3 = scmp.lt.s32.totalorder %s5226_s26, 7 }
  0x1f   : > { %7351 = sst [smem:[#allocation27_spill]] %s5210_s22  ;;  %s5232_s29 = smov [#allocation10]  }
  0x20   : > { %7352 = sst [smem:[#allocation28_spill]] %s5214_s23  ;;  %p5382_p4 = pnand %p4208_p0, %p323_p3 }
  0x21   : > { %s335_s30 = sshll.u32 %s5232_s29, 4  ;;  %s336_s30 = int_to_ptr.vmem [resolvable:$true] %s335_s30 }
  0x22   : > { %s7353_s28 = scalar_select %p5382_p4, 1, 0 }
  0x23   : > { %p4471_p5 = pneg %p5382_p4  ;;  %s4911_s12 = scalar_lea.vmem %s336_s30, 4096 }
  0x24   : > { %7354 = sst [smem:[#allocation29_spill]] %s7353_s28  ;;  %p4912_p8 = scmp.ne.s32.totalorder %s336_s30, %s4911_s12 }
  0x25   : > { %p5390_p6 = pnand %p4471_p5, %p7299_p1  ;;  %p4919_p11 = scmp.lt.s32.totalorder %s336_s30, %s336_s30 }
  0x26   : > { %p4920_p12 = scmp.lt.s32.totalorder %s4911_s12, %s4911_s12 }
  0x27   : > { %p7300_p7 = pneg %p5390_p6 }
  0x28   : > { %p4921_p13 = por %p4920_p12, %p4919_p11 }
  0x29   : > { %p4914_p9 = pnand %p4912_p8, %p7300_p7 }
  0x2b   : > { %p4915_p10 = pneg %p4914_p9 }
  0x2d   : > { %p4922_p0 = pnand %p4921_p13, %p4915_p10 }
  0x2f   : > { %4925 = shalt.err (!%p4922_p0)
}
  0x30   : > { %s7286_s29 = smov 256   ;;  %s7287_s10 = smov 16  }
  0x31   : > { %s7356_s3 = sld [smem:[#allocation54_spill]]  ;;  %s4201_s9 = sadd.s32 4294967294, %s5226_s26  }
  0x32   : > { %s40_s7 = sadd.s32 1, %s5218_s24  ;;  %p7285_p5 = scmp.eq.s32.totalorder %s5226_s26, 0 }
  0x33   : > { %p5409_p3 = scmp.ge.s32.totalorder %s40_s7, 3  ;;  %p95_p8 = scmp.ne.s32.totalorder %s5194_s18, %s5190_s17 }
  0x34   : > { %p101_p9 = scmp.ne.s32.totalorder %s5190_s17, %s5186_s16  ;;  %p316_p10 = scmp.eq.s32.totalorder %s4201_s9, 5 }
  0x35   : > { %s7475_s7 = smov (%p5409_p3, %s40_s7), 0  ;;  %p5428_p11 = por %p95_p8, %p7285_p5 }
  0x36   : > { %7358 = sst [smem:[#allocation30_spill]] %s7475_s7  ;;  %p5434_p12 = por %p101_p9, %p7299_p1 }
  0x37   : > { %4474 = dma.hbm_to_vmem [thread:$0]  (!%p5390_p6), %s7356_s3, 4096, %s336_s30, [#allocation11], %s7286_s29, %s7286_s29, %s7287_s10  }
  0x38   : > { %s7360_s12 = scalar_select %p5434_p12, 1, 0 }
  0x39   : > { %p5440_p13 = por %p310_p2, %p95_p8  ;;  %p5444_p0 = por %p316_p10, %p101_p9 }
  0x3a   : > { %7361 = sst [smem:[#allocation31_spill]] %s7360_s12  ;;  %p7301_p5 = scmp.lt.s32.totalorder %s5226_s26, 6 }
  0x3b   : > { %s7362_s4 = scalar_select %p5440_p13, 1, 0 }
  0x3c   : > { %s7364_s23 = scalar_select %p5444_p0, 1, 0 }
  0x3d   : > { %7363 = sst [smem:[#allocation32_spill]] %s7362_s4  ;;  %s5450_s9 = smul.u32 48, %s5222_s25 }
  0x3e   : > { %7365 = sst [smem:[#allocation33_spill]] %s7364_s23  ;;  %s414_s22 = sand.u32 1, %s5226_s26  }
  0x3f   : > { %s416_s29 = sand.u32 1, %s5194_s18   ;;  %s4219_s3 = sshll.u32 %s5218_s24, 4 }
  0x40   : > { %s4218_s10 = sshll.u32 %s416_s29, 7  ;;  %s424_s16 = sadd.s32 %s5450_s9, %s4219_s3 }
  0x41   : > { %s418_s17 = scalar_lea.vmem [#allocation7], %s4218_s10  ;;  %s4220_s28 = sshll.u32 %s424_s16, 7 }
  0x42   : > { %s427_s12 = sshll.u32 %s418_s17, 4  ;;  %s7366_s1 = sld [smem:[#allocation52_spill]]  ;;  %s428_s12 = int_to_ptr.vmem [resolvable:$true] %s427_s12 }
  0x43   : > { %p5463_p2 = pnand %p7301_p5, %p5428_p11  ;;  %s5235_s14 = smov [#allocation12]  }
  0x44   : > { %s351_s15 = sshll.u32 %s5235_s14, 4  ;;  %s5467_s29 = scalar_lea.sflag [#allocation8], %s414_s22  ;;  %s352_s15 = int_to_ptr.vmem [resolvable:$true] %s351_s15 }
  0x45   : > { %p4928_p8 = pneg %p5463_p2  ;;  %s4939_s3 = scalar_lea.vmem %s428_s12, 2048 }
  0x46   : > { %p4940_p9 = scmp.ne.s32.totalorder %s428_s12, %s4939_s3  ;;  %s5236_s10 = smov [#allocation7]  }
  0x47   : > { %s4944_s2 = sshll.u32 %s5236_s10, 4  ;;  %s4945_s2 = int_to_ptr.vmem [resolvable:$false] %s4944_s2 }
  0x48   : > { %s426_s4 = scalar_lea.hbm %s7366_s1, %s4220_s28  ;;  %p4942_p10 = pnand %p4940_p9, %p4928_p8 }
  0x49   : > { %s4946_s13 = scalar_lea.vmem %s4945_s2, 4096  ;;  %p4947_p7 = scmp.lt.s32.totalorder %s428_s12, %s4945_s2 }
  0x4a   : > { %p4943_p1 = pneg %p4942_p10  ;;  %p4948_p11 = scmp.lt.s32.totalorder %s4946_s13, %s4939_s3 }
  0x4c   : > { %p4949_p5 = por %p4948_p11, %p4947_p7 }
  0x4e   : > { %p4950_p0 = pnand %p4949_p5, %p4943_p1 }
  0x50   : > { %4953 = shalt.err (!%p4950_p0)
}
  0x51   : > { %s7302_s16 = smov 128   ;;  %s7304_s14 = smov 8  }
  0x52   : > { %4487 = dma.hbm_to_vmem [thread:$0]  (!%p5463_p2), %s426_s4, 2048, %s428_s12, %s5467_s29, %s7302_s16, %s7302_s16, %s7304_s14  }
  0x53   : > { %s5239_s17 = smov [#allocation13]   ;;  %s4965_s28 = scalar_lea.vmem %s352_s15, 1024 }
  0x54   : > { %s370_s22 = sshll.u32 %s5239_s17, 4  ;;  %p4966_p8 = scmp.ne.s32.totalorder %s352_s15, %s4965_s28  ;;  %s371_s22 = int_to_ptr.vmem [resolvable:$true] %s370_s22 }
  0x55   : > { %p7368_p9 = pneg %p5390_p6  ;;  %p4973_p5 = scmp.lt.s32.totalorder %s352_s15, %s352_s15 }
  0x56   : > { %p4974_p0 = scmp.lt.s32.totalorder %s4965_s28, %s4965_s28 }
  0x57   : > { %p4968_p7 = pnand %p4966_p8, %p7368_p9 }
  0x58   : > { %p4975_p10 = por %p4974_p0, %p4973_p5 }
  0x59   : > { %p4969_p1 = pneg %p4968_p7 }
  0x5b   : > { %p4976_p11 = pnand %p4975_p10, %p4969_p1 }
  0x5d   : > { %4979 = shalt.err (!%p4976_p11)
}
  0x5e   : > { %s7369_s23 = smov 16   ;;  %s7370_s30 = smov 256  }
  0x5f   : > { %s7371_s5 = sld [smem:[#allocation56_spill]]  ;;  %s4991_s3 = scalar_lea.vmem %s371_s22, 2048 }
  0x60   : > { %p4992_p2 = scmp.ne.s32.totalorder %s371_s22, %s4991_s3  ;;  %p7372_p8 = pmov %p7368_p9 }
  0x61   : > { %p4999_p5 = scmp.lt.s32.totalorder %s371_s22, %s371_s22  ;;  %p5000_p1 = scmp.lt.s32.totalorder %s4991_s3, %s4991_s3 }
  0x62   : > { %p4994_p9 = pnand %p4992_p2, %p7372_p8 }
  0x63   : > { %p5001_p0 = por %p5000_p1, %p4999_p5 }
  0x64   : > { %p4995_p7 = pneg %p4994_p9 }
  0x65   : > { %4477 = dma.hbm_to_vmem [thread:$0]  (!%p5390_p6), %s7371_s5, 1024, %s352_s15, [#allocation11], %s7370_s30, %s7370_s30, %s7369_s23  }
  0x66   : > { %p5002_p10 = pnand %p5001_p0, %p4995_p7 }
  0x68   : > { %5005 = shalt.err (!%p5002_p10)
}
  0x69   : > { %s5240_s10 = smov 64   ;;  %s5241_s15 = smov 4  }
  0x6a   : > { %s7373_s8 = sld [smem:[#allocation59_spill]]  ;;  %s4202_s17 = sshll.u32 %s5218_s24, 3 }
  0x6b   : > { %s7374_s28 = sadd.s32 1, %s5222_s25  ;;  %s4203_s23 = sadd.s32 4294967295, %s4202_s17 }
  0x6c   : > { %s7477_s28 = smov (!%p5409_p3, %s7374_s28), %s5222_s25  ;;  %s4204_s30 = sshll.u32 %s7475_s7, 3 }
  0x6d   : > { %p45_p11 = scmp.ge.s32.totalorder %s7477_s28, 2  ;;  %p49_p2 = scmp.gt.s32.totalorder %s4203_s23, 0 }
  0x6e   : > { %s4205_s4 = sadd.s32 4294967295, %s4204_s30  ;;  %s60_s12 = sadd.s32 1, %s5206_s21 }
  0x6f   : > { %s7479_s28 = smov (%p45_p11, %s7477_s28), 0  ;;  %s7481_s23 = smov (!%p49_p2, %s4203_s23), 0 }
  0x70   : > { %4480 = dma.hbm_to_vmem [thread:$0]  (!%p5390_p6), %s7373_s8, 2048, %s371_s22, [#allocation14], %s5240_s10, %s5240_s10, %s5241_s15  }
  0x71   : > { %7375 = sst [smem:[#allocation34_spill]] %s7479_s28  ;;  %p53_p6 = scmp.gt.s32.totalorder %s4205_s4, 0 }
  0x72   : > { %s5508_s11 = ssub.s32 %s5222_s25, %s7479_s28  ;;  %p67_p3 = scmp.ne.s32.totalorder %s5206_s21, %s5202_s20 }
  0x73   : > { %p73_p8 = scmp.ne.s32.totalorder %s5202_s20, %s5198_s19  ;;  %s7483_s4 = smov (!%p53_p6, %s4205_s4), 0 }
  0x74   : > { %p7376_p9 = scmp.eq.s32.totalorder %s5226_s26, 0  ;;  %p7378_p5 = scmp.eq.s32.totalorder %s5376_s27, 0 }
  0x75   : > { %s56_s3 = ssub.s32 %s7481_s23, %s7483_s4  ;;  %s7380_s10 = ssub.s32 %s5218_s24, %s7475_s7 }
  0x76   : > { %p5516_p7 = por %p7376_p9, %p67_p3  ;;  %p5522_p1 = por %p7378_p5, %p73_p8 }
  0x77   : > { %s85_s15 = sor.u32 %s7380_s10, %s5508_s11  ;;  %s57_s2 = sor.u32 %s56_s3, %s5508_s11 }
  0x78   : > { %p86_p0 = scmp.eq.s32.totalorder %s85_s15, 0  ;;  %p58_p10 = scmp.eq.s32.totalorder %s57_s2, 0 }
  0x79   : > { %s5531_s19 = sadd.s32 8, %s4202_s17  ;;  %s7381_s13 = sadd.s32 1, %s5194_s18 }
  0x7a   : > { %s5536_s16 = scalar_select %p86_p0, %s5194_s18, %s7381_s13  }
  0x7b   : > { %s5539_s14 = scalar_select %p58_p10, %s5206_s21, %s60_s12  }
  0x7c   : > { %s5542_s1 = sadd.s32 8, %s4204_s30  ;;  %s387_s4 = sand.u32 1, %s5206_s21  }
  0x7d   : > { %s4213_s10 = sshll.u32 %s387_s4, 4  ;;  %s4216_s3 = sshll.u32 %s7481_s23, 1 }
  0x7e   : > { %s401_s15 = sadd.s32 %s5450_s9, %s4216_s3  ;;  %s391_s2 = scalar_lea.vmem [#allocation4], %s4213_s10 }
  0x7f   : > { %s404_s5 = sshll.u32 %s391_s2, 4  ;;  %s4217_s8 = sshll.u32 %s401_s15, 7  ;;  %s405_s5 = int_to_ptr.vmem [resolvable:$true] %s404_s5 }
  0x80   : > { %s7382_s0 = sld [smem:[#allocation51_spill]]  ;;  %p7383_p6 = scmp.lt.s32.totalorder %s5226_s26, 6 }
  0x81   : > { %s388_s30 = scalar_lea.sflag [#allocation5], %s387_s4  ;;  %s5019_s23 = scalar_lea.vmem %s405_s5, 256 }
  0x82   : > { %p5554_p3 = pnand %p7383_p6, %p5516_p7  ;;  %p5020_p9 = scmp.ne.s32.totalorder %s405_s5, %s5019_s23 }
  0x83   : > { %s5242_s10 = smov [#allocation4]  }
  0x84   : > { %p5008_p8 = pneg %p5554_p3  ;;  %s5024_s3 = sshll.u32 %s5242_s10, 4  ;;  %s5025_s3 = int_to_ptr.vmem [resolvable:$false] %s5024_s3 }
  0x85   : > { %s5026_s15 = scalar_lea.vmem %s5025_s3, 512  ;;  %p5027_p10 = scmp.lt.s32.totalorder %s405_s5, %s5025_s3 }
  0x86   : > { %s403_s13 = scalar_lea.hbm %s7382_s0, %s4217_s8  ;;  %p5022_p5 = pnand %p5020_p9, %p5008_p8 }
  0x87   : > { %p5028_p2 = scmp.lt.s32.totalorder %s5026_s15, %s5019_s23 }
  0x88   : > { %p5023_p0 = pneg %p5022_p5 }
  0x89   : > { %p5029_p11 = por %p5028_p2, %p5027_p10 }
  0x8b   : > { %p5030_p13 = pnand %p5029_p11, %p5023_p0 }
  0x8d   : > { %5033 = shalt.err (!%p5030_p13)
}
  0x8e   : > { %s7385_s8 = smov 8   ;;  %s7386_s28 = smov 128  }
  0x8f   : > { %s7387_s6 = sld [smem:[#allocation24_spill]]  ;;  %p7390_p13 = scmp.lt.s32.totalorder %s5531_s19, 23 }
  0x90   : > { %s7388_s4 = sld [smem:[#allocation23_spill]]  ;;  %p7391_p7 = scmp.lt.s32.totalorder %s5542_s1, 23 }
  0x91   : > { %s7389_s2 = sld [smem:[#allocation22_spill]]  ;;  %s7485_s19 = smov (!%p7390_p13, %s5531_s19), 23 }
  0x92   : > { %4484 = dma.hbm_to_vmem [thread:$0]  (!%p5554_p3), %s403_s13, 256, %s405_s5, %s388_s30, %s7386_s28, %s7386_s28, %s7385_s8  }
  0x93   : > { %s7487_s1 = smov (!%p7391_p7, %s5542_s1), 23  ;;  %p7392_p6 = scmp.eq.s32.totalorder %s5226_s26, 0 }
  0x94   : > { %s120_s12 = ssub.s32 %s7485_s19, %s7487_s1  ;;  %p7393_p5 = scmp.eq.s32.totalorder %s5376_s27, 0 }
  0x95   : > { %s124_s17 = sadd.s32 1, %s7387_s6  ;;  %s439_s23 = sand.u32 1, %s7387_s6  }
  0x96   : > { %p131_p11 = scmp.ne.s32.totalorder %s7387_s6, %s7388_s4  ;;  %s121_s10 = sor.u32 %s120_s12, %s5508_s11 }
  0x97   : > { %p137_p2 = scmp.ne.s32.totalorder %s7388_s4, %s7389_s2  ;;  %p122_p9 = scmp.eq.s32.totalorder %s121_s10, 0 }
  0x98   : > { %p133_p8 = por %p131_p11, %p7392_p6  ;;  %s4221_s5 = sshll.u32 %s439_s23, 4 }
  0x99   : > { %p5582_p0 = por %p137_p2, %p7393_p5  ;;  %s4223_s13 = sshll.u32 %s7485_s19, 1 }
  0x9a   : > { %s7489_s6 = smov (!%p122_p9, %s7387_s6), %s124_s17  ;;  %s451_s30 = sadd.s32 %s5450_s9, %s4223_s13 }
  0x9b   : > { %s7394_s3 = scalar_select %p5582_p0, 1, 0 }
  0x9c   : > { %s4224_s15 = sshll.u32 %s451_s30, 7  ;;  %s441_s0 = scalar_lea.vmem [#allocation9], %s4221_s5 }
  0x9d   : > { %s454_s4 = sshll.u32 %s441_s0, 4  ;;  %s7395_s7 = sld [smem:[#allocation53_spill]]  ;;  %s455_s4 = int_to_ptr.vmem [resolvable:$true] %s454_s4 }
  0x9e   : > { %p7396_p3 = scmp.lt.s32.totalorder %s5226_s26, 6  ;;  %s5047_s19 = scalar_lea.vmem %s455_s4, 256 }
  0x9f   : > { %p5048_p7 = scmp.ne.s32.totalorder %s455_s4, %s5047_s19  ;;  %s5243_s9 = smov [#allocation9]  }
  0xa0   : > { %p5595_p10 = pnand %p7396_p3, %p133_p8  ;;  %s5052_s17 = sshll.u32 %s5243_s9, 4  ;;  %s5053_s17 = int_to_ptr.vmem [resolvable:$false] %s5052_s17 }
  0xa1   : > { %s5054_s0 = scalar_lea.vmem %s5053_s17, 512  ;;  %p5055_p6 = scmp.lt.s32.totalorder %s455_s4, %s5053_s17 }
  0xa2   : > { %p5036_p13 = pneg %p5595_p10  ;;  %p5056_p9 = scmp.lt.s32.totalorder %s5054_s0, %s5047_s19 }
  0xa3   : > { %s453_s11 = scalar_lea.hbm %s7395_s7, %s4224_s15 }
  0xa4   : > { %p5050_p11 = pnand %p5048_p7, %p5036_p13  ;;  %p5057_p5 = por %p5056_p9, %p5055_p6 }
  0xa6   : > { %p5051_p2 = pneg %p5050_p11 }
  0xa8   : > { %p5058_p0 = pnand %p5057_p5, %p5051_p2 }
  0xaa   : > { %5061 = shalt.err (!%p5058_p0)
}
  0xab   : > { %4490 = dma.hbm_to_vmem [thread:$0]  (!%p5595_p10), %s453_s11, 256, %s455_s4, %s5467_s29, %s7386_s28, %s7386_s28, %s7385_s8  }
  0xac   : > { %466 = sbr.rel (%p5382_p4) target bundleno = 1241 (0x4d9), region = 60 }
  0xb1   : > { %s468_s23 = sand.u32 1, %s5202_s20  }
  0xb2   : > { %s5610_s10 = sshll.u32 %s468_s23, 4  ;;  %s469_s5 = scalar_lea.sflag [#allocation5], %s468_s23 }
  0xb3   : > { %s472_s13 = scalar_lea.vmem [#allocation4], %s5610_s10 }
  0xb4   : > { %5149 = dma.done.wait (%p5522_p1), %s469_s5, 256  }
  0xb5   : > { %5151 = vsyncadd (%p5522_p1), %s469_s5, 4294967040  ;;  %s7399_s30 = sld [smem:[#allocation26_spill]]  ;;  %s477_s8 = sand.u32 1, %s5376_s27  }
  0xb6   : > { %s478_s4 = scalar_lea.sflag [#allocation8], %s477_s8 }
  0xbb   : > { %s479_s28 = sand.u32 1, %s7399_s30  }
  0xbc   : > { %s5621_s15 = sshll.u32 %s479_s28, 7 }
  0xbd   : > { %s5624_s2 = scalar_lea.vmem [#allocation7], %s5621_s15 }
  0xbe   : > { %5153 = dma.done.wait (%p5434_p12), %s478_s4, 2048  }
  0xbf   : > { %5155 = vsyncadd (%p5434_p12), %s478_s4, 4294965248  ;;  %s7401_s22 = sld [smem:[#allocation23_spill]]  ;;  %p7402_p4 = scmp.ne.s32.totalorder %s7394_s3, 0 }
  0xc5   : > { %s488_s1 = sand.u32 1, %s7401_s22  }
  0xc6   : > { %s5631_s11 = sshll.u32 %s488_s1, 4 }
  0xc7   : > { %s490_s12 = scalar_lea.vmem [#allocation9], %s5631_s11 }
  0xc8   : > { %5157 = dma.done.wait (%p7402_p4), %s478_s4, 256  }
  0xc9   : > { %5159 = vsyncadd (%p7402_p4), %s478_s4, 4294967040  ;;  %p7403_p1 = scmp.eq.s32.totalorder %s5376_s27, 0 }
  0xcb   : > { %5161 = dma.done.wait (%p7403_p1), [#allocation11], 5120   ;;  %p7404_p8 = pmov %p7403_p1 }
  0xcc   : > { %p7405_p12 = pmov %p7403_p1 }
  0xcd   : > { %5163 = vsyncadd (%p7404_p8), [#allocation11], 4294962176 }
  0xce   : > { %5165 = dma.done.wait (%p7405_p12), [#allocation14], 2048   ;;  %p7406_p0 = pmov %p7403_p1 }
  0xcf   : > { %v5244_v0 = vmov 0   ;;  %v5648_v1 = vld [vmem:[#allocation10 + $0xe4] ss:$16 sps:$4 sm:$0xff]   ;;  %v5650_v2 = vld [vmem:[#allocation10 + $0xe0] ss:$16 sps:$4 sm:$0xff]   ;;  %v604_v18 = vld [vmem:[%s5624_s2 + $0x48] sm:$0xff] }
  0xd0   : > { %5167 = vsyncadd (%p7406_p0), [#allocation14], 4294965248  ;;  %872 = vmatprep.mubr.bf16.mxu1 %v5244_v0  ;;  %832 = vmatprep.mubr.bf16.mxu0 %v5244_v0  ;;  %v5653_v3 = vld [vmem:[#allocation10 + $0xc4] ss:$16 sps:$4 sm:$0xff]   ;;  %v5657_v4 = vld [vmem:[#allocation10 + $0xc0] ss:$16 sps:$4 sm:$0xff]  }
  0xd1   : > { %4431 = vmatprep.subr.bf16.mxu1 %v5648_v1  ;;  %800 = vmatprep.subr.bf16.mxu0 %v5648_v1  ;;  %v5661_v5 = vld [vmem:[#allocation10 + $0xa4] ss:$16 sps:$4 sm:$0xff]   ;;  %v5665_v6 = vld [vmem:[#allocation10 + $0xa0] ss:$16 sps:$4 sm:$0xff]   ;;  %v5711_v19 = vld [vmem:[#allocation10 + $0xec] ss:$16 sps:$4 sm:$0xff]  }
  0xd2   : > { %4439 = vmatpush1.bf16.msra.mxu1 %v5650_v2  ;;  %801 = vmatpush1.bf16.msra.mxu0 %v5650_v2  ;;  %v5669_v7 = vld [vmem:[#allocation10 + $0x84] ss:$16 sps:$4 sm:$0xff]   ;;  %v5673_v8 = vld [vmem:[#allocation10 + $0x80] ss:$16 sps:$4 sm:$0xff]   ;;  %v596_v21 = vld [vmem:[%s5624_s2 + $0x8] sm:$0xff]  ;;  %s7410_s19 = sld [smem:[#allocation55_spill]] }
  0xd3   : > { %4432 = vmatprep.subr.bf16.mxu1 %v5653_v3  ;;  %802 = vmatprep.subr.bf16.mxu0 %v5653_v3  ;;  %v5677_v9 = vld [vmem:[#allocation10 + $0x64] ss:$16 sps:$4 sm:$0xff]   ;;  %v5681_v10 = vld [vmem:[#allocation10 + $0x60] ss:$16 sps:$4 sm:$0xff]   ;;  %v5719_v23 = vld [vmem:[#allocation10 + $0xe8] ss:$16 sps:$4 sm:$0xff]  }
  0xd4   : > { %v5685_v11 = vld [vmem:[#allocation10 + $0x44] ss:$16 sps:$4 sm:$0xff]   ;;  %v5689_v12 = vld [vmem:[#allocation10 + $0x40] ss:$16 sps:$4 sm:$0xff]   ;;  %v5723_v24 = vld [vmem:[#allocation10 + $0xcc] ss:$16 sps:$4 sm:$0xff]  }
  0xd5   : > { %v5693_v13 = vld [vmem:[#allocation10 + $0x24] ss:$16 sps:$4 sm:$0xff]   ;;  %v5697_v14 = vld [vmem:[#allocation10 + $0x20] ss:$16 sps:$4 sm:$0xff]   ;;  %v5731_v26 = vld [vmem:[#allocation10 + $0xc8] ss:$16 sps:$4 sm:$0xff]  }
  0xd6   : > { %4440 = vmatpush1.bf16.msra.mxu1 %v5657_v4  ;;  %803 = vmatpush1.bf16.msra.mxu0 %v5657_v4  ;;  %v5701_v15 = vld [vmem:[#allocation10 + $0x4] ss:$16 sps:$4 sm:$0xff]   ;;  %v5705_v16 = vld [vmem:[#allocation10] ss:$16 sps:$4 sm:$0xff]   ;;  %v606_v28 = vld [vmem:[%s5624_s2 + $0x58] sm:$0xff]  ;;  %s6234_s9 = scalar_lea.vmem [#allocation15], %s5621_s15 }
  0xd7   : > { %4433 = vmatprep.subr.bf16.mxu1 %v5661_v5  ;;  %804 = vmatprep.subr.bf16.mxu0 %v5661_v5  ;;  %v603_v17 = vld [vmem:[%s5624_s2 + $0x40] sm:$0xff]  ;;  %v605_v27 = vld [vmem:[%s5624_s2 + $0x50] sm:$0xff]  ;;  %v5737_v29 = vld [vmem:[#allocation10 + $0xac] ss:$16 sps:$4 sm:$0xff]   ;;  %s7412_s17 = sld [smem:[#allocation27_spill]] }
  0xd8   : > { %v595_v20 = vld [vmem:[%s5624_s2] sm:$0xff]  ;;  %v5716_v22 = vpack.c.bf16 %v604_v18, %v603_v17  ;;  %v597_v30 = vld [vmem:[%s5624_s2 + $0x10] sm:$0xff]  ;;  %v598_v31 = vld [vmem:[%s5624_s2 + $0x18] sm:$0xff]  ;;  %v5743_v32 = vpack.c.bf16 %v606_v28, %v605_v27 }
  0xd9   : > { %v5725_v25 = vpack.c.bf16 %v596_v21, %v595_v20  ;;  %v5747_v33 = vld [vmem:[#allocation10 + $0xa8] ss:$16 sps:$4 sm:$0xff]   ;;  %v5750_v34 = vld [vmem:[#allocation10 + $0x8c] ss:$16 sps:$4 sm:$0xff]   ;;  %v5752_v35 = vpack.c.bf16 %v598_v31, %v597_v30  ;;  %v607_v37 = vld [vmem:[%s5624_s2 + $0x60] sm:$0xff] }
  0xda   : > { %4441 = vmatpush1.bf16.msra.mxu1 %v5665_v6  ;;  %805 = vmatpush1.bf16.msra.mxu0 %v5665_v6  ;;  %v5758_v36 = vld [vmem:[#allocation10 + $0x88] ss:$16 sps:$4 sm:$0xff]   ;;  %v5764_v39 = vld [vmem:[#allocation10 + $0x6c] ss:$16 sps:$4 sm:$0xff]   ;;  %v599_v40 = vld [vmem:[%s5624_s2 + $0x20] sm:$0xff] }
  0xdb   : > { %4434 = vmatprep.subr.bf16.mxu1 %v5669_v7  ;;  %806 = vmatprep.subr.bf16.mxu0 %v5669_v7  ;;  %v608_v38 = vld [vmem:[%s5624_s2 + $0x68] sm:$0xff]  ;;  %v609_v47 = vld [vmem:[%s5624_s2 + $0x70] sm:$0xff]  ;;  %v610_v48 = vld [vmem:[%s5624_s2 + $0x78] sm:$0xff] }
  0xdc   : > { %v600_v41 = vld [vmem:[%s5624_s2 + $0x28] sm:$0xff]  ;;  %v5770_v42 = vpack.c.bf16 %v608_v38, %v607_v37  ;;  %v601_v50 = vld [vmem:[%s5624_s2 + $0x30] sm:$0xff]  ;;  %v602_v51 = vld [vmem:[%s5624_s2 + $0x38] sm:$0xff]  ;;  %v5794_v52 = vpack.c.bf16 %v610_v48, %v609_v47 }
  0xdd   : > { %v5774_v43 = vld [vmem:[#allocation10 + $0x68] ss:$16 sps:$4 sm:$0xff]   ;;  %v5778_v44 = vld [vmem:[#allocation10 + $0x4c] ss:$16 sps:$4 sm:$0xff]   ;;  %v613_v45 = vpack.c.bf16 %v600_v41, %v599_v40  ;;  %v614_v55 = vpack.c.bf16 %v602_v51, %v601_v50  ;;  %v1314_v57 = vld [vmem:[%s472_s13] sm:$0xff]  ;;  %p4305_p3 = scmp.ne.s32.totalorder %s7412_s17, 0 }
  0xde   : > { %4442 = vmatpush1.bf16.msra.mxu1 %v5673_v8  ;;  %807 = vmatpush1.bf16.msra.mxu0 %v5673_v8  ;;  %v5782_v46 = vld [vmem:[#allocation10 + $0x48] ss:$16 sps:$4 sm:$0xff]   ;;  %v5788_v49 = vld [vmem:[#allocation10 + $0x2c] ss:$16 sps:$4 sm:$0xff]   ;;  %v1439_v60 = vld [vmem:[%s490_s12] sm:$0xff] }
  0xdf   : > { %4435 = vmatprep.subr.bf16.mxu1 %v5677_v9  ;;  %808 = vmatprep.subr.bf16.mxu0 %v5677_v9  ;;  %v5798_v53 = vld [vmem:[#allocation10 + $0x28] ss:$16 sps:$4 sm:$0xff]   ;;  %v5801_v54 = vld [vmem:[#allocation10 + $0xc] ss:$16 sps:$4 sm:$0xff]   ;;  %v5929_v17 = vld [vmem:[%s7410_s19] sm:$0xf] }
  0xe0   : > { %v5806_v56 = vld [vmem:[#allocation10 + $0x8] ss:$16 sps:$4 sm:$0xff]  }
  0xe1   : > { %v1315_v58 = vld [vmem:[%s472_s13 + $0x8] sm:$0xff] }
  0xe2   : > { %4443 = vmatpush1.bf16.msra.mxu1 %v5681_v10  ;;  %809 = vmatpush1.bf16.msra.mxu0 %v5681_v10  ;;  %v1316_v59 = vpack.c.bf16 %v1315_v58, %v1314_v57  ;;  %v1440_v61 = vld [vmem:[%s490_s12 + $0x8] sm:$0xff] }
  0xe3   : > { %4436 = vmatprep.subr.bf16.mxu1 %v5685_v11  ;;  %810 = vmatprep.subr.bf16.mxu0 %v5685_v11  ;;  %v1441_v62 = vpack.c.bf16 %v1440_v61, %v1439_v60 }
  0xe6   : > { %4444 = vmatpush1.bf16.msra.mxu1 %v5689_v12  ;;  %811 = vmatpush1.bf16.msra.mxu0 %v5689_v12 }
  0xe7   : > { %4437 = vmatprep.subr.bf16.mxu1 %v5693_v13  ;;  %812 = vmatprep.subr.bf16.mxu0 %v5693_v13 }
  0xea   : > { %4445 = vmatpush1.bf16.msra.mxu1 %v5697_v14  ;;  %813 = vmatpush1.bf16.msra.mxu0 %v5697_v14 }
  0xeb   : > { %4438 = vmatprep.subr.bf16.mxu1 %v5701_v15  ;;  %814 = vmatprep.subr.bf16.mxu0 %v5701_v15 }
  0xee   : > { %4446 = vmatpush1.bf16.msra.mxu1 %v5705_v16  ;;  %815 = vmatpush1.bf16.msra.mxu0 %v5705_v16 }
  0xef   : > { %913 = vmatprep.subr.bf16.mxu1 %v5711_v19  ;;  %1317 = vmatprep.subr.bf16.mxu0 %v5648_v1 }
  0xf1   : > { %873 = vmatmul.mubr.bf16.vlgmr.msra.gmra.mxu1 %v5716_v22  ;;  %833 = vmatmul.mubr.bf16.vlgmr.msra.gmra.mxu0 %v5725_v25 }
  0xf2   : > { %914 = vmatpush1.bf16.msra.mxu1 %v5719_v23  ;;  %882 = vmatprep.mubr.bf16.mxu1 %v5244_v0 }
  0xf3   : > { %915 = vmatprep.subr.bf16.mxu1 %v5723_v24  ;;  %842 = vmatprep.mubr.bf16.mxu0 %v5244_v0 }
  0xf4   : > { %1318 = vmatpush1.bf16.msra.mxu0 %v5650_v2 }
  0xf5   : > { %1319 = vmatprep.subr.bf16.mxu0 %v5653_v3 }
  0xf6   : > { %916 = vmatpush1.bf16.msra.mxu1 %v5731_v26 }
  0xf7   : > { %917 = vmatprep.subr.bf16.mxu1 %v5737_v29 }
  0xf8   : > { %1320 = vmatpush1.bf16.msra.mxu0 %v5657_v4 }
  0xf9   : > { %883 = vmatmul.mubr.bf16.gmra.mxu1 %v5743_v32  ;;  %843 = vmatmul.mubr.bf16.gmra.mxu0 %v5752_v35 }
  0xfa   : > { %918 = vmatpush1.bf16.msra.mxu1 %v5747_v33  ;;  %892 = vmatprep.mubr.bf16.mxu1 %v5244_v0 }
  0xfb   : > { %919 = vmatprep.subr.bf16.mxu1 %v5750_v34  ;;  %852 = vmatprep.mubr.bf16.mxu0 %v5244_v0 }
  0xfc   : > { %1321 = vmatprep.subr.bf16.mxu0 %v5661_v5 }
  0xfd   : > { %1322 = vmatpush1.bf16.msra.mxu0 %v5665_v6 }
  0xfe   : > { %920 = vmatpush1.bf16.msra.mxu1 %v5758_v36  ;;  %1323 = vmatprep.subr.bf16.mxu0 %v5669_v7 }
  0xff   : > { %921 = vmatprep.subr.bf16.mxu1 %v5764_v39 }
 0x101   : > { %893 = vmatmul.mubr.bf16.gmra.mxu1 %v5770_v42  ;;  %853 = vmatmul.mubr.bf16.gmra.mxu0 %v613_v45 }
 0x102   : > { %922 = vmatpush1.bf16.msra.mxu1 %v5774_v43  ;;  %902 = vmatprep.mubr.bf16.mxu1 %v5244_v0 }
 0x103   : > { %923 = vmatprep.subr.bf16.mxu1 %v5778_v44  ;;  %862 = vmatprep.mubr.bf16.mxu0 %v5244_v0 }
 0x104   : > { %1324 = vmatpush1.bf16.msra.mxu0 %v5673_v8 }
 0x105   : > { %1325 = vmatprep.subr.bf16.mxu0 %v5677_v9 }
 0x106   : > { %924 = vmatpush1.bf16.msra.mxu1 %v5782_v46 }
 0x107   : > { %925 = vmatprep.subr.bf16.mxu1 %v5788_v49 }
 0x108   : > { %1326 = vmatpush1.bf16.msra.mxu0 %v5681_v10 }
 0x109   : > { %903 = vmatmul.mubr.bf16.gmra.mxu1 %v5794_v52  ;;  %863 = vmatmul.mubr.bf16.gmra.mxu0 %v614_v55 }
 0x10a   : > { %926 = vmatpush1.bf16.msra.mxu1 %v5798_v53  ;;  %945 = vmatprep.mubr.bf16.mxu1 %v5244_v0 }
 0x10b   : > { %927 = vmatprep.subr.bf16.mxu1 %v5801_v54  ;;  %1327 = vmatprep.subr.bf16.mxu0 %v5685_v11 }
 0x10c   : > { %1328 = vmatpush1.bf16.msra.mxu0 %v5689_v12  ;;  %1349 = vmatprep.mubr.bf16.mxu0 %v5244_v0 }
 0x10d   : > { %1329 = vmatprep.subr.bf16.mxu0 %v5693_v13 }
 0x10e   : > { %928 = vmatpush1.bf16.msra.mxu1 %v5806_v56 }
 0x10f   : > { %1360 = vmatprep.subr.bf16.mxu1 %v5711_v19 }
 0x110   : > { %1330 = vmatpush1.bf16.msra.mxu0 %v5697_v14 }
 0x111   : > { %946 = vmatmul.mubr.bf16.vlgmr.msra.gmra.mxu1 %v5725_v25  ;;  %1331 = vmatprep.subr.bf16.mxu0 %v5701_v15 }
 0x112   : > { %1361 = vmatpush1.bf16.msra.mxu1 %v5719_v23  ;;  %955 = vmatprep.mubr.bf16.mxu1 %v5244_v0 }
 0x113   : > { %1362 = vmatprep.subr.bf16.mxu1 %v5723_v24 }
 0x114   : > { %1332 = vmatpush1.bf16.msra.mxu0 %v5705_v16 }
 0x115   : > { %1442 = vmatprep.subr.bf16.mxu0 %v5648_v1 }
 0x116   : > { %1363 = vmatpush1.bf16.msra.mxu1 %v5731_v26 }
 0x117   : > { %1364 = vmatprep.subr.bf16.mxu1 %v5737_v29  ;;  %1350 = vmatmul.mubr.bf16.vlgmr.msra.gmra.mxu0 %v1316_v59 }
 0x118   : > { %1443 = vmatpush1.bf16.msra.mxu0 %v5650_v2  ;;  %1474 = vmatprep.mubr.bf16.mxu0 %v5244_v0 }
 0x119   : > { %956 = vmatmul.mubr.bf16.gmra.mxu1 %v5752_v35  ;;  %1444 = vmatprep.subr.bf16.mxu0 %v5653_v3 }
 0x11a   : > { %965 = vmatprep.mubr.bf16.mxu1 %v5244_v0  ;;  %1365 = vmatpush1.bf16.msra.mxu1 %v5747_v33 }
 0x11b   : > { %1366 = vmatprep.subr.bf16.mxu1 %v5750_v34 }
 0x11c   : > { %1445 = vmatpush1.bf16.msra.mxu0 %v5657_v4 }
 0x11d   : > { %1446 = vmatprep.subr.bf16.mxu0 %v5661_v5 }
 0x11e   : > { %1367 = vmatpush1.bf16.msra.mxu1 %v5758_v36 }
 0x11f   : > { %1368 = vmatprep.subr.bf16.mxu1 %v5764_v39 }
 0x120   : > { %1447 = vmatpush1.bf16.msra.mxu0 %v5665_v6 }
 0x121   : > { %966 = vmatmul.mubr.bf16.gmra.mxu1 %v613_v45  ;;  %1448 = vmatprep.subr.bf16.mxu0 %v5669_v7 }
 0x122   : > { %975 = vmatprep.mubr.bf16.mxu1 %v5244_v0  ;;  %1369 = vmatpush1.bf16.msra.mxu1 %v5774_v43 }
 0x123   : > { %1370 = vmatprep.subr.bf16.mxu1 %v5778_v44 }
 0x124   : > { %1449 = vmatpush1.bf16.msra.mxu0 %v5673_v8 }
 0x125   : > { %1450 = vmatprep.subr.bf16.mxu0 %v5677_v9  ;;  %v620_v9 = vlaneseq }
 0x126   : > { %1371 = vmatpush1.bf16.msra.mxu1 %v5782_v46 }
 0x127   : > { %1372 = vmatprep.subr.bf16.mxu1 %v5788_v49 }
 0x128   : > { %1451 = vmatpush1.bf16.msra.mxu0 %v5681_v10 }
 0x129   : > { %976 = vmatmul.mubr.bf16.gmra.mxu1 %v614_v55  ;;  %1452 = vmatprep.subr.bf16.mxu0 %v5685_v11 }
 0x12a   : > { %985 = vmatprep.mubr.bf16.mxu1 %v5244_v0  ;;  %1373 = vmatpush1.bf16.msra.mxu1 %v5798_v53 }
 0x12b   : > { %1374 = vmatprep.subr.bf16.mxu1 %v5801_v54 }
 0x12c   : > { %1453 = vmatpush1.bf16.msra.mxu0 %v5689_v12  ;;  %v5914_v12 = vshrl.u32 %v620_v9, 7 }
 0x12d   : > { %1454 = vmatprep.subr.bf16.mxu0 %v5693_v13 }
 0x12e   : > { %1375 = vmatpush1.bf16.msra.mxu1 %v5806_v56  ;;  %7407 = vst [vmem:[#allocation35_spill] sm:$0xff] %v5914_v12 }
 0x12f   : > { %1485 = vmatprep.subr.bf16.mxu1 %v5711_v19 }
 0x130   : > { %1455 = vmatpush1.bf16.msra.mxu0 %v5697_v14  ;;  %v5919_v14 = vsub.s32 2, %v5914_v12 }
 0x131   : > { %986 = vmatmul.mubr.bf16.gmra.mxu1 %v5716_v22  ;;  %1456 = vmatprep.subr.bf16.mxu0 %v5701_v15 }
 0x132   : > { %995 = vmatprep.mubr.bf16.mxu1 %v5244_v0  ;;  %7408 = vst [vmem:[#allocation36_spill] sm:$0xff] %v5919_v14  ;;  %v5935_v19 = vrot.slane %v5929_v17, %v5919_v14 }
 0x134   : > { %1457 = vmatpush1.bf16.msra.mxu0 %v5705_v16  ;;  %v5924_v16 = vsub.s32 3, %v5914_v12 }
 0x136   : > { %7409 = vst [vmem:[#allocation37_spill] sm:$0xff] %v5924_v16  ;;  %v5941_v21 = vrot.slane %v5929_v17, %v5924_v16 }
 0x137   : > { %1475 = vmatmul.mubr.bf16.vlgmr.msra.gmra.mxu0 %v1441_v62 }
 0x139   : > { %996 = vmatmul.mubr.bf16.gmra.mxu1 %v5743_v32 }
 0x13a   : > { %1005 = vmatprep.mubr.bf16.mxu1 %v5244_v0 }
 0x141   : > { %1006 = vmatmul.mubr.bf16.gmra.mxu1 %v5770_v42 }
 0x142   : > { %1015 = vmatprep.mubr.bf16.mxu1 %v5244_v0 }
 0x149   : > { %1016 = vmatmul.mubr.bf16.gmra.mxu1 %v5794_v52 }
 0x14a   : > { %1392 = vmatprep.mubr.bf16.mxu1 %v5244_v0 }
 0x151   : > { %1393 = vmatmul.mubr.bf16.vlgmr.msra.gmra.mxu1 %v1316_v59 }
 0x152   : > { %1486 = vmatpush1.bf16.msra.mxu1 %v5719_v23  ;;  %1517 = vmatprep.mubr.bf16.mxu1 %v5244_v0 }
 0x153   : > { %1487 = vmatprep.subr.bf16.mxu1 %v5723_v24 }
 0x156   : > { %1488 = vmatpush1.bf16.msra.mxu1 %v5731_v26 }
 0x157   : > { %1489 = vmatprep.subr.bf16.mxu1 %v5737_v29 }
 0x15a   : > { %1490 = vmatpush1.bf16.msra.mxu1 %v5747_v33 }
 0x15b   : > { %1491 = vmatprep.subr.bf16.mxu1 %v5750_v34 }
 0x15e   : > { %1492 = vmatpush1.bf16.msra.mxu1 %v5758_v36 }
 0x15f   : > { %1493 = vmatprep.subr.bf16.mxu1 %v5764_v39 }
 0x162   : > { %1494 = vmatpush1.bf16.msra.mxu1 %v5774_v43 }
 0x163   : > { %1495 = vmatprep.subr.bf16.mxu1 %v5778_v44 }
 0x166   : > { %1496 = vmatpush1.bf16.msra.mxu1 %v5782_v46 }
 0x167   : > { %1497 = vmatprep.subr.bf16.mxu1 %v5788_v49 }
 0x16a   : > { %1498 = vmatpush1.bf16.msra.mxu1 %v5798_v53 }
 0x16b   : > { %1499 = vmatprep.subr.bf16.mxu1 %v5801_v54 }
 0x16e   : > { %1500 = vmatpush1.bf16.msra.mxu1 %v5806_v56 }
 0x171   : > { %1518 = vmatmul.mubr.bf16.vlgmr.msra.gmra.mxu1 %v1441_v62 }
 0x1b1   : > { %v5890_v63 = vpop.f32.mrf.mxu1  ;;  %v5946_v24 = vpop.f32.mrf.mxu0 }
 0x1b3   : > { %v5892_v0 = vpop.f32.mrf.mxu1  ;;  %v5956_v31 = vpop.f32.mrf.mxu0 }
 0x1b5   : > { %v5894_v1 = vpop.f32.mrf.mxu1  ;;  %v5966_v38 = vpop.f32.mrf.mxu0 }
 0x1b7   : > { %v5896_v2 = vpop.f32.mrf.mxu1  ;;  %v5976_v45 = vpop.f32.mrf.mxu0 }
 0x1b9   : > { %v5898_v3 = vpop.f32.mrf.mxu1  ;;  %v5986_v52 = vpop.f32.mrf.mxu0 }
 0x1bb   : > { %v5900_v4 = vpop.f32.mrf.mxu1  ;;  %v5996_v9 = vpop.f32.mrf.mxu0 }
 0x1bd   : > { %v5902_v5 = vpop.f32.mrf.mxu1 }
 0x1bf   : > { %v5904_v6 = vpop.f32.mrf.mxu1 }
 0x1c1   : > { %v5906_v7 = vpop.f32.mrf.mxu1 }
 0x1c3   : > { %v5908_v8 = vpop.f32.mrf.mxu1 }
 0x1c5   : > { %v5910_v10 = vpop.f32.mrf.mxu1 }
 0x1c7   : > { %v5912_v11 = vpop.f32.mrf.mxu1 }
 0x1c9   : > { %v5916_v13 = vpop.f32.mrf.mxu1 }
 0x1cb   : > { %v5921_v15 = vpop.f32.mrf.mxu1 }
 0x1cd   : > { %v5931_v18 = vpop.f32.mrf.mxu1 }
 0x1cf   : > { %v5937_v20 = vpop.f32.mrf.mxu1 }
 0x1d1   : > { %v947_v22 = vpop.f32.mrf.mxu1 }
 0x1d2   : > { %v5944_v23 = vadd.f32 %v947_v22, %v5935_v19 }
 0x1d3   : > { %v949_v25 = vpop.f32.mrf.mxu1 }
 0x1d4   : > { %v4265_v26 = vmul.f32 -1.442695, %v5944_v23  ;;  %v5950_v27 = vadd.f32 %v949_v25, %v5941_v21 }
 0x1d5   : > { %v951_v28 = vpop.f32.mrf.mxu1 }
 0x1d6   : > { %4685 = vpow2.f32 %v4265_v26  ;;  %v4266_v29 = vmul.f32 -1.442695, %v5950_v27  ;;  %v5954_v30 = vadd.f32 %v951_v28, %v5935_v19 }
 0x1d7   : > { %v953_v32 = vpop.f32.mrf.mxu1 }
 0x1d8   : > { %4687 = vpow2.f32 %v4266_v29  ;;  %v4267_v33 = vmul.f32 -1.442695, %v5954_v30  ;;  %v5960_v34 = vadd.f32 %v953_v32, %v5941_v21 }
 0x1d9   : > { %v957_v35 = vpop.f32.mrf.mxu1 }
 0x1da   : > { %4689 = vpow2.f32 %v4267_v33  ;;  %v4268_v36 = vmul.f32 -1.442695, %v5960_v34  ;;  %v5964_v37 = vadd.f32 %v957_v35, %v5935_v19 }
 0x1db   : > { %v959_v39 = vpop.f32.mrf.mxu1 }
 0x1dc   : > { %4691 = vpow2.f32 %v4268_v36  ;;  %v4269_v40 = vmul.f32 -1.442695, %v5964_v37  ;;  %v5970_v41 = vadd.f32 %v959_v39, %v5941_v21 }
 0x1dd   : > { %v961_v42 = vpop.f32.mrf.mxu1 }
 0x1de   : > { %4693 = vpow2.f32 %v4269_v40  ;;  %v4270_v43 = vmul.f32 -1.442695, %v5970_v41  ;;  %v5974_v44 = vadd.f32 %v961_v42, %v5935_v19  ;;  %v6006_v40 = vpop.f32.mrf.mxu0 }
 0x1df   : > { %v963_v46 = vpop.f32.mrf.mxu1 }
 0x1e0   : > { %4695 = vpow2.f32 %v4270_v43  ;;  %v4271_v47 = vmul.f32 -1.442695, %v5974_v44  ;;  %v5980_v48 = vadd.f32 %v963_v46, %v5941_v21  ;;  %v6009_v43 = vsub.s32 0, %v5914_v12 }
 0x1e1   : > { %v967_v49 = vpop.f32.mrf.mxu1 }
 0x1e2   : > { %4697 = vpow2.f32 %v4271_v47  ;;  %v4272_v50 = vmul.f32 -1.442695, %v5980_v48  ;;  %v5984_v51 = vadd.f32 %v967_v49, %v5935_v19 }
 0x1e3   : > { %v4686_v53 = vpop.eup %4685  ;;  %v969_v54 = vpop.f32.mrf.mxu1 }
 0x1e4   : > { %v1122_v55 = vadd.f32 1.0, %v4686_v53  ;;  %4699 = vpow2.f32 %v4272_v50  ;;  %v4273_v56 = vmul.f32 -1.442695, %v5984_v51  ;;  %v5990_v57 = vadd.f32 %v969_v54, %v5941_v21 }
 0x1e5   : > { %v4688_v58 = vpop.eup %4687  ;;  %v971_v59 = vpop.f32.mrf.mxu1  ;;  %v6016_v54 = vsub.s32 1, %v5914_v12 }
 0x1e6   : > { %4701 = vrcp.f32 %v1122_v55  ;;  %v1123_v60 = vadd.f32 1.0, %v4688_v58  ;;  %v4274_v61 = vmul.f32 -1.442695, %v5990_v57  ;;  %v5994_v62 = vadd.f32 %v971_v59, %v5935_v19 }
 0x1e7   : > { %v4690_v22 = vpop.eup %4689  ;;  %4703 = vpow2.f32 %v4273_v56  ;;  %v973_v25 = vpop.f32.mrf.mxu1  ;;  %7411 = vst [vmem:[#allocation38_spill] sm:$0xff] %v6016_v54 }
 0x1e8   : > { %4705 = vrcp.f32 %v1123_v60  ;;  %v1124_v26 = vadd.f32 1.0, %v4690_v22  ;;  %v4275_v28 = vmul.f32 -1.442695, %v5994_v62  ;;  %v6000_v29 = vadd.f32 %v973_v25, %v5941_v21  ;;  %v6022_v60 = vpop.f32.mrf.mxu0 }
 0x1e9   : > { %v4692_v32 = vpop.eup %4691  ;;  %4707 = vpow2.f32 %v4274_v61  ;;  %v977_v33 = vpop.f32.mrf.mxu1  ;;  %v6026_v22 = vrot.slane %v5929_v17, %v6009_v43 }
 0x1ea   : > { %4709 = vrcp.f32 %v1124_v26  ;;  %v1125_v35 = vadd.f32 1.0, %v4692_v32  ;;  %v4276_v36 = vmul.f32 -1.442695, %v6000_v29  ;;  %v6004_v39 = vadd.f32 %v977_v33, %v5935_v19 }
 0x1eb   : > { %v4694_v42 = vpop.eup %4693  ;;  %4711 = vpow2.f32 %v4275_v28  ;;  %v979_v46 = vpop.f32.mrf.mxu1 }
 0x1ec   : > { %4713 = vrcp.f32 %v1125_v35  ;;  %v1126_v47 = vadd.f32 1.0, %v4694_v42  ;;  %v4277_v49 = vmul.f32 -1.442695, %v6004_v39  ;;  %v6013_v50 = vadd.f32 %v979_v46, %v5941_v21 }
 0x1ed   : > { %v4696_v53 = vpop.eup %4695  ;;  %4715 = vpow2.f32 %v4276_v36  ;;  %v981_v55 = vpop.f32.mrf.mxu1  ;;  %v6034_v35 = vrot.slane %v5929_v17, %v6016_v54  ;;  %v835_v42 = vadd.f32 %v5946_v24, %v6026_v22 }
 0x1ee   : > { %4717 = vrcp.f32 %v1126_v47  ;;  %v1127_v56 = vadd.f32 1.0, %v4696_v53  ;;  %v4278_v58 = vmul.f32 -1.442695, %v6013_v50  ;;  %v6020_v59 = vadd.f32 %v981_v55, %v5935_v19  ;;  %v6042_v53 = vpop.f32.mrf.mxu0 }
 0x1ef   : > { %v4698_v61 = vpop.eup %4697  ;;  %4719 = vpow2.f32 %v4277_v49  ;;  %v983_v25 = vpop.f32.mrf.mxu1  ;;  %v837_v17 = vadd.f32 %v5956_v31, %v6034_v35 }
 0x1f0   : > { %4721 = vrcp.f32 %v1127_v56  ;;  %v1128_v26 = vadd.f32 1.0, %v4698_v61  ;;  %v4279_v28 = vmul.f32 -1.442695, %v6020_v59  ;;  %v6030_v32 = vadd.f32 %v983_v25, %v5941_v21 }
 0x1f1   : > { %v4700_v33 = vpop.eup %4699  ;;  %4723 = vpow2.f32 %v4278_v58  ;;  %v987_v36 = vpop.f32.mrf.mxu1 }
 0x1f2   : > { %4725 = vrcp.f32 %v1128_v26  ;;  %v1129_v46 = vadd.f32 1.0, %v4700_v33  ;;  %v4280_v47 = vmul.f32 -1.442695, %v6030_v32  ;;  %v6040_v49 = vadd.f32 %v987_v36, %v5935_v19 }
 0x1f3   : > { %v4702_v55 = vpop.eup %4701  ;;  %4727 = vpow2.f32 %v4279_v28  ;;  %v989_v56 = vpop.f32.mrf.mxu1  ;;  %v839_v28 = vadd.f32 %v5966_v38, %v6026_v22 }
 0x1f4   : > { %v4704_v58 = vpop.eup %4703  ;;  %v1218_v61 = vmul.f32 %v4702_v55, %v5944_v23  ;;  %4729 = vrcp.f32 %v1129_v46  ;;  %v4281_v24 = vmul.f32 -1.442695, %v6040_v49  ;;  %v6049_v25 = vadd.f32 %v989_v56, %v5941_v21  ;;  %v6055_v46 = vpop.f32.mrf.mxu0 }
 0x1f5   : > { %v4706_v26 = vpop.eup %4705  ;;  %v1130_v33 = vadd.f32 1.0, %v4704_v58  ;;  %4731 = vpow2.f32 %v4280_v47  ;;  %v991_v36 = vpop.f32.mrf.mxu1  ;;  %v841_v58 = vadd.f32 %v5976_v45, %v6034_v35 }
 0x1f6   : > { %v4708_v16 = vpop.eup %4707  ;;  %v1219_v14 = vmul.f32 %v4706_v26, %v5950_v27  ;;  %4733 = vpow2.f32 %v4281_v24  ;;  %v1250_v31 = vmul.f32 %v1218_v61, %v835_v42  ;;  %v4282_v23 = vmul.f32 -1.442695, %v6049_v25 }
 0x1f7   : > { %v4710_v55 = vpop.eup %4709  ;;  %4735 = vrcp.f32 %v1130_v33  ;;  %v1131_v56 = vadd.f32 1.0, %v4708_v16  ;;  %v6058_v12 = vadd.f32 %v991_v36, %v5935_v19  ;;  %v993_v47 = vpop.f32.mrf.mxu1  ;;  %v845_v33 = vadd.f32 %v5986_v52, %v6026_v22 }
 0x1f8   : > { %v4712_v38 = vpop.eup %4711  ;;  %v1220_v54 = vmul.f32 %v4710_v55, %v5954_v30  ;;  %1282 = vst [vmem:[#allocation2 + $0x20] sm:$0xff] %v1250_v31  ;;  %4737 = vpow2.f32 %v4282_v23  ;;  %v1251_v27 = vmul.f32 %v1219_v14, %v837_v17  ;;  %v6064_v42 = vadd.f32 %v993_v47, %v5941_v21  ;;  %v6074_v17 = vpop.f32.mrf.mxu0 }
 0x1f9   : > { %v4714_v61 = vpop.eup %4713  ;;  %4739 = vrcp.f32 %v1131_v56  ;;  %v1132_v24 = vadd.f32 1.0, %v4712_v38  ;;  %v4283_v16 = vmul.f32 -1.442695, %v6058_v12  ;;  %v997_v26 = vpop.f32.mrf.mxu1  ;;  %v847_v47 = vadd.f32 %v5996_v9, %v6034_v35 }
 0x1fa   : > { %v4716_v36 = vpop.eup %4715  ;;  %v1221_v45 = vmul.f32 %v4714_v61, %v5960_v34  ;;  %1283 = vst [vmem:[#allocation2 + $0x28] sm:$0xff] %v1251_v27  ;;  %v1252_v30 = vmul.f32 %v1220_v54, %v839_v28  ;;  %v4284_v31 = vmul.f32 -1.442695, %v6064_v42  ;;  %v6072_v14 = vadd.f32 %v997_v26, %v5935_v19 }
 0x1fb   : > { %v4718_v23 = vpop.eup %4717  ;;  %4741 = vrcp.f32 %v1132_v24  ;;  %v1133_v55 = vadd.f32 1.0, %v4716_v36  ;;  %v999_v56 = vpop.f32.mrf.mxu1  ;;  %v849_v26 = vadd.f32 %v6006_v40, %v6026_v22  ;;  %v851_v40 = vadd.f32 %v6022_v60, %v6034_v35 }
 0x1fc   : > { %v4720_v52 = vpop.eup %4719  ;;  %v1222_v38 = vmul.f32 %v4718_v23, %v5964_v37  ;;  %4743 = vpow2.f32 %v4283_v16  ;;  %1284 = vst [vmem:[#allocation2 + $0x30] sm:$0xff] %v1252_v30  ;;  %v1253_v34 = vmul.f32 %v1221_v45, %v841_v58  ;;  %v4285_v54 = vmul.f32 -1.442695, %v6072_v14  ;;  %v6089_v16 = vpop.f32.mrf.mxu0 }
 0x1fd   : > { %v4722_v28 = vpop.eup %4721  ;;  %4745 = vrcp.f32 %v1133_v55  ;;  %v1134_v27 = vadd.f32 1.0, %v4720_v52  ;;  %v6081_v61 = vadd.f32 %v999_v56, %v5941_v21  ;;  %v1001_v24 = vpop.f32.mrf.mxu1 }
 0x1fe   : > { %v4724_v36 = vpop.eup %4723  ;;  %v1223_v9 = vmul.f32 %v4722_v28, %v5970_v41  ;;  %4747 = vpow2.f32 %v4284_v31  ;;  %1285 = vst [vmem:[#allocation2 + $0x38] sm:$0xff] %v1253_v34  ;;  %v1254_v37 = vmul.f32 %v1222_v38, %v845_v33  ;;  %v6087_v58 = vadd.f32 %v1001_v24, %v5935_v19 }
 0x1ff   : > { %v4726_v45 = vpop.eup %4725  ;;  %4749 = vrcp.f32 %v1134_v27  ;;  %v1135_v30 = vadd.f32 1.0, %v4724_v36  ;;  %v4286_v23 = vmul.f32 -1.442695, %v6081_v61  ;;  %v1003_v55 = vpop.f32.mrf.mxu1 }
 0x200   : > { %v4728_v56 = vpop.eup %4727  ;;  %v1224_v41 = vmul.f32 %v4726_v45, %v5974_v44  ;;  %4751 = vpow2.f32 %v4285_v54  ;;  %1286 = vst [vmem:[#allocation2 + $0x40] sm:$0xff] %v1254_v37  ;;  %v1255_v33 = vmul.f32 %v1223_v9, %v847_v47  ;;  %v4287_v31 = vmul.f32 -1.442695, %v6087_v58  ;;  %v864_v54 = vpop.f32.mrf.mxu0 }
 0x201   : > { %v4730_v52 = vpop.eup %4729  ;;  %4753 = vrcp.f32 %v1135_v30  ;;  %v1136_v38 = vadd.f32 1.0, %v4728_v56  ;;  %v6097_v34 = vadd.f32 %v1003_v55, %v5941_v21  ;;  %v1007_v28 = vpop.f32.mrf.mxu1  ;;  %v855_v37 = vadd.f32 %v6042_v53, %v6026_v22 }
 0x202   : > { %v4732_v27 = vpop.eup %4731  ;;  %v1225_v24 = vmul.f32 %v4730_v52, %v5980_v48  ;;  %4755 = vpow2.f32 %v4286_v23  ;;  %1287 = vst [vmem:[#allocation2 + $0x48] sm:$0xff] %v1255_v33  ;;  %v1256_v60 = vmul.f32 %v1224_v41, %v849_v26  ;;  %v6101_v44 = vadd.f32 %v1007_v28, %v5935_v19 }
 0x203   : > { %v4734_v47 = vpop.eup %4733  ;;  %4757 = vrcp.f32 %v1136_v38  ;;  %v1137_v36 = vadd.f32 1.0, %v4732_v27  ;;  %v4288_v9 = vmul.f32 -1.442695, %v6097_v34  ;;  %v1009_v45 = vpop.f32.mrf.mxu1  ;;  %v857_v26 = vadd.f32 %v6055_v46, %v6034_v35 }
 0x204   : > { %v4736_v30 = vpop.eup %4735  ;;  %v1138_v55 = vadd.f32 1.0, %v4734_v47  ;;  %4759 = vpow2.f32 %v4287_v31  ;;  %1288 = vst [vmem:[#allocation2 + $0x50] sm:$0xff] %v1256_v60  ;;  %v1257_v48 = vmul.f32 %v1225_v24, %v851_v40  ;;  %v4289_v41 = vmul.f32 -1.442695, %v6101_v44  ;;  %v866_v40 = vpop.f32.mrf.mxu0 }
 0x205   : > { %v4738_v23 = vpop.eup %4737  ;;  %v1226_v56 = vmul.f32 %v4736_v30, %v5984_v51  ;;  %4761 = vrcp.f32 %v1137_v36  ;;  %v6111_v33 = vadd.f32 %v1009_v45, %v5941_v21  ;;  %v1011_v52 = vpop.f32.mrf.mxu1  ;;  %v859_v46 = vadd.f32 %v6074_v17, %v6026_v22 }
 0x206   : > { %v4740_v53 = vpop.eup %4739  ;;  %4763 = vrcp.f32 %v1138_v55  ;;  %v1139_v38 = vadd.f32 1.0, %v4738_v23  ;;  %1289 = vst [vmem:[#allocation2 + $0x58] sm:$0xff] %v1257_v48  ;;  %v6114_v31 = vadd.f32 %v1011_v52, %v5935_v19 }
 0x207   : > { %v1227_v51 = vmul.f32 %v4740_v53, %v5990_v57  ;;  %4765 = vpow2.f32 %v4288_v9  ;;  %v1258_v28 = vmul.f32 %v1226_v56, %v855_v37  ;;  %v4290_v27 = vmul.f32 -1.442695, %v6111_v33  ;;  %v1013_v24 = vpop.f32.mrf.mxu1  ;;  %v868_v56 = vpop.f32.mrf.mxu0 }
 0x208   : > { %v4742_v60 = vpop.eup %4741  ;;  %4767 = vrcp.f32 %v1139_v38  ;;  %v4291_v47 = vmul.f32 -1.442695, %v6114_v31  ;;  %v6122_v36 = vadd.f32 %v1013_v24, %v5941_v21  ;;  %v861_v57 = vadd.f32 %v6089_v16, %v6034_v35 }
 0x209   : > { %v4744_v45 = vpop.eup %4743  ;;  %v1228_v30 = vmul.f32 %v4742_v60, %v5994_v62  ;;  %4769 = vpow2.f32 %v4289_v41  ;;  %1290 = vst [vmem:[#allocation2 + $0x60] sm:$0xff] %v1258_v28  ;;  %v1259_v17 = vmul.f32 %v1227_v51, %v857_v26  ;;  %v1017_v9 = vpop.f32.mrf.mxu1  ;;  %v865_v26 = vadd.f32 %v864_v54, %v6026_v22 }
 0x20a   : > { %v4746_v37 = vpop.eup %4745  ;;  %v1140_v55 = vadd.f32 1.0, %v4744_v45  ;;  %4771 = vpow2.f32 %v4290_v27  ;;  %v4292_v48 = vmul.f32 -1.442695, %v6122_v36  ;;  %v6129_v23 = vadd.f32 %v1017_v9, %v5935_v19 }
 0x20b   : > { %v4748_v52 = vpop.eup %4747  ;;  %v1229_v53 = vmul.f32 %v4746_v37, %v6000_v29  ;;  %1291 = vst [vmem:[#allocation2 + $0x68] sm:$0xff] %v1259_v17  ;;  %4773 = vpow2.f32 %v4291_v47  ;;  %v1260_v62 = vmul.f32 %v1228_v30, %v859_v46  ;;  %v1019_v41 = vpop.f32.mrf.mxu1  ;;  %v867_v60 = vadd.f32 %v866_v40, %v6034_v35 }
 0x20c   : > { %v4750_v16 = vpop.eup %4749  ;;  %4775 = vrcp.f32 %v1140_v55  ;;  %v1141_v38 = vadd.f32 1.0, %v4748_v52  ;;  %v4293_v51 = vmul.f32 -1.442695, %v6129_v23  ;;  %v6135_v28 = vadd.f32 %v1019_v41, %v5941_v21  ;;  %v870_v17 = vpop.f32.mrf.mxu0 }
 0x20d   : > { %v4752_v27 = vpop.eup %4751  ;;  %v1230_v24 = vmul.f32 %v4750_v16, %v6004_v39  ;;  %1292 = vst [vmem:[#allocation2 + $0x70] sm:$0xff] %v1260_v62  ;;  %4777 = vpow2.f32 %v4292_v48  ;;  %v1261_v29 = vmul.f32 %v1229_v53, %v861_v57  ;;  %v1021_v46 = vpop.f32.mrf.mxu1  ;;  %v869_v57 = vadd.f32 %v868_v56, %v6026_v22 }
 0x20e   : > { %v4754_v47 = vpop.eup %4753  ;;  %4779 = vrcp.f32 %v1141_v38  ;;  %v1142_v54 = vadd.f32 1.0, %v4752_v27  ;;  %v4294_v45 = vmul.f32 -1.442695, %v6135_v28  ;;  %v6141_v30 = vadd.f32 %v1021_v46, %v5935_v19 }
 0x20f   : > { %v4756_v9 = vpop.eup %4755  ;;  %v1231_v37 = vmul.f32 %v4754_v47, %v6013_v50  ;;  %1293 = vst [vmem:[#allocation2 + $0x78] sm:$0xff] %v1261_v29  ;;  %4781 = vpow2.f32 %v4293_v51  ;;  %v1262_v39 = vmul.f32 %v1230_v24, %v865_v26  ;;  %v1023_v55 = vpop.f32.mrf.mxu1  ;;  %v871_v16 = vadd.f32 %v870_v17, %v6034_v35 }
 0x210   : > { %v4758_v40 = vpop.eup %4757  ;;  %4783 = vrcp.f32 %v1142_v54  ;;  %v1143_v48 = vadd.f32 1.0, %v4756_v9  ;;  %v4295_v52 = vmul.f32 -1.442695, %v6141_v30  ;;  %v6147_v53 = vadd.f32 %v1023_v55, %v5941_v21 }
 0x211   : > { %v4760_v62 = vpop.eup %4759  ;;  %v1232_v41 = vmul.f32 %v4758_v40, %v6020_v59  ;;  %1294 = vst [vmem:[#allocation2 + $0x80] sm:$0xff] %v1262_v39  ;;  %4785 = vpow2.f32 %v4294_v45  ;;  %v1263_v50 = vmul.f32 %v1231_v37, %v867_v60  ;;  %v1394_v26 = vpop.f32.mrf.mxu1  ;;  %v875_v29 = vadd.f32 %v5890_v63, %v6026_v22 }
 0x212   : > { %v4762_v38 = vpop.eup %4761  ;;  %4787 = vrcp.f32 %v1143_v48  ;;  %v1144_v56 = vadd.f32 1.0, %v4760_v62  ;;  %v4296_v51 = vmul.f32 -1.442695, %v6147_v53  ;;  %v6153_v27 = vadd.f32 %v1394_v26, %v5935_v19 }
 0x213   : > { %v4764_v24 = vpop.eup %4763  ;;  %v1233_v59 = vmul.f32 %v4762_v38, %v6030_v32  ;;  %1295 = vst [vmem:[#allocation2 + $0x88] sm:$0xff] %v1263_v50  ;;  %4789 = vpow2.f32 %v4295_v52  ;;  %v1264_v60 = vmul.f32 %v1232_v41, %v869_v57  ;;  %v1396_v46 = vpop.f32.mrf.mxu1  ;;  %v877_v37 = vadd.f32 %v5892_v0, %v6034_v35 }
 0x214   : > { %v4766_v47 = vpop.eup %4765  ;;  %v1234_v54 = vmul.f32 %v4764_v24, %v6040_v49  ;;  %4791 = vrcp.f32 %v1144_v56  ;;  %v4297_v45 = vmul.f32 -1.442695, %v6153_v27  ;;  %v6161_v17 = vadd.f32 %v1396_v46, %v5941_v21 }
 0x215   : > { %v4768_v9 = vpop.eup %4767  ;;  %v1145_v63 = vadd.f32 1.0, %v4766_v47  ;;  %1296 = vst [vmem:[#allocation2 + $0x90] sm:$0xff] %v1264_v60  ;;  %4793 = vpow2.f32 %v4296_v51  ;;  %v1265_v32 = vmul.f32 %v1233_v59, %v871_v16  ;;  %v1398_v39 = vpop.f32.mrf.mxu1  ;;  %v879_v24 = vadd.f32 %v5894_v1, %v6026_v22 }
 0x216   : > { %v4770_v57 = vpop.eup %4769  ;;  %v1266_v55 = vmul.f32 %v1234_v54, %v875_v29  ;;  %v1235_v40 = vmul.f32 %v4768_v9, %v6049_v25  ;;  %4795 = vpow2.f32 %v4297_v45  ;;  %v4298_v49 = vmul.f32 -1.442695, %v6161_v17 }
 0x217   : > { %v4772_v48 = vpop.eup %4771  ;;  %4797 = vrcp.f32 %v1145_v63  ;;  %v1146_v52 = vadd.f32 1.0, %v4770_v57  ;;  %1297 = vst [vmem:[#allocation2 + $0x98] sm:$0xff] %v1265_v32  ;;  %v6168_v62 = vadd.f32 %v1398_v39, %v5935_v19  ;;  %v1400_v0 = vpop.f32.mrf.mxu1  ;;  %v881_v54 = vadd.f32 %v5896_v2, %v6034_v35 }
 0x218   : > { %v4774_v41 = vpop.eup %4773  ;;  %1298 = vst [vmem:[#allocation2 + $0xa0] sm:$0xff] %v1266_v55  ;;  %v1267_v50 = vmul.f32 %v1235_v40, %v877_v37  ;;  %v1147_v16 = vadd.f32 1.0, %v4772_v48  ;;  %4799 = vpow2.f32 %v4298_v49  ;;  %v6171_v26 = vadd.f32 %v1400_v0, %v5941_v21 }
 0x219   : > { %v4776_v25 = vpop.eup %4775  ;;  %4801 = vrcp.f32 %v1146_v52  ;;  %v1148_v38 = vadd.f32 1.0, %v4774_v41  ;;  %v4299_v56 = vmul.f32 -1.442695, %v6168_v62  ;;  %v889_v0 = vadd.f32 %v5902_v5, %v6026_v22 }
 0x21a   : > { %v4778_v51 = vpop.eup %4777  ;;  %1299 = vst [vmem:[#allocation2 + $0xa8] sm:$0xff] %v1267_v50  ;;  %v1236_v29 = vmul.f32 %v4776_v25, %v6058_v12  ;;  %4803 = vrcp.f32 %v1147_v16  ;;  %v4300_v59 = vmul.f32 -1.442695, %v6171_v26  ;;  %v885_v12 = vadd.f32 %v5898_v3, %v6026_v22 }
 0x21b   : > { %v4780_v60 = vpop.eup %4779  ;;  %4805 = vrcp.f32 %v1148_v38  ;;  %v1149_v46 = vadd.f32 1.0, %v4778_v51 }
 0x21c   : > { %v4782_v47 = vpop.eup %4781  ;;  %v1268_v45 = vmul.f32 %v1236_v29, %v879_v24  ;;  %v1237_v9 = vmul.f32 %v4780_v60, %v6064_v42  ;;  %4807 = vpow2.f32 %v4299_v56  ;;  %v887_v42 = vadd.f32 %v5900_v4, %v6034_v35 }
 0x21d   : > { %v4784_v37 = vpop.eup %4783  ;;  %4809 = vrcp.f32 %v1149_v46  ;;  %v1150_v1 = vadd.f32 1.0, %v4782_v47  ;;  %v897_v47 = vadd.f32 %v5908_v8, %v6034_v35 }
 0x21e   : > { %v4786_v63 = vpop.eup %4785  ;;  %1300 = vst [vmem:[#allocation2 + $0xb0] sm:$0xff] %v1268_v45  ;;  %v1269_v32 = vmul.f32 %v1237_v9, %v881_v54  ;;  %v1238_v39 = vmul.f32 %v4784_v37, %v6072_v14  ;;  %4811 = vpow2.f32 %v4300_v59  ;;  %v899_v54 = vadd.f32 %v5910_v10, %v6026_v22 }
 0x21f   : > { %v4788_v57 = vpop.eup %4787  ;;  %4813 = vrcp.f32 %v1150_v1  ;;  %v1151_v55 = vadd.f32 1.0, %v4786_v63  ;;  %v905_v10 = vadd.f32 %v5916_v13, %v6026_v22 }
 0x220   : > { %v4790_v2 = vpop.eup %4789  ;;  %1301 = vst [vmem:[#allocation2 + $0xb8] sm:$0xff] %v1269_v32  ;;  %v1270_v40 = vmul.f32 %v1238_v39, %v885_v12  ;;  %v1239_v49 = vmul.f32 %v4788_v57, %v6081_v61  ;;  %v891_v61 = vadd.f32 %v5904_v6, %v6034_v35  ;;  %v1351_v57 = vpop.f32.mrf.mxu0 }
 0x221   : > { %v4792_v48 = vpop.eup %4791  ;;  %4815 = vrcp.f32 %v1151_v55  ;;  %v1152_v52 = vadd.f32 1.0, %v4790_v2 }
 0x222   : > { %v4794_v3 = vpop.eup %4793  ;;  %1302 = vst [vmem:[#allocation2 + $0xc0] sm:$0xff] %v1270_v40  ;;  %v1271_v14 = vmul.f32 %v1239_v49, %v887_v42  ;;  %v1240_v41 = vmul.f32 %v4792_v48, %v6087_v58  ;;  %v895_v58 = vadd.f32 %v5906_v7, %v6026_v22  ;;  %v909_v40 = vadd.f32 %v5931_v18, %v6026_v22  ;;  %v1353_v48 = vpop.f32.mrf.mxu0 }
 0x223   : > { %v4796_v50 = vpop.eup %4795  ;;  %4817 = vrcp.f32 %v1152_v52  ;;  %v1153_v16 = vadd.f32 1.0, %v4794_v3  ;;  %v1352_v3 = vadd.f32 %v1351_v57, %v6026_v22 }
 0x224   : > { %v4798_v25 = vpop.eup %4797  ;;  %1303 = vst [vmem:[#allocation2 + $0xc8] sm:$0xff] %v1271_v14  ;;  %v1272_v4 = vmul.f32 %v1240_v41, %v889_v0  ;;  %v1415_v38 = vadd.f32 1.0, %v4796_v50  ;;  %v911_v14 = vadd.f32 %v5937_v20, %v6034_v35 }
 0x225   : > { %v4800_v56 = vpop.eup %4799  ;;  %v1241_v51 = vmul.f32 %v4798_v25, %v6097_v34  ;;  %4819 = vrcp.f32 %v1153_v16 }
 0x226   : > { %v4802_v24 = vpop.eup %4801  ;;  %1304 = vst [vmem:[#allocation2 + $0xd0] sm:$0xff] %v1272_v4  ;;  %4821 = vrcp.f32 %v1415_v38  ;;  %v1416_v5 = vadd.f32 1.0, %v4800_v56  ;;  %v1354_v38 = vadd.f32 %v1353_v48, %v6034_v35  ;;  %v1355_v56 = vpop.f32.mrf.mxu0 }
 0x227   : > { %v4804_v29 = vpop.eup %4803  ;;  %v1273_v59 = vmul.f32 %v1241_v51, %v891_v61  ;;  %v1242_v60 = vmul.f32 %v4802_v24, %v6101_v44  ;;  %v901_v44 = vadd.f32 %v5912_v11, %v6034_v35  ;;  %v907_v11 = vadd.f32 %v5921_v15, %v6034_v35 }
 0x228   : > { %v4806_v46 = vpop.eup %4805  ;;  %v1243_v6 = vmul.f32 %v4804_v29, %v6111_v33  ;;  %4823 = vrcp.f32 %v1416_v5 }
 0x229   : > { %v4808_v34 = vpop.eup %4807  ;;  %1305 = vst [vmem:[#allocation2 + $0xd8] sm:$0xff] %v1273_v59  ;;  %v1274_v45 = vmul.f32 %v1242_v60, %v895_v58  ;;  %v1244_v9 = vmul.f32 %v4806_v46, %v6114_v31  ;;  %v1357_v59 = vpop.f32.mrf.mxu0 }
 0x22a   : > { %v4810_v37 = vpop.eup %4809  ;;  %v1275_v7 = vmul.f32 %v1243_v6, %v897_v47  ;;  %v1417_v1 = vadd.f32 1.0, %v4808_v34 }
 0x22b   : > { %v4812_v63 = vpop.eup %4811  ;;  %1306 = vst [vmem:[#allocation2 + $0xe0] sm:$0xff] %v1274_v45  ;;  %v1276_v8 = vmul.f32 %v1244_v9, %v899_v54  ;;  %v1245_v33 = vmul.f32 %v4810_v37, %v6122_v36  ;;  %v1358_v54 = vadd.f32 %v1357_v59, %v6034_v35 }
 0x22c   : > { %v4814_v12 = vpop.eup %4813  ;;  %1307 = vst [vmem:[#allocation2 + $0xe8] sm:$0xff] %v1275_v7  ;;  %4825 = vrcp.f32 %v1417_v1  ;;  %v1418_v32 = vadd.f32 1.0, %v4812_v63 }
 0x22d   : > { %1308 = vst [vmem:[#allocation2 + $0xf0] sm:$0xff] %v1276_v8  ;;  %v1277_v31 = vmul.f32 %v1245_v33, %v901_v44  ;;  %v1246_v39 = vmul.f32 %v4814_v12, %v6129_v23  ;;  %v1476_v8 = vpop.f32.mrf.mxu0 }
 0x22e   : > { %v4816_v55 = vpop.eup %4815  ;;  %4827 = vrcp.f32 %v1418_v32  ;;  %v1477_v33 = vadd.f32 %v1476_v8, %v6026_v22 }
 0x22f   : > { %1309 = vst [vmem:[#allocation2 + $0xf8] sm:$0xff] %v1277_v31  ;;  %v1278_v2 = vmul.f32 %v1246_v39, %v905_v10  ;;  %v1247_v36 = vmul.f32 %v4816_v55, %v6135_v28 }
 0x230   : > { %v4818_v42 = vpop.eup %4817 }
 0x231   : > { %1310 = vst [vmem:[#allocation2 + $0x100] sm:$0xff] %v1278_v2  ;;  %v1279_v13 = vmul.f32 %v1247_v36, %v907_v11  ;;  %v1248_v49 = vmul.f32 %v4818_v42, %v6141_v30  ;;  %v1519_v23 = vpop.f32.mrf.mxu1 }
 0x232   : > { %v4820_v52 = vpop.eup %4819  ;;  %v1520_v0 = vadd.f32 %v1519_v23, %v5935_v19 }
 0x233   : > { %v4822_v15 = vpop.eup %4821  ;;  %1311 = vst [vmem:[#allocation2 + $0x108] sm:$0xff] %v1279_v13  ;;  %v1280_v28 = vmul.f32 %v1248_v49, %v909_v40  ;;  %v1249_v41 = vmul.f32 %v4820_v52, %v6147_v53  ;;  %v1521_v18 = vpop.f32.mrf.mxu1 }
 0x234   : > { %v1427_v50 = vmul.f32 %v4822_v15, %v6153_v27  ;;  %v4301_v16 = vmul.f32 -1.442695, %v1520_v0  ;;  %v1522_v30 = vadd.f32 %v1521_v18, %v5941_v21 }
 0x235   : > { %v4824_v25 = vpop.eup %4823  ;;  %1312 = vst [vmem:[#allocation2 + $0x110] sm:$0xff] %v1280_v28  ;;  %v1281_v4 = vmul.f32 %v1249_v41, %v911_v14  ;;  %v1523_v61 = vpop.f32.mrf.mxu1 }
 0x236   : > { %v1428_v51 = vmul.f32 %v4824_v25, %v6161_v17  ;;  %v1431_v20 = vmul.f32 %v1427_v50, %v1352_v3  ;;  %4829 = vpow2.f32 %v4301_v16  ;;  %v4302_v24 = vmul.f32 -1.442695, %v1522_v30 }
 0x237   : > { %1313 = vst [vmem:[#allocation2 + $0x118] sm:$0xff] %v1281_v4  ;;  %v1524_v53 = vadd.f32 %v1523_v61, %v5935_v19  ;;  %v1525_v5 = vpop.f32.mrf.mxu1  ;;  %v1356_v17 = vadd.f32 %v1355_v56, %v6026_v22 }
 0x238   : > { %1435 = vst [vmem:[#allocation2] sm:$0xff] %v1431_v20  ;;  %v1432_v27 = vmul.f32 %v1428_v51, %v1354_v38  ;;  %4831 = vpow2.f32 %v4302_v24  ;;  %v1526_v29 = vadd.f32 %v1525_v5, %v5941_v21 }
 0x239   : > { %v4826_v58 = vpop.eup %4825  ;;  %v4303_v60 = vmul.f32 -1.442695, %v1524_v53 }
 0x23a   : > { %v1429_v46 = vmul.f32 %v4826_v58, %v6168_v62  ;;  %1436 = vst [vmem:[#allocation2 + $0x8] sm:$0xff] %v1432_v27  ;;  %v4304_v47 = vmul.f32 -1.442695, %v1526_v29 }
 0x23b   : > { %v4828_v6 = vpop.eup %4827  ;;  %4833 = vpow2.f32 %v4303_v60 }
 0x23c   : > { %v1430_v34 = vmul.f32 %v4828_v6, %v6171_v26  ;;  %v1433_v19 = vmul.f32 %v1429_v46, %v1356_v17  ;;  %4835 = vpow2.f32 %v4304_v47  ;;  %v1478_v26 = vpop.f32.mrf.mxu0 }
 0x23d   : > { %v1479_v55 = vadd.f32 %v1478_v26, %v6034_v35 }
 0x23e   : > { %1437 = vst [vmem:[#allocation2 + $0x10] sm:$0xff] %v1433_v19  ;;  %v1434_v45 = vmul.f32 %v1430_v34, %v1358_v54  ;;  %v1480_v32 = vpop.f32.mrf.mxu0 }
 0x23f   : > { %v1481_v13 = vadd.f32 %v1480_v32, %v6026_v22 }
 0x240   : > { %1438 = vst [vmem:[#allocation2 + $0x18] sm:$0xff] %v1434_v45  ;;  %v1482_v11 = vpop.f32.mrf.mxu0 }
 0x241   : > { %v1483_v48 = vadd.f32 %v1482_v11, %v6034_v35 }
 0x243   : > { %v4830_v21 = vpop.eup %4829 }
 0x244   : > { %v1540_v9 = vadd.f32 1.0, %v4830_v21 }
 0x245   : > { %v4832_v37 = vpop.eup %4831 }
 0x246   : > { %4837 = vrcp.f32 %v1540_v9  ;;  %v1541_v62 = vadd.f32 1.0, %v4832_v37 }
 0x248   : > { %v4834_v7 = vpop.eup %4833  ;;  %4839 = vrcp.f32 %v1541_v62 }
 0x249   : > { %v4836_v1 = vpop.eup %4835  ;;  %v1542_v63 = vadd.f32 1.0, %v4834_v7 }
 0x24a   : > { %v1543_v44 = vadd.f32 1.0, %v4836_v1 }
 0x24b   : > { %4841 = vrcp.f32 %v1542_v63 }
 0x24c   : > { %4843 = vrcp.f32 %v1543_v44 }
 0x253   : > { %v4838_v12 = vpop.eup %4837 }
 0x254   : > { %v1552_v10 = vmul.f32 %v4838_v12, %v1520_v0 }
 0x255   : > { %v4840_v31 = vpop.eup %4839 }
 0x256   : > { %v1553_v39 = vmul.f32 %v4840_v31, %v1522_v30  ;;  %v1556_v57 = vmul.f32 %v1552_v10, %v1477_v33 }
 0x258   : > { %v4842_v2 = vpop.eup %4841  ;;  %1560 = vst [vmem:[#allocation2 + $0x120] sm:$0xff] %v1556_v57  ;;  %v1557_v36 = vmul.f32 %v1553_v39, %v1479_v55 }
 0x259   : > { %v4844_v42 = vpop.eup %4843  ;;  %v1554_v40 = vmul.f32 %v4842_v2, %v1524_v53 }
 0x25a   : > { %v1555_v49 = vmul.f32 %v4844_v42, %v1526_v29  ;;  %1561 = vst [vmem:[#allocation2 + $0x128] sm:$0xff] %v1557_v36  ;;  %1567 = sbr.rel (%p4305_p3) target bundleno = 610 (0x262), region = 88 }
 0x25b   : > { %v1558_v23 = vmul.f32 %v1554_v40, %v1481_v13 }
 0x25c   : > { %v1559_v52 = vmul.f32 %v1555_v49, %v1483_v48 }
 0x25d   : > { %1562 = vst [vmem:[#allocation2 + $0x130] sm:$0xff] %v1558_v23 }
 0x25e   : > { %1563 = vst [vmem:[#allocation2 + $0x138] sm:$0xff] %v1559_v52 }
 0x25f   : > { %v5245_v3 = vmov 0.0  }
 0x260   : > { %1568 = vst [vmem:[#allocation2] sm:$0xff] %v5245_v3  ;;  %1569 = vst [vmem:[#allocation2 + $0x8] sm:$0xff] %v5245_v3 }
 0x261   : > { %1570 = vst [vmem:[#allocation2 + $0x10] sm:$0xff] %v5245_v3  ;;  %1571 = vst [vmem:[#allocation2 + $0x18] sm:$0xff] %v5245_v3 }
 0x262 PF: > { %s7413_s0 = sld [smem:[#allocation27_spill]] }
 0x268   : > { %p4306_p10 = scmp.ne.s32.totalorder %s7413_s0, 2 }
 0x26a   : > { %1575 = sbr.rel (%p4306_p10) target bundleno = 626 (0x272), region = 92 }
 0x26f   : > { %v5246_v22 = vmov 0.0  }
 0x270   : > { %1576 = vst [vmem:[#allocation2 + $0x120] sm:$0xff] %v5246_v22  ;;  %1577 = vst [vmem:[#allocation2 + $0x128] sm:$0xff] %v5246_v22 }
 0x271   : > { %1578 = vst [vmem:[#allocation2 + $0x130] sm:$0xff] %v5246_v22  ;;  %1579 = vst [vmem:[#allocation2 + $0x138] sm:$0xff] %v5246_v22 }
 0x272 PF: > { %v6238_v35 = vld [vmem:[#allocation12] sm:$0xff]  ;;  %v6240_v0 = vld [vmem:[#allocation12 + $0x8] sm:$0xff]  ;;  %v6242_v15 = vld [vmem:[#allocation12 + $0x10] sm:$0xff]  ;;  %s7420_s10 = sld [smem:[#allocation57_spill]]  ;;  %s6264_s29 = smov 0  }
 0x273   : > { %7414 = vst [vmem:[#allocation39_spill] sm:$0xff] %v6238_v35  ;;  %7415 = vst [vmem:[#allocation40_spill] sm:$0xff] %v6240_v0  ;;  %v6244_v14 = vld [vmem:[#allocation12 + $0x18] sm:$0xff]  ;;  %v6246_v28 = vld [vmem:[#allocation12 + $0x20] sm:$0xff]  ;;  %s7422_s30 = sld [smem:[#allocation58_spill]] }
 0x274   : > { %7416 = vst [vmem:[#allocation41_spill] sm:$0xff] %v6246_v28  ;;  %v6248_v41 = vld [vmem:[#allocation12 + $0x28] sm:$0xff]  ;;  %v6250_v18 = vld [vmem:[#allocation12 + $0x30] sm:$0x7f]  ;;  %v6252_v50 = vld [vmem:[#allocation12 + $0x38] sm:$0x7f] }
 0x275   : > { %7417 = vst [vmem:[#allocation42_spill] sm:$0xff] %v6248_v41  ;;  %7418 = vst [vmem:[#allocation43_spill] sm:$0xff] %v6250_v18 }
 0x276   : > { %7419 = vst [vmem:[#allocation44_spill] sm:$0xff] %v6252_v50 }
 0x278   : > { %v6257_v16 = vld [vmem:[%s7420_s10] sm:$0x3] }
 0x279   : > { %7421 = vst [vmem:[#allocation45_spill] sm:$0xff] %v6257_v16  ;;  %v6262_v30 = vld [vmem:[%s7422_s30] sm:$0x3] }
 0x27a   : > { %7423 = vst [vmem:[#allocation46_spill] sm:$0xff] %v6262_v30 }
 0x27b LB: >> { %v7424_v35 = vld [vmem:[#allocation39_spill] sm:$0xff]  ;;  %v7425_v0 = vld [vmem:[#allocation40_spill] sm:$0xff]  ;;  %s4307_s8 = sshll.u32 %s5230_s29, 5  ;;  %v7426_v38 = vld [vmem:[#allocation38_spill] sm:$0xff]  ;;  %vm1664_vm0 = vcmask 1046528   ;;  %v6353_v7 = vrot.slane %v6242_v15, %v6009_v43  ;;  %vm1731_vm1 = vcmask 1045504   ;;  %s5230_s29 = sphi %s6264_s29, %s1595_s29  }
 0x27c   : >> { %v1621_v25 = vrot.slane %v7424_v35, %v6009_v43  ;;  %v1625_v4 = vrot.slane %v7425_v0, %v6009_v43  ;;  %v1639_v56 = vrot.slane %v7424_v35, %v7426_v38  ;;  %v1643_v61 = vrot.slane %v7425_v0, %v7426_v38  ;;  %v7427_v51 = vld [vmem:[#allocation35_spill] sm:$0xff]  ;;  %s1597_s15 = sshra.s32 %s4307_s8, 3  ;;  %v7429_v24 = vld [vmem:[#allocation36_spill] sm:$0xff]  ;;  %v7432_v58 = vld [vmem:[#allocation37_spill] sm:$0xff]  ;;  %s3626_s1 = scalar_lea.vmem [#allocation3], %s4307_s8 }
 0x27d   : >> { %v6279_v20 = vsub.s32 4, %v7427_v51  ;;  %v6285_v53 = vrot.slane %v7424_v35, %v7429_v24  ;;  %v6289_v5 = vrot.slane %v7425_v0, %v7429_v24  ;;  %v6292_v27 = vsub.s32 5, %v7427_v51  ;;  %s4360_s4 = sshll.u32 %s1597_s15, 4  ;;  %s1595_s29 = sadd.s32 1, %s5230_s29  }
 0x27e   : >> { %v6295_v29 = vsub.s32 6, %v7427_v51  ;;  %v6299_v59 = vrot.slane %v7424_v35, %v7432_v58  ;;  %v6303_v60 = vrot.slane %v7425_v0, %v7432_v58  ;;  %v6310_v17 = vsub.s32 7, %v7427_v51  ;;  %s6328_s22 = scalar_lea.vmem [#allocation2], %s4360_s4  ;;  %p1592_p13 = scmp.ge.s32.totalorder %s1595_s29, 4  }
 0x27f   : >> { %7428 = vst [vmem:[#allocation47_spill] sm:$0xff] %v6279_v20  ;;  %7430 = vst [vmem:[#allocation48_spill] sm:$0xff] %v6292_v27  ;;  %v6307_v46 = vrot.slane %v7424_v35, %v6279_v20  ;;  %v6314_v47 = vrot.slane %v7425_v0, %v6279_v20  ;;  %v6318_v6 = vrot.slane %v7424_v35, %v6292_v27  ;;  %v6331_v54 = vld [vmem:[%s6328_s22] sm:$0xff]  ;;  %v6334_v45 = vld [vmem:[%s6328_s22 + $0x8] sm:$0xff]  ;;  %vm1798_vm2 = vcmask 1044480   ;;  %s7444_s27 = sld [smem:[#allocation60_spill]] (%p1592_p13) }
 0x280   : >> { %7431 = vst [vmem:[#allocation49_spill] sm:$0xff] %v6295_v29  ;;  %7433 = vst [vmem:[#allocation50_spill] sm:$0xff] %v6310_v17  ;;  %v6322_v34 = vrot.slane %v7425_v0, %v6292_v27  ;;  %v6326_v19 = vrot.slane %v7424_v35, %v6295_v29  ;;  %v6337_v21 = vld [vmem:[%s6328_s22 + $0x10] sm:$0xff]  ;;  %v6341_v9 = vrot.slane %v7425_v0, %v6295_v29  ;;  %v6356_v1 = vld [vmem:[%s6328_s22 + $0x18] sm:$0xff]  ;;  %vm1865_vm3 = vcmask 1043456   ;;  %s7445_s3 = sld [smem:[#allocation28_spill]] (%p1592_p13) }
 0x281   : >> { %v6345_v37 = vrot.slane %v7424_v35, %v6310_v17  ;;  %v6349_v62 = vrot.slane %v7425_v0, %v6310_v17  ;;  %v6359_v63 = vld [vmem:[%s6328_s22 + $0x20] sm:$0xff]  ;;  %v6362_v44 = vld [vmem:[%s6328_s22 + $0x28] sm:$0xff]  ;;  %v1626_v8 = vmul.f32 %v1621_v25, %v6331_v54  ;;  %v1627_v26 = vmul.f32 %v1625_v4, %v6334_v45  ;;  %v6369_v32 = vld [vmem:[%s6328_s22 + $0x30] sm:$0xff]  ;;  %s7446_s19 = sld [smem:[#allocation27_spill]] (%p1592_p13)  ;;  %s4023_s13 = sshll.u32 (%p1592_p13), %s6234_s9, 4  ;;  %s7193_s13 = int_to_ptr.vmem [resolvable:$true] %s4023_s13 }
 0x282   : >> { %v1628_v33 = vmul.f32 %v1621_v25, %v6337_v21  ;;  %v1644_v12 = vmul.f32 %v1639_v56, %v6331_v54  ;;  %v6372_v10 = vld [vmem:[%s6328_s22 + $0x38] sm:$0xff]  ;;  %v6375_v31 = vld [vmem:[%s6328_s22 + $0x40] sm:$0xff]  ;;  %v1629_v39 = vmul.f32 %v1625_v4, %v6356_v1  ;;  %v1630_v57 = vmul.f32 %v1621_v25, %v6359_v63  ;;  %v6382_v2 = vld [vmem:[%s6328_s22 + $0x48] sm:$0xff]  ;;  %s7448_s10 = sld [smem:[#allocation32_spill]] (%p1592_p13)  ;;  %s7198_s4 = scalar_lea.sflag (%p1592_p13), [#allocation6], %s479_s28 }
 0x283   : >> { %v1631_v55 = vmul.f32 %v1625_v4, %v6362_v44  ;;  %v1645_v11 = vmul.f32 %v1643_v61, %v6334_v45  ;;  %v1632_v36 = vmul.f32 %v1621_v25, %v6369_v32  ;;  %v1633_v42 = vmul.f32 %v1625_v4, %v6372_v10  ;;  %s7449_s8 = sld [smem:[#allocation61_spill]] (%p1592_p13) }
 0x284   : >> { %v1634_v40 = vmul.f32 %v1621_v25, %v6375_v31  ;;  %v1646_v13 = vmul.f32 %v1639_v56, %v6337_v21  ;;  %v1635_v49 = vmul.f32 %v1625_v4, %v6382_v2  ;;  %v1647_v48 = vmul.f32 %v1643_v61, %v6356_v1 }
 0x285   : >> { %v1648_v23 = vmul.f32 %v1639_v56, %v6359_v63  ;;  %v1649_v52 = vmul.f32 %v1643_v61, %v6362_v44  ;;  %v1650_v3 = vmul.f32 %v1639_v56, %v6369_v32  ;;  %v1651_v22 = vmul.f32 %v1643_v61, %v6372_v10 }
 0x286   : >> { %v1652_v0 = vmul.f32 %v1639_v56, %v6375_v31  ;;  %v1653_v35 = vmul.f32 %v1643_v61, %v6382_v2  ;;  %v1665_v51 = vrot.slane %v1644_v12, 1  ;;  %v1666_v25 = vrot.slane %v1646_v13, 1  ;;  %s4450_s17 = smul.u32 (%p1592_p13), 48, %s7445_s3 }
 0x287   : >> { %v1668_v30 = vrot.slane %v1645_v11, 1  ;;  %v1669_v16 = vrot.slane %v1647_v48, 1  ;;  %v1671_v4 = vrot.slane %v1648_v23, 1  ;;  %v1673_v50 = vrot.slane %v1649_v52, 1  ;;  %s4350_s0 = sshll.u32 (%p1592_p13), %s7446_s19, 4 }
 0x288   : >> { %v1675_v18 = vrot.slane %v1650_v3, 1  ;;  %v1677_v41 = vrot.slane %v1651_v22, 1  ;;  %v1667_v28 = vsel %vm1664_vm0, %v1665_v51, %v1666_v25  ;;  %v1679_v29 = vrot.slane %v1652_v0, 1  ;;  %s4020_s23 = sadd.s32 (%p1592_p13), %s4450_s17, %s4350_s0  ;;  %p7450_p11 = scmp.ne.s32.totalorder (%p1592_p13), %s7448_s10, 0 }
 0x289   : >> { %v1670_v17 = vsel %vm1664_vm0, %v1668_v30, %v1669_v16  ;;  %v1681_v27 = vrot.slane %v1653_v35, 1  ;;  %v1672_v20 = vsel %vm1664_vm0, %v1666_v25, %v1671_v4  ;;  %v1674_v56 = vsel %vm1664_vm0, %v1669_v16, %v1673_v50  ;;  %s4351_s5 = sshll.u32 (%p1592_p13), %s4020_s23, 7 }
 0x28a   : >> { %v1676_v61 = vsel %vm1664_vm0, %v1671_v4, %v1675_v18  ;;  %v1678_v12 = vsel %vm1664_vm0, %v1673_v50, %v1677_v41  ;;  %v1680_v11 = vsel %vm1664_vm0, %v1675_v18, %v1679_v29  ;;  %v1693_v48 = vadd.f32 %v1667_v28, %v1626_v8  ;;  %s7191_s15 = scalar_lea.hbm (%p1592_p13), %s7449_s8, %s4351_s5 }
 0x28b   : >> { %v1682_v13 = vsel %vm1664_vm0, %v1677_v41, %v1681_v27  ;;  %v1694_v23 = vadd.f32 %v1670_v17, %v1627_v26  ;;  %v1695_v52 = vadd.f32 %v1672_v20, %v1628_v33  ;;  %v1696_v51 = vadd.f32 %v1674_v56, %v1629_v39 }
 0x28c   : >> { %v1697_v3 = vadd.f32 %v1676_v61, %v1630_v57  ;;  %v1698_v30 = vadd.f32 %v1678_v12, %v1631_v55  ;;  %v1699_v0 = vadd.f32 %v1680_v11, %v1632_v36  ;;  %v1700_v35 = vadd.f32 %v1682_v13, %v1633_v42 }
 0x28d   : >> { %v1701_v22 = vadd.f32 %v1679_v29, %v1634_v40  ;;  %v1702_v25 = vadd.f32 %v1681_v27, %v1635_v49  ;;  %v1711_v16 = vmul.f32 %v6285_v53, %v6331_v54  ;;  %v1712_v50 = vmul.f32 %v6289_v5, %v6334_v45 }
 0x28e   : >> { %v1713_v18 = vmul.f32 %v6285_v53, %v6337_v21  ;;  %v1714_v28 = vmul.f32 %v6289_v5, %v6356_v1  ;;  %v1715_v41 = vmul.f32 %v6285_v53, %v6359_v63  ;;  %v1716_v20 = vmul.f32 %v6289_v5, %v6362_v44 }
 0x28f   : >> { %v1717_v27 = vmul.f32 %v6285_v53, %v6369_v32  ;;  %v1718_v29 = vmul.f32 %v6289_v5, %v6372_v10  ;;  %v1719_v17 = vmul.f32 %v6285_v53, %v6375_v31  ;;  %v1720_v8 = vmul.f32 %v6289_v5, %v6382_v2 }
 0x290   : >> { %v1732_v26 = vrot.slane %v1711_v16, 2  ;;  %v1733_v33 = vrot.slane %v1713_v18, 2  ;;  %v1735_v39 = vrot.slane %v1712_v50, 2  ;;  %v1736_v57 = vrot.slane %v1714_v28, 2 }
 0x291   : >> { %v1738_v55 = vrot.slane %v1715_v41, 2  ;;  %v1740_v36 = vrot.slane %v1716_v20, 2  ;;  %v1742_v40 = vrot.slane %v1717_v27, 2  ;;  %v1744_v49 = vrot.slane %v1718_v29, 2 }
 0x292   : >> { %v1734_v42 = vsel %vm1731_vm1, %v1732_v26, %v1733_v33  ;;  %v1746_v4 = vrot.slane %v1719_v17, 2  ;;  %v1737_v56 = vsel %vm1731_vm1, %v1735_v39, %v1736_v57  ;;  %v1748_v12 = vrot.slane %v1720_v8, 2 }
 0x293   : >> { %v1739_v61 = vsel %vm1731_vm1, %v1733_v33, %v1738_v55  ;;  %v1741_v53 = vsel %vm1731_vm1, %v1736_v57, %v1740_v36  ;;  %v1743_v5 = vsel %vm1731_vm1, %v1738_v55, %v1742_v40  ;;  %v1745_v11 = vsel %vm1731_vm1, %v1740_v36, %v1744_v49 }
 0x294   : >> { %v1747_v13 = vsel %vm1731_vm1, %v1742_v40, %v1746_v4  ;;  %v1760_v16 = vadd.f32 %v1734_v42, %v1693_v48  ;;  %v1749_v50 = vsel %vm1731_vm1, %v1744_v49, %v1748_v12  ;;  %v1761_v18 = vadd.f32 %v1737_v56, %v1694_v23 }
 0x295   : >> { %v1762_v28 = vadd.f32 %v1739_v61, %v1695_v52  ;;  %v1763_v41 = vadd.f32 %v1741_v53, %v1696_v51  ;;  %v1764_v20 = vadd.f32 %v1743_v5, %v1697_v3  ;;  %v1765_v27 = vadd.f32 %v1745_v11, %v1698_v30 }
 0x296   : >> { %v1766_v29 = vadd.f32 %v1747_v13, %v1699_v0  ;;  %v1767_v17 = vadd.f32 %v1749_v50, %v1700_v35  ;;  %v1768_v26 = vadd.f32 %v1746_v4, %v1701_v22  ;;  %v1769_v33 = vadd.f32 %v1748_v12, %v1702_v25 }
 0x297   : >> { %v1778_v8 = vmul.f32 %v6299_v59, %v6331_v54  ;;  %v1779_v39 = vmul.f32 %v6303_v60, %v6334_v45  ;;  %v1780_v48 = vmul.f32 %v6299_v59, %v6337_v21  ;;  %v1781_v23 = vmul.f32 %v6303_v60, %v6356_v1 }
 0x298   : >> { %v1782_v52 = vmul.f32 %v6299_v59, %v6359_v63  ;;  %v1783_v51 = vmul.f32 %v6303_v60, %v6362_v44  ;;  %v1784_v3 = vmul.f32 %v6299_v59, %v6369_v32  ;;  %v1785_v30 = vmul.f32 %v6303_v60, %v6372_v10 }
 0x299   : >> { %v1786_v0 = vmul.f32 %v6299_v59, %v6375_v31  ;;  %v1787_v35 = vmul.f32 %v6303_v60, %v6382_v2  ;;  %v1799_v22 = vrot.slane %v1778_v8, 3  ;;  %v1800_v25 = vrot.slane %v1780_v48, 3 }
 0x29a   : >> { %v1802_v57 = vrot.slane %v1779_v39, 3  ;;  %v1803_v55 = vrot.slane %v1781_v23, 3  ;;  %v1805_v36 = vrot.slane %v1782_v52, 3  ;;  %v1807_v42 = vrot.slane %v1783_v51, 3 }
 0x29b   : >> { %v1809_v40 = vrot.slane %v1784_v3, 3  ;;  %v1811_v49 = vrot.slane %v1785_v30, 3  ;;  %v1801_v4 = vsel %vm1798_vm2, %v1799_v22, %v1800_v25  ;;  %v1813_v61 = vrot.slane %v1786_v0, 3 }
 0x29c   : >> { %v1804_v56 = vsel %vm1798_vm2, %v1802_v57, %v1803_v55  ;;  %v1815_v53 = vrot.slane %v1787_v35, 3  ;;  %v1806_v59 = vsel %vm1798_vm2, %v1800_v25, %v1805_v36  ;;  %v1808_v12 = vsel %vm1798_vm2, %v1803_v55, %v1807_v42 }
 0x29d   : >> { %v1810_v60 = vsel %vm1798_vm2, %v1805_v36, %v1809_v40  ;;  %v1812_v5 = vsel %vm1798_vm2, %v1807_v42, %v1811_v49  ;;  %v1814_v11 = vsel %vm1798_vm2, %v1809_v40, %v1813_v61  ;;  %v1827_v50 = vadd.f32 %v1801_v4, %v1760_v16 }
 0x29e   : >> { %v1816_v13 = vsel %vm1798_vm2, %v1811_v49, %v1815_v53  ;;  %v1828_v8 = vadd.f32 %v1804_v56, %v1761_v18  ;;  %v1829_v39 = vadd.f32 %v1806_v59, %v1762_v28  ;;  %v1830_v48 = vadd.f32 %v1808_v12, %v1763_v41 }
 0x29f   : >> { %v1831_v23 = vadd.f32 %v1810_v60, %v1764_v20  ;;  %v1832_v52 = vadd.f32 %v1812_v5, %v1765_v27  ;;  %v1833_v51 = vadd.f32 %v1814_v11, %v1766_v29  ;;  %v1834_v3 = vadd.f32 %v1816_v13, %v1767_v17 }
 0x2a0   : >> { %v1835_v30 = vadd.f32 %v1813_v61, %v1768_v26  ;;  %v1836_v0 = vadd.f32 %v1815_v53, %v1769_v33  ;;  %v1845_v35 = vmul.f32 %v6307_v46, %v6331_v54  ;;  %v1846_v22 = vmul.f32 %v6314_v47, %v6334_v45 }
 0x2a1   : >> { %v1847_v25 = vmul.f32 %v6307_v46, %v6337_v21  ;;  %v1848_v16 = vmul.f32 %v6314_v47, %v6356_v1  ;;  %v1849_v18 = vmul.f32 %v6307_v46, %v6359_v63  ;;  %v1850_v28 = vmul.f32 %v6314_v47, %v6362_v44 }
 0x2a2   : >> { %v1851_v41 = vmul.f32 %v6307_v46, %v6369_v32  ;;  %v1852_v20 = vmul.f32 %v6314_v47, %v6372_v10  ;;  %v1853_v27 = vmul.f32 %v6307_v46, %v6375_v31  ;;  %v1854_v29 = vmul.f32 %v6314_v47, %v6382_v2 }
 0x2a3   : >> { %v1866_v17 = vrot.slane %v1845_v35, 4  ;;  %v1867_v26 = vrot.slane %v1847_v25, 4  ;;  %v1869_v33 = vrot.slane %v1846_v22, 4  ;;  %v1870_v57 = vrot.slane %v1848_v16, 4 }
 0x2a4   : >> { %v1872_v55 = vrot.slane %v1849_v18, 4  ;;  %v1874_v36 = vrot.slane %v1850_v28, 4  ;;  %vm1932_vm4 = vcmask 1042432   ;;  %v1876_v40 = vrot.slane %v1851_v41, 4 }
 0x2a5   : >> { %v1868_v42 = vsel %vm1865_vm3, %v1866_v17, %v1867_v26  ;;  %v1878_v49 = vrot.slane %v1852_v20, 4  ;;  %v1880_v4 = vrot.slane %v1853_v27, 4  ;;  %v1871_v56 = vsel %vm1865_vm3, %v1869_v33, %v1870_v57 }
 0x2a6   : >> { %v1873_v61 = vsel %vm1865_vm3, %v1867_v26, %v1872_v55  ;;  %v1875_v46 = vsel %vm1865_vm3, %v1870_v57, %v1874_v36  ;;  %v1882_v53 = vrot.slane %v1854_v29, 4  ;;  %v1877_v47 = vsel %vm1865_vm3, %v1872_v55, %v1876_v40 }
 0x2a7   : >> { %v1879_v59 = vsel %vm1865_vm3, %v1874_v36, %v1878_v49  ;;  %v1881_v12 = vsel %vm1865_vm3, %v1876_v40, %v1880_v4  ;;  %v1894_v60 = vadd.f32 %v1868_v42, %v1827_v50  ;;  %v1895_v11 = vadd.f32 %v1871_v56, %v1828_v8 }
 0x2a8   : >> { %v1883_v5 = vsel %vm1865_vm3, %v1878_v49, %v1882_v53  ;;  %v1896_v13 = vadd.f32 %v1873_v61, %v1829_v39  ;;  %v1897_v35 = vadd.f32 %v1875_v46, %v1830_v48  ;;  %v1898_v22 = vadd.f32 %v1877_v47, %v1831_v23 }
 0x2a9   : >> { %v1899_v25 = vadd.f32 %v1879_v59, %v1832_v52  ;;  %v1900_v16 = vadd.f32 %v1881_v12, %v1833_v51  ;;  %v1901_v18 = vadd.f32 %v1883_v5, %v1834_v3  ;;  %v1902_v28 = vadd.f32 %v1880_v4, %v1835_v30 }
 0x2aa   : >> { %v1903_v41 = vadd.f32 %v1882_v53, %v1836_v0  ;;  %v1912_v20 = vmul.f32 %v6318_v6, %v6331_v54  ;;  %v1913_v27 = vmul.f32 %v6322_v34, %v6334_v45  ;;  %v1914_v50 = vmul.f32 %v6318_v6, %v6337_v21 }
 0x2ab   : >> { %v1915_v8 = vmul.f32 %v6322_v34, %v6356_v1  ;;  %v1916_v39 = vmul.f32 %v6318_v6, %v6359_v63  ;;  %v1917_v48 = vmul.f32 %v6322_v34, %v6362_v44  ;;  %v1918_v23 = vmul.f32 %v6318_v6, %v6369_v32 }
 0x2ac   : >> { %v1919_v52 = vmul.f32 %v6322_v34, %v6372_v10  ;;  %v1920_v51 = vmul.f32 %v6318_v6, %v6375_v31  ;;  %v1921_v3 = vmul.f32 %v6322_v34, %v6382_v2  ;;  %v1933_v30 = vrot.slane %v1912_v20, 5 }
 0x2ad   : >> { %v1934_v0 = vrot.slane %v1914_v50, 5  ;;  %v1936_v29 = vrot.slane %v1913_v27, 5  ;;  %v1937_v17 = vrot.slane %v1915_v8, 5  ;;  %vm1999_vm5 = vcmask 1041408  }
 0x2ae   : >> { %v1939_v26 = vrot.slane %v1916_v39, 5  ;;  %v1941_v33 = vrot.slane %v1917_v48, 5  ;;  %v1943_v57 = vrot.slane %v1918_v23, 5  ;;  %v1945_v55 = vrot.slane %v1919_v52, 5 }
 0x2af   : >> { %v1935_v36 = vsel %vm1932_vm4, %v1933_v30, %v1934_v0  ;;  %v1938_v42 = vsel %vm1932_vm4, %v1936_v29, %v1937_v17  ;;  %v1947_v40 = vrot.slane %v1920_v51, 5  ;;  %v1949_v49 = vrot.slane %v1921_v3, 5 }
 0x2b0   : >> { %v1940_v6 = vsel %vm1932_vm4, %v1934_v0, %v1939_v26  ;;  %v1942_v4 = vsel %vm1932_vm4, %v1937_v17, %v1941_v33  ;;  %v1944_v34 = vsel %vm1932_vm4, %v1939_v26, %v1943_v57  ;;  %v1946_v56 = vsel %vm1932_vm4, %v1941_v33, %v1945_v55 }
 0x2b1   : >> { %v1948_v61 = vsel %vm1932_vm4, %v1943_v57, %v1947_v40  ;;  %v1950_v46 = vsel %vm1932_vm4, %v1945_v55, %v1949_v49  ;;  %v1961_v53 = vadd.f32 %v1935_v36, %v1894_v60  ;;  %v1962_v47 = vadd.f32 %v1938_v42, %v1895_v11 }
 0x2b2   : >> { %v1963_v59 = vadd.f32 %v1940_v6, %v1896_v13  ;;  %v1964_v12 = vadd.f32 %v1942_v4, %v1897_v35  ;;  %v1965_v5 = vadd.f32 %v1944_v34, %v1898_v22  ;;  %v1966_v20 = vadd.f32 %v1946_v56, %v1899_v25 }
 0x2b3   : >> { %v1967_v27 = vadd.f32 %v1948_v61, %v1900_v16  ;;  %v1968_v50 = vadd.f32 %v1950_v46, %v1901_v18  ;;  %v1969_v8 = vadd.f32 %v1947_v40, %v1902_v28  ;;  %v1970_v39 = vadd.f32 %v1949_v49, %v1903_v41 }
 0x2b4   : >> { %v1979_v48 = vmul.f32 %v6326_v19, %v6331_v54  ;;  %v1980_v23 = vmul.f32 %v6341_v9, %v6334_v45  ;;  %v1981_v52 = vmul.f32 %v6326_v19, %v6337_v21  ;;  %v1982_v60 = vmul.f32 %v6341_v9, %v6356_v1 }
 0x2b5   : >> { %v1983_v11 = vmul.f32 %v6326_v19, %v6359_v63  ;;  %v1984_v13 = vmul.f32 %v6341_v9, %v6362_v44  ;;  %v1985_v35 = vmul.f32 %v6326_v19, %v6369_v32  ;;  %v1986_v54 = vmul.f32 %v6341_v9, %v6372_v10 }
 0x2b6   : >> { %v1987_v45 = vmul.f32 %v6326_v19, %v6375_v31  ;;  %v1988_v22 = vmul.f32 %v6341_v9, %v6382_v2  ;;  %v2000_v25 = vrot.slane %v1979_v48, 6  ;;  %v2001_v16 = vrot.slane %v1981_v52, 6 }
 0x2b7   : >> { %v2003_v18 = vrot.slane %v1980_v23, 6  ;;  %v2004_v28 = vrot.slane %v1982_v60, 6  ;;  %v2006_v41 = vrot.slane %v1983_v11, 6  ;;  %v2008_v51 = vrot.slane %v1984_v13, 6 }
 0x2b8   : >> { %vm2062_vm6 = vcmask 1040384   ;;  %v2002_v3 = vsel %vm1999_vm5, %v2000_v25, %v2001_v16  ;;  %v2010_v30 = vrot.slane %v1985_v35, 6  ;;  %v2012_v0 = vrot.slane %v1986_v54, 6 }
 0x2b9   : >> { %v2014_v29 = vrot.slane %v1987_v45, 6  ;;  %v2005_v17 = vsel %vm1999_vm5, %v2003_v18, %v2004_v28  ;;  %v2007_v26 = vsel %vm1999_vm5, %v2001_v16, %v2006_v41  ;;  %v2009_v19 = vsel %vm1999_vm5, %v2004_v28, %v2008_v51 }
 0x2ba   : >> { %v2016_v33 = vrot.slane %v1988_v22, 6  ;;  %v2011_v9 = vsel %vm1999_vm5, %v2006_v41, %v2010_v30  ;;  %v2013_v57 = vsel %vm1999_vm5, %v2008_v51, %v2012_v0  ;;  %v2028_v36 = vadd.f32 %v2002_v3, %v1961_v53 }
 0x2bb   : >> { %v2015_v55 = vsel %vm1999_vm5, %v2010_v30, %v2014_v29  ;;  %v2029_v40 = vadd.f32 %v2005_v17, %v1962_v47  ;;  %v2030_v49 = vadd.f32 %v2007_v26, %v1963_v59  ;;  %v2031_v6 = vadd.f32 %v2009_v19, %v1964_v12 }
 0x2bc   : >> { %v2017_v42 = vsel %vm1999_vm5, %v2012_v0, %v2016_v33  ;;  %v2032_v4 = vadd.f32 %v2011_v9, %v1965_v5  ;;  %v2033_v34 = vadd.f32 %v2013_v57, %v1966_v20  ;;  %v2034_v56 = vadd.f32 %v2015_v55, %v1967_v27 }
 0x2bd   : >> { %v2035_v61 = vadd.f32 %v2017_v42, %v1968_v50  ;;  %v2036_v46 = vadd.f32 %v2014_v29, %v1969_v8  ;;  %v2037_v48 = vadd.f32 %v2016_v33, %v1970_v39  ;;  %v2046_v23 = vmul.f32 %v6345_v37, %v6337_v21  ;;  %v6567_v29 = vld [vmem:[%s6328_s22 + $0x50] sm:$0xff]  ;;  %v6582_v42 = vld [vmem:[%s6328_s22 + $0x58] sm:$0xff] }
 0x2be   : >> { %v2047_v52 = vmul.f32 %v6349_v62, %v6356_v1  ;;  %v2048_v53 = vmul.f32 %v6345_v37, %v6359_v63  ;;  %v2049_v47 = vmul.f32 %v6349_v62, %v6362_v44  ;;  %v2050_v59 = vmul.f32 %v6345_v37, %v6369_v32 }
 0x2bf   : >> { %v2051_v12 = vmul.f32 %v6349_v62, %v6372_v10  ;;  %v2052_v5 = vmul.f32 %v6345_v37, %v6375_v31  ;;  %v2053_v20 = vmul.f32 %v6349_v62, %v6382_v2  ;;  %v2063_v27 = vrot.slane %v2046_v23, 7 }
 0x2c0   : >> { %v2064_v50 = vrot.slane %v2047_v52, 7  ;;  %v2065_v8 = vrot.slane %v2048_v53, 7  ;;  %v2067_v39 = vrot.slane %v2049_v47, 7  ;;  %v2069_v60 = vrot.slane %v2050_v59, 7 }
 0x2c1   : >> { %v2071_v11 = vrot.slane %v2051_v12, 7  ;;  %v2073_v13 = vrot.slane %v2052_v5, 7  ;;  %v2075_v35 = vrot.slane %v2053_v20, 7  ;;  %v2087_v54 = vadd.f32 %v2063_v27, %v2028_v36 }
 0x2c2   : >> { %v2088_v45 = vadd.f32 %v2064_v50, %v2029_v40  ;;  %v2066_v22 = vsel %vm2062_vm6, %v2063_v27, %v2065_v8  ;;  %v2068_v25 = vsel %vm2062_vm6, %v2064_v50, %v2067_v39  ;;  %v2070_v37 = vsel %vm2062_vm6, %v2065_v8, %v2069_v60 }
 0x2c3   : >> { %v2072_v16 = vsel %vm2062_vm6, %v2067_v39, %v2071_v11  ;;  %v2074_v62 = vsel %vm2062_vm6, %v2069_v60, %v2073_v13  ;;  %v2076_v18 = vsel %vm2062_vm6, %v2071_v11, %v2075_v35  ;;  %v2089_v28 = vadd.f32 %v2066_v22, %v2030_v49 }
 0x2c4   : >> { %v2090_v41 = vadd.f32 %v2068_v25, %v2031_v6  ;;  %v2091_v51 = vadd.f32 %v2070_v37, %v2032_v4  ;;  %v2092_v3 = vadd.f32 %v2072_v16, %v2033_v34  ;;  %v2093_v30 = vadd.f32 %v2074_v62, %v2034_v56 }
 0x2c5   : >> { %v2094_v0 = vadd.f32 %v2076_v18, %v2035_v61  ;;  %v2095_v17 = vadd.f32 %v2073_v13, %v2036_v46  ;;  %v2096_v26 = vadd.f32 %v2075_v35, %v2037_v48  ;;  %v2104_v19 = vrot.slane %v6244_v14, %v6009_v43 }
 0x2c6   : >> { %v2105_v33 = vmul.f32 %v6353_v7, %v6337_v21  ;;  %v2107_v9 = vmul.f32 %v6353_v7, %v6359_v63  ;;  %v2109_v57 = vmul.f32 %v6353_v7, %v6369_v32  ;;  %v2111_v55 = vmul.f32 %v6353_v7, %v6375_v31 }
 0x2c7   : >> { %v2113_v36 = vmul.f32 %v6353_v7, %v6567_v29  ;;  %v2106_v40 = vmul.f32 %v2104_v19, %v6356_v1  ;;  %v2108_v49 = vmul.f32 %v2104_v19, %v6362_v44  ;;  %v2110_v6 = vmul.f32 %v2104_v19, %v6372_v10 }
 0x2c8   : >> { %v2112_v4 = vmul.f32 %v2104_v19, %v6382_v2  ;;  %v2114_v34 = vmul.f32 %v2104_v19, %v6582_v42  ;;  %v2115_v56 = vadd.f32 %v2105_v33, %v2087_v54  ;;  %v2117_v61 = vadd.f32 %v2107_v9, %v2089_v28 }
 0x2c9   : >> { %v2119_v46 = vadd.f32 %v2109_v57, %v2091_v51  ;;  %v2116_v48 = vadd.f32 %v2106_v40, %v2088_v45  ;;  %v2118_v23 = vadd.f32 %v2108_v49, %v2090_v41  ;;  %v2120_v52 = vadd.f32 %v2110_v6, %v2092_v3 }
 0x2ca   : >> { %v2121_v53 = vadd.f32 %v2111_v55, %v2093_v30  ;;  %v2122_v7 = vadd.f32 %v2112_v4, %v2094_v0  ;;  %v2123_v47 = vadd.f32 %v2113_v36, %v2095_v17  ;;  %v2124_v59 = vadd.f32 %v2114_v34, %v2096_v26 }
 0x2cb   : >> { %v2128_v12 = vrot.slane %v6242_v15, %v7426_v38  ;;  %v2132_v5 = vrot.slane %v6244_v14, %v7426_v38  ;;  %v2194_v20 = vrot.slane %v6242_v15, %v7429_v24  ;;  %v2198_v27 = vrot.slane %v6244_v14, %v7429_v24 }
 0x2cc   : >> { %v6599_v50 = vrot.slane %v6242_v15, %v7432_v58 }
 0x2cd   : >> { %v2133_v8 = vmul.f32 %v2128_v12, %v6337_v21  ;;  %v2135_v39 = vmul.f32 %v2128_v12, %v6359_v63  ;;  %v2137_v60 = vmul.f32 %v2128_v12, %v6369_v32  ;;  %v2139_v11 = vmul.f32 %v2128_v12, %v6375_v31 }
 0x2ce   : >> { %v2134_v13 = vmul.f32 %v2132_v5, %v6356_v1  ;;  %v2136_v35 = vmul.f32 %v2132_v5, %v6362_v44  ;;  %v2138_v54 = vmul.f32 %v2132_v5, %v6372_v10  ;;  %v2140_v45 = vmul.f32 %v2132_v5, %v6382_v2 }
 0x2cf   : >> { %v2141_v22 = vmul.f32 %v2128_v12, %v6567_v29  ;;  %v2142_v25 = vmul.f32 %v2132_v5, %v6582_v42  ;;  %v2153_v37 = vrot.slane %v2133_v8, 1  ;;  %v2154_v16 = vrot.slane %v2135_v39, 1 }
 0x2d0   : >> { %v2156_v62 = vrot.slane %v2134_v13, 1  ;;  %v2157_v18 = vrot.slane %v2136_v35, 1  ;;  %v2159_v28 = vrot.slane %v2137_v60, 1  ;;  %v2161_v41 = vrot.slane %v2138_v54, 1 }
 0x2d1   : >> { %v2155_v51 = vsel %vm1664_vm0, %v2153_v37, %v2154_v16  ;;  %v2163_v3 = vrot.slane %v2139_v11, 1  ;;  %v2165_v30 = vrot.slane %v2140_v45, 1  ;;  %v2167_v0 = vrot.slane %v2141_v22, 1 }
 0x2d2   : >> { %v2158_v17 = vsel %vm1664_vm0, %v2156_v62, %v2157_v18  ;;  %v2160_v26 = vsel %vm1664_vm0, %v2154_v16, %v2159_v28  ;;  %v2162_v19 = vsel %vm1664_vm0, %v2157_v18, %v2161_v41  ;;  %v2169_v33 = vrot.slane %v2142_v25, 1 }
 0x2d3   : >> { %v2164_v9 = vsel %vm1664_vm0, %v2159_v28, %v2163_v3  ;;  %v2166_v57 = vsel %vm1664_vm0, %v2161_v41, %v2165_v30  ;;  %v2168_v55 = vsel %vm1664_vm0, %v2163_v3, %v2167_v0  ;;  %v2181_v36 = vadd.f32 %v2155_v51, %v2115_v56 }
 0x2d4   : >> { %v2170_v40 = vsel %vm1664_vm0, %v2165_v30, %v2169_v33  ;;  %v2182_v49 = vadd.f32 %v2158_v17, %v2116_v48  ;;  %v2183_v6 = vadd.f32 %v2160_v26, %v2117_v61  ;;  %v2184_v4 = vadd.f32 %v2162_v19, %v2118_v23 }
 0x2d5   : >> { %v2185_v34 = vadd.f32 %v2164_v9, %v2119_v46  ;;  %v2186_v12 = vadd.f32 %v2166_v57, %v2120_v52  ;;  %v2187_v5 = vadd.f32 %v2168_v55, %v2121_v53  ;;  %v2188_v8 = vadd.f32 %v2170_v40, %v2122_v7 }
 0x2d6   : >> { %v2189_v39 = vadd.f32 %v2167_v0, %v2123_v47  ;;  %v2190_v60 = vadd.f32 %v2169_v33, %v2124_v59  ;;  %v2199_v11 = vmul.f32 %v2194_v20, %v6337_v21  ;;  %v2200_v13 = vmul.f32 %v2198_v27, %v6356_v1 }
 0x2d7   : >> { %v2201_v35 = vmul.f32 %v2194_v20, %v6359_v63  ;;  %v2202_v54 = vmul.f32 %v2198_v27, %v6362_v44  ;;  %v2203_v56 = vmul.f32 %v2194_v20, %v6369_v32  ;;  %v2204_v48 = vmul.f32 %v2198_v27, %v6372_v10 }
 0x2d8   : >> { %v2205_v61 = vmul.f32 %v2194_v20, %v6375_v31  ;;  %v2206_v46 = vmul.f32 %v2198_v27, %v6382_v2  ;;  %v2207_v23 = vmul.f32 %v2194_v20, %v6567_v29  ;;  %v2208_v52 = vmul.f32 %v2198_v27, %v6582_v42 }
 0x2d9   : >> { %v2219_v53 = vrot.slane %v2199_v11, 2  ;;  %v2220_v7 = vrot.slane %v2201_v35, 2  ;;  %v2222_v47 = vrot.slane %v2200_v13, 2  ;;  %v2223_v59 = vrot.slane %v2202_v54, 2 }
 0x2da   : >> { %v2225_v45 = vrot.slane %v2203_v56, 2  ;;  %v2227_v22 = vrot.slane %v2204_v48, 2  ;;  %v2229_v25 = vrot.slane %v2205_v61, 2  ;;  %v2231_v37 = vrot.slane %v2206_v46, 2 }
 0x2db   : >> { %v2221_v16 = vsel %vm1731_vm1, %v2219_v53, %v2220_v7  ;;  %v2224_v62 = vsel %vm1731_vm1, %v2222_v47, %v2223_v59  ;;  %v2233_v18 = vrot.slane %v2207_v23, 2  ;;  %v2235_v28 = vrot.slane %v2208_v52, 2 }
 0x2dc   : >> { %v2226_v41 = vsel %vm1731_vm1, %v2220_v7, %v2225_v45  ;;  %v2228_v20 = vsel %vm1731_vm1, %v2223_v59, %v2227_v22  ;;  %v2230_v27 = vsel %vm1731_vm1, %v2225_v45, %v2229_v25  ;;  %v2232_v51 = vsel %vm1731_vm1, %v2227_v22, %v2231_v37 }
 0x2dd   : >> { %v2234_v3 = vsel %vm1731_vm1, %v2229_v25, %v2233_v18  ;;  %v2236_v30 = vsel %vm1731_vm1, %v2231_v37, %v2235_v28  ;;  %v2247_v0 = vadd.f32 %v2221_v16, %v2181_v36  ;;  %v2248_v17 = vadd.f32 %v2224_v62, %v2182_v49 }
 0x2de   : >> { %v2249_v26 = vadd.f32 %v2226_v41, %v2183_v6  ;;  %v2250_v19 = vadd.f32 %v2228_v20, %v2184_v4  ;;  %v2251_v33 = vadd.f32 %v2230_v27, %v2185_v34  ;;  %v2252_v9 = vadd.f32 %v2232_v51, %v2186_v12  ;;  %v7434_v4 = vld [vmem:[#allocation47_spill] sm:$0xff] }
 0x2df   : >> { %v2253_v57 = vadd.f32 %v2234_v3, %v2187_v5  ;;  %v2254_v55 = vadd.f32 %v2236_v30, %v2188_v8  ;;  %v2255_v40 = vadd.f32 %v2233_v18, %v2189_v39  ;;  %v2256_v11 = vadd.f32 %v2235_v28, %v2190_v60 }
 0x2e0   : >> { %v2264_v13 = vrot.slane %v6244_v14, %v7432_v58  ;;  %v2265_v35 = vmul.f32 %v6599_v50, %v6337_v21  ;;  %v2267_v54 = vmul.f32 %v6599_v50, %v6359_v63  ;;  %v2269_v36 = vmul.f32 %v6599_v50, %v6369_v32 }
 0x2e1   : >> { %v2271_v49 = vmul.f32 %v6599_v50, %v6375_v31  ;;  %v2273_v6 = vmul.f32 %v6599_v50, %v6567_v29  ;;  %v2326_v34 = vrot.slane %v6242_v15, %v7434_v4  ;;  %v2330_v12 = vrot.slane %v6244_v14, %v7434_v4 }
 0x2e2   : >> { %v2266_v5 = vmul.f32 %v2264_v13, %v6356_v1  ;;  %v2268_v8 = vmul.f32 %v2264_v13, %v6362_v44  ;;  %v2270_v39 = vmul.f32 %v2264_v13, %v6372_v10  ;;  %v2272_v60 = vmul.f32 %v2264_v13, %v6382_v2 }
 0x2e3   : >> { %v2274_v56 = vmul.f32 %v2264_v13, %v6582_v42  ;;  %v2285_v48 = vrot.slane %v2265_v35, 3  ;;  %v2286_v61 = vrot.slane %v2267_v54, 3  ;;  %v2291_v46 = vrot.slane %v2269_v36, 3 }
 0x2e4   : >> { %v2288_v50 = vrot.slane %v2266_v5, 3  ;;  %v2289_v23 = vrot.slane %v2268_v8, 3  ;;  %v2293_v52 = vrot.slane %v2270_v39, 3  ;;  %v2295_v53 = vrot.slane %v2271_v49, 3 }
 0x2e5   : >> { %v2287_v7 = vsel %vm1798_vm2, %v2285_v48, %v2286_v61  ;;  %v2292_v47 = vsel %vm1798_vm2, %v2286_v61, %v2291_v46  ;;  %v2297_v59 = vrot.slane %v2272_v60, 3  ;;  %v2299_v45 = vrot.slane %v2273_v6, 3 }
 0x2e6   : >> { %v2290_v22 = vsel %vm1798_vm2, %v2288_v50, %v2289_v23  ;;  %v2294_v25 = vsel %vm1798_vm2, %v2289_v23, %v2293_v52  ;;  %v2296_v37 = vsel %vm1798_vm2, %v2291_v46, %v2295_v53  ;;  %v2301_v16 = vrot.slane %v2274_v56, 3 }
 0x2e7   : >> { %v2298_v62 = vsel %vm1798_vm2, %v2293_v52, %v2297_v59  ;;  %v2300_v18 = vsel %vm1798_vm2, %v2295_v53, %v2299_v45  ;;  %v2313_v28 = vadd.f32 %v2287_v7, %v2247_v0  ;;  %v2314_v41 = vadd.f32 %v2290_v22, %v2248_v17 }
 0x2e8   : >> { %v2302_v20 = vsel %vm1798_vm2, %v2297_v59, %v2301_v16  ;;  %v2315_v27 = vadd.f32 %v2292_v47, %v2249_v26  ;;  %v2316_v51 = vadd.f32 %v2294_v25, %v2250_v19  ;;  %v2317_v3 = vadd.f32 %v2296_v37, %v2251_v33 }
 0x2e9   : >> { %v2318_v30 = vadd.f32 %v2298_v62, %v2252_v9  ;;  %v2319_v13 = vadd.f32 %v2300_v18, %v2253_v57  ;;  %v2320_v35 = vadd.f32 %v2302_v20, %v2254_v55  ;;  %v2321_v54 = vadd.f32 %v2299_v45, %v2255_v40 }
 0x2ea   : >> { %v2322_v36 = vadd.f32 %v2301_v16, %v2256_v11  ;;  %v2331_v49 = vmul.f32 %v2326_v34, %v6337_v21  ;;  %v2332_v6 = vmul.f32 %v2330_v12, %v6356_v1  ;;  %v2333_v5 = vmul.f32 %v2326_v34, %v6359_v63 }
 0x2eb   : >> { %v2334_v8 = vmul.f32 %v2330_v12, %v6362_v44  ;;  %v2335_v0 = vmul.f32 %v2326_v34, %v6369_v32  ;;  %v2336_v17 = vmul.f32 %v2330_v12, %v6372_v10  ;;  %v2337_v26 = vmul.f32 %v2326_v34, %v6375_v31 }
 0x2ec   : >> { %v2338_v19 = vmul.f32 %v2330_v12, %v6382_v2  ;;  %v2339_v33 = vmul.f32 %v2326_v34, %v6567_v29  ;;  %v2340_v9 = vmul.f32 %v2330_v12, %v6582_v42  ;;  %v2351_v57 = vrot.slane %v2331_v49, 4 }
 0x2ed   : >> { %v2352_v55 = vrot.slane %v2333_v5, 4  ;;  %v2354_v40 = vrot.slane %v2332_v6, 4  ;;  %v2355_v11 = vrot.slane %v2334_v8, 4  ;;  %v2357_v39 = vrot.slane %v2335_v0, 4  ;;  %v7435_v6 = vld [vmem:[#allocation48_spill] sm:$0xff]  ;;  %v7436_v0 = vld [vmem:[#allocation49_spill] sm:$0xff] }
 0x2ee   : >> { %v2359_v60 = vrot.slane %v2336_v17, 4  ;;  %v2361_v56 = vrot.slane %v2337_v26, 4  ;;  %v2363_v48 = vrot.slane %v2338_v19, 4  ;;  %v2365_v61 = vrot.slane %v2339_v33, 4 }
 0x2ef   : >> { %v2353_v46 = vsel %vm1865_vm3, %v2351_v57, %v2352_v55  ;;  %v2356_v50 = vsel %vm1865_vm3, %v2354_v40, %v2355_v11  ;;  %v2358_v23 = vsel %vm1865_vm3, %v2352_v55, %v2357_v39  ;;  %v2367_v52 = vrot.slane %v2340_v9, 4 }
 0x2f0   : >> { %v2360_v34 = vsel %vm1865_vm3, %v2355_v11, %v2359_v60  ;;  %v2362_v12 = vsel %vm1865_vm3, %v2357_v39, %v2361_v56  ;;  %v2364_v53 = vsel %vm1865_vm3, %v2359_v60, %v2363_v48  ;;  %v2366_v7 = vsel %vm1865_vm3, %v2361_v56, %v2365_v61 }
 0x2f1   : >> { %v2368_v47 = vsel %vm1865_vm3, %v2363_v48, %v2367_v52  ;;  %v2379_v59 = vadd.f32 %v2353_v46, %v2313_v28  ;;  %v2380_v45 = vadd.f32 %v2356_v50, %v2314_v41  ;;  %v2381_v22 = vadd.f32 %v2358_v23, %v2315_v27  ;;  %v7437_v41 = vld [vmem:[#allocation50_spill] sm:$0xff] }
 0x2f2   : >> { %v2382_v25 = vadd.f32 %v2360_v34, %v2316_v51  ;;  %v2383_v37 = vadd.f32 %v2362_v12, %v2317_v3  ;;  %v2384_v16 = vadd.f32 %v2364_v53, %v2318_v30  ;;  %v2385_v62 = vadd.f32 %v2366_v7, %v2319_v13 }
 0x2f3   : >> { %v2386_v18 = vadd.f32 %v2368_v47, %v2320_v35  ;;  %v2387_v20 = vadd.f32 %v2365_v61, %v2321_v54  ;;  %v2388_v49 = vadd.f32 %v2367_v52, %v2322_v36  ;;  %v2392_v5 = vrot.slane %v6242_v15, %v7435_v6 }
 0x2f4   : >> { %v2396_v8 = vrot.slane %v6244_v14, %v7435_v6  ;;  %v2458_v17 = vrot.slane %v6242_v15, %v7436_v0  ;;  %v2462_v28 = vrot.slane %v6244_v14, %v7436_v0  ;;  %v6694_v27 = vrot.slane %v6242_v15, %v7437_v41  ;;  %v4871_v15 = vld [vmem:[#allocation13 + $0x10] sm:$0xff] (%p1592_p13)  }
 0x2f5   : >> { %v2397_v51 = vmul.f32 %v2392_v5, %v6337_v21  ;;  %v2399_v3 = vmul.f32 %v2392_v5, %v6359_v63  ;;  %v2401_v30 = vmul.f32 %v2392_v5, %v6369_v32  ;;  %v2403_v13 = vmul.f32 %v2392_v5, %v6375_v31 }
 0x2f6   : >> { %v2398_v35 = vmul.f32 %v2396_v8, %v6356_v1  ;;  %v2400_v54 = vmul.f32 %v2396_v8, %v6362_v44  ;;  %v2402_v36 = vmul.f32 %v2396_v8, %v6372_v10  ;;  %v2404_v26 = vmul.f32 %v2396_v8, %v6382_v2 }
 0x2f7   : >> { %v2405_v19 = vmul.f32 %v2392_v5, %v6567_v29  ;;  %v2406_v33 = vmul.f32 %v2396_v8, %v6582_v42  ;;  %v2417_v9 = vrot.slane %v2397_v51, 5  ;;  %v2418_v21 = vrot.slane %v2399_v3, 5 }
 0x2f8   : >> { %v2420_v57 = vrot.slane %v2398_v35, 5  ;;  %v2421_v55 = vrot.slane %v2400_v54, 5  ;;  %v2423_v40 = vrot.slane %v2401_v30, 5  ;;  %v2425_v11 = vrot.slane %v2402_v36, 5  ;;  %v4845_v36 = vld [vmem:[%s6328_s22 + $0x10] sm:$0xff] }
 0x2f9   : >> { %v2419_v39 = vsel %vm1932_vm4, %v2417_v9, %v2418_v21  ;;  %v2427_v60 = vrot.slane %v2403_v13, 5  ;;  %v2429_v56 = vrot.slane %v2404_v26, 5  ;;  %v2431_v48 = vrot.slane %v2405_v19, 5 }
 0x2fa   : >> { %v2422_v61 = vsel %vm1932_vm4, %v2420_v57, %v2421_v55  ;;  %v2424_v46 = vsel %vm1932_vm4, %v2418_v21, %v2423_v40  ;;  %v2426_v50 = vsel %vm1932_vm4, %v2421_v55, %v2425_v11  ;;  %v2433_v23 = vrot.slane %v2406_v33, 5 }
 0x2fb   : >> { %v2428_v52 = vsel %vm1932_vm4, %v2423_v40, %v2427_v60  ;;  %v2430_v34 = vsel %vm1932_vm4, %v2425_v11, %v2429_v56  ;;  %v2432_v12 = vsel %vm1932_vm4, %v2427_v60, %v2431_v48  ;;  %v2445_v53 = vadd.f32 %v2419_v39, %v2379_v59 }
 0x2fc   : >> { %v2434_v7 = vsel %vm1932_vm4, %v2429_v56, %v2433_v23  ;;  %v2446_v47 = vadd.f32 %v2422_v61, %v2380_v45  ;;  %v2447_v5 = vadd.f32 %v2424_v46, %v2381_v22  ;;  %v2448_v8 = vadd.f32 %v2426_v50, %v2382_v25 }
 0x2fd   : >> { %v2449_v51 = vadd.f32 %v2428_v52, %v2383_v37  ;;  %v2450_v3 = vadd.f32 %v2430_v34, %v2384_v16  ;;  %v2451_v30 = vadd.f32 %v2432_v12, %v2385_v62  ;;  %v2452_v13 = vadd.f32 %v2434_v7, %v2386_v18  ;;  %v6735_v7 = vld [vmem:[%s6328_s22 + $0x20] sm:$0xff] }
 0x2fe   : >> { %v2453_v35 = vadd.f32 %v2431_v48, %v2387_v20  ;;  %v2454_v54 = vadd.f32 %v2433_v23, %v2388_v49  ;;  %v2463_v26 = vmul.f32 %v4845_v36, %v2458_v17  ;;  %v2464_v19 = vmul.f32 %v2462_v28, %v6356_v1 }
 0x2ff   : >> { %v2465_v33 = vmul.f32 %v2458_v17, %v6359_v63  ;;  %v2466_v9 = vmul.f32 %v2462_v28, %v6362_v44  ;;  %v2467_v59 = vmul.f32 %v2458_v17, %v6369_v32  ;;  %v2468_v45 = vmul.f32 %v2462_v28, %v6372_v10 }
 0x300   : >> { %v2469_v22 = vmul.f32 %v2458_v17, %v6375_v31  ;;  %v2470_v25 = vmul.f32 %v2462_v28, %v6382_v2  ;;  %v2471_v37 = vmul.f32 %v2458_v17, %v6567_v29  ;;  %v2472_v16 = vmul.f32 %v2462_v28, %v6582_v42 }
 0x301   : >> { %v2483_v62 = vrot.slane %v2463_v26, 6  ;;  %v2484_v18 = vrot.slane %v2465_v33, 6  ;;  %v2486_v20 = vrot.slane %v2464_v19, 6  ;;  %v2487_v1 = vrot.slane %v2466_v9, 6  ;;  %v6758_v26 = vld [vmem:[%s6328_s22 + $0x28] sm:$0xff]  ;;  %v6762_v33 = vld [vmem:[%s6328_s22 + $0x38] sm:$0xff] }
 0x302   : >> { %v2489_v49 = vrot.slane %v2467_v59, 6  ;;  %v2491_v63 = vrot.slane %v2468_v45, 6  ;;  %v2493_v21 = vrot.slane %v2469_v22, 6  ;;  %v2495_v44 = vrot.slane %v2470_v25, 6  ;;  %v6766_v59 = vld [vmem:[%s6328_s22 + $0x48] sm:$0xff] }
 0x303   : >> { %v2485_v32 = vsel %vm1999_vm5, %v2483_v62, %v2484_v18  ;;  %v2488_v10 = vsel %vm1999_vm5, %v2486_v20, %v2487_v1  ;;  %v2497_v57 = vrot.slane %v2471_v37, 6  ;;  %v2499_v31 = vrot.slane %v2472_v16, 6 }
 0x304   : >> { %v2490_v2 = vsel %vm1999_vm5, %v2484_v18, %v2489_v49  ;;  %v2492_v17 = vsel %vm1999_vm5, %v2487_v1, %v2491_v63  ;;  %v2494_v28 = vsel %vm1999_vm5, %v2489_v49, %v2493_v21  ;;  %v2496_v55 = vsel %vm1999_vm5, %v2491_v63, %v2495_v44 }
 0x305   : >> { %v2498_v40 = vsel %vm1999_vm5, %v2493_v21, %v2497_v57  ;;  %v2500_v11 = vsel %vm1999_vm5, %v2495_v44, %v2499_v31  ;;  %v2511_v39 = vadd.f32 %v2485_v32, %v2445_v53  ;;  %v2512_v60 = vadd.f32 %v2488_v10, %v2446_v47  ;;  %v6740_v47 = vld [vmem:[%s6328_s22 + $0x30] sm:$0xff] }
 0x306   : >> { %v2513_v56 = vadd.f32 %v2490_v2, %v2447_v5  ;;  %v2514_v48 = vadd.f32 %v2492_v17, %v2448_v8  ;;  %v2515_v61 = vadd.f32 %v2494_v28, %v2449_v51  ;;  %v2516_v46 = vadd.f32 %v2496_v55, %v2450_v3  ;;  %v6745_v8 = vld [vmem:[%s6328_s22 + $0x40] sm:$0xff] }
 0x307   : >> { %v2517_v50 = vadd.f32 %v2498_v40, %v2451_v30  ;;  %v2518_v23 = vadd.f32 %v2500_v11, %v2452_v13  ;;  %v2519_v52 = vadd.f32 %v2497_v57, %v2453_v35  ;;  %v2520_v34 = vadd.f32 %v2499_v31, %v2454_v54  ;;  %v7438_v30 = vld [vmem:[#allocation41_spill] sm:$0xff]  ;;  %v7439_v35 = vld [vmem:[#allocation42_spill] sm:$0xff] }
 0x308   : >> { %v2528_v12 = vrot.slane %v6244_v14, %v7437_v41  ;;  %v2529_v53 = vmul.f32 %v6735_v7, %v6694_v27  ;;  %v2531_v5 = vmul.f32 %v6740_v47, %v6694_v27  ;;  %v2533_v51 = vmul.f32 %v6745_v8, %v6694_v27  ;;  %v4872_v14 = vld [vmem:[#allocation13 + $0x48] sm:$0xff] (%p1592_p13)  }
 0x309   : >> { %v2535_v3 = vmul.f32 %v6694_v27, %v6567_v29  ;;  %v2582_v13 = vrot.slane %v7438_v30, %v6009_v43  ;;  %v2586_v54 = vrot.slane %v7439_v35, %v6009_v43  ;;  %v2610_v36 = vrot.slane %v7438_v30, %v7426_v38 }
 0x30a   : >> { %v2530_v19 = vmul.f32 %v6758_v26, %v2528_v12  ;;  %v2532_v9 = vmul.f32 %v6762_v33, %v2528_v12  ;;  %v2534_v27 = vmul.f32 %v6766_v59, %v2528_v12  ;;  %v2536_v45 = vmul.f32 %v2528_v12, %v6582_v42 }
 0x30b   : >> { %v2545_v22 = vrot.slane %v2529_v53, 7  ;;  %v2547_v25 = vrot.slane %v2531_v5, 7  ;;  %v2551_v37 = vrot.slane %v2533_v51, 7  ;;  %v2555_v16 = vrot.slane %v2535_v3, 7 }
 0x30c   : >> { %v2546_v62 = vrot.slane %v2530_v19, 7  ;;  %v2549_v18 = vrot.slane %v2532_v9, 7  ;;  %v2553_v20 = vrot.slane %v2534_v27, 7  ;;  %v2557_v1 = vrot.slane %v2536_v45, 7  ;;  %v6781_v19 = vld [vmem:[%s6328_s22 + $0x60] sm:$0xff]  ;;  %v6784_v9 = vld [vmem:[%s6328_s22 + $0x68] sm:$0xff] }
 0x30d   : >> { %v2548_v49 = vsel %vm2062_vm6, %v2545_v22, %v2547_v25  ;;  %v2552_v63 = vsel %vm2062_vm6, %v2547_v25, %v2551_v37  ;;  %v2556_v21 = vsel %vm2062_vm6, %v2551_v37, %v2555_v16  ;;  %v2569_v44 = vadd.f32 %v2545_v22, %v2511_v39 }
 0x30e   : >> { %v2550_v32 = vsel %vm2062_vm6, %v2546_v62, %v2549_v18  ;;  %v2554_v10 = vsel %vm2062_vm6, %v2549_v18, %v2553_v20  ;;  %v2558_v57 = vsel %vm2062_vm6, %v2553_v20, %v2557_v1  ;;  %v2570_v31 = vadd.f32 %v2546_v62, %v2512_v60 }
 0x30f   : >> { %v2571_v2 = vadd.f32 %v2548_v49, %v2513_v56  ;;  %v2572_v17 = vadd.f32 %v2550_v32, %v2514_v48  ;;  %v2573_v28 = vadd.f32 %v2552_v63, %v2515_v61  ;;  %v2574_v55 = vadd.f32 %v2554_v10, %v2516_v46 }
 0x310   : >> { %v2575_v40 = vadd.f32 %v2556_v21, %v2517_v50  ;;  %v2576_v11 = vadd.f32 %v2558_v57, %v2518_v23  ;;  %v2577_v12 = vadd.f32 %v2555_v16, %v2519_v52  ;;  %v2578_v53 = vadd.f32 %v2557_v1, %v2520_v34 }
 0x311   : >> { %v2587_v5 = vmul.f32 %v6735_v7, %v2582_v13  ;;  %v2588_v39 = vmul.f32 %v6758_v26, %v2586_v54  ;;  %v2589_v51 = vmul.f32 %v6740_v47, %v2582_v13  ;;  %v2590_v3 = vmul.f32 %v6762_v33, %v2586_v54 }
 0x312   : >> { %v2591_v60 = vmul.f32 %v6745_v8, %v2582_v13  ;;  %v2592_v56 = vmul.f32 %v6766_v59, %v2586_v54  ;;  %v2593_v48 = vmul.f32 %v2582_v13, %v6567_v29  ;;  %v2594_v61 = vmul.f32 %v2586_v54, %v6582_v42 }
 0x313   : >> { %v2595_v46 = vmul.f32 %v2582_v13, %v6781_v19  ;;  %v2596_v50 = vmul.f32 %v2586_v54, %v6784_v9  ;;  %v2597_v23 = vadd.f32 %v2587_v5, %v2569_v44  ;;  %v2598_v52 = vadd.f32 %v2588_v39, %v2570_v31 }
 0x314   : >> { %v2599_v34 = vadd.f32 %v2589_v51, %v2571_v2  ;;  %v2600_v27 = vadd.f32 %v2590_v3, %v2572_v17  ;;  %v2601_v45 = vadd.f32 %v2591_v60, %v2573_v28  ;;  %v2602_v22 = vadd.f32 %v2592_v56, %v2574_v55 }
 0x315   : >> { %v2603_v25 = vadd.f32 %v2593_v48, %v2575_v40  ;;  %v2604_v37 = vadd.f32 %v2594_v61, %v2576_v11  ;;  %v2605_v16 = vadd.f32 %v2595_v46, %v2577_v12  ;;  %v2606_v62 = vadd.f32 %v2596_v50, %v2578_v53 }
 0x316   : >> { %v2614_v18 = vrot.slane %v7439_v35, %v7426_v38  ;;  %v2615_v20 = vmul.f32 %v6735_v7, %v2610_v36  ;;  %v2617_v1 = vmul.f32 %v6740_v47, %v2610_v36  ;;  %v2619_v13 = vmul.f32 %v6745_v8, %v2610_v36 }
 0x317   : >> { %v2621_v54 = vmul.f32 %v2610_v36, %v6567_v29  ;;  %v2623_v49 = vmul.f32 %v2610_v36, %v6781_v19  ;;  %v2676_v63 = vrot.slane %v7438_v30, %v7429_v24  ;;  %v2680_v21 = vrot.slane %v7439_v35, %v7429_v24 }
 0x318   : >> { %v2616_v44 = vmul.f32 %v6758_v26, %v2614_v18  ;;  %v2618_v32 = vmul.f32 %v6762_v33, %v2614_v18  ;;  %v2620_v10 = vmul.f32 %v6766_v59, %v2614_v18  ;;  %v2622_v57 = vmul.f32 %v2614_v18, %v6582_v42 }
 0x319   : >> { %v2624_v31 = vmul.f32 %v2614_v18, %v6784_v9  ;;  %v2635_v2 = vrot.slane %v2615_v20, 1  ;;  %v2636_v17 = vrot.slane %v2617_v1, 1  ;;  %v2641_v28 = vrot.slane %v2619_v13, 1 }
 0x31a   : >> { %v2638_v36 = vrot.slane %v2616_v44, 1  ;;  %v2639_v55 = vrot.slane %v2618_v32, 1  ;;  %v2643_v40 = vrot.slane %v2620_v10, 1  ;;  %v2645_v11 = vrot.slane %v2621_v54, 1 }
 0x31b   : >> { %v2637_v12 = vsel %vm1664_vm0, %v2635_v2, %v2636_v17  ;;  %v2642_v53 = vsel %vm1664_vm0, %v2636_v17, %v2641_v28  ;;  %v2647_v5 = vrot.slane %v2622_v57, 1  ;;  %v2649_v39 = vrot.slane %v2623_v49, 1 }
 0x31c   : >> { %v2640_v51 = vsel %vm1664_vm0, %v2638_v36, %v2639_v55  ;;  %v2644_v3 = vsel %vm1664_vm0, %v2639_v55, %v2643_v40  ;;  %v2646_v60 = vsel %vm1664_vm0, %v2641_v28, %v2645_v11  ;;  %v2651_v56 = vrot.slane %v2624_v31, 1 }
 0x31d   : >> { %v2648_v48 = vsel %vm1664_vm0, %v2643_v40, %v2647_v5  ;;  %v2650_v61 = vsel %vm1664_vm0, %v2645_v11, %v2649_v39  ;;  %v2663_v46 = vadd.f32 %v2637_v12, %v2597_v23  ;;  %v2664_v50 = vadd.f32 %v2640_v51, %v2598_v52 }
 0x31e   : >> { %v2652_v18 = vsel %vm1664_vm0, %v2647_v5, %v2651_v56  ;;  %v2665_v20 = vadd.f32 %v2642_v53, %v2599_v34  ;;  %v2666_v1 = vadd.f32 %v2644_v3, %v2600_v27  ;;  %v2667_v13 = vadd.f32 %v2646_v60, %v2601_v45 }
 0x31f   : >> { %v2668_v54 = vadd.f32 %v2648_v48, %v2602_v22  ;;  %v2669_v49 = vadd.f32 %v2650_v61, %v2603_v25  ;;  %v2670_v44 = vadd.f32 %v2652_v18, %v2604_v37  ;;  %v2671_v32 = vadd.f32 %v2649_v39, %v2605_v16 }
 0x320   : >> { %v2672_v10 = vadd.f32 %v2651_v56, %v2606_v62  ;;  %v2681_v57 = vmul.f32 %v6735_v7, %v2676_v63  ;;  %v2682_v31 = vmul.f32 %v6758_v26, %v2680_v21  ;;  %v2683_v2 = vmul.f32 %v6740_v47, %v2676_v63 }
 0x321   : >> { %v2684_v17 = vmul.f32 %v6762_v33, %v2680_v21  ;;  %v2685_v23 = vmul.f32 %v6745_v8, %v2676_v63  ;;  %v2686_v52 = vmul.f32 %v6766_v59, %v2680_v21  ;;  %v2687_v34 = vmul.f32 %v2676_v63, %v6567_v29 }
 0x322   : >> { %v2688_v27 = vmul.f32 %v2680_v21, %v6582_v42  ;;  %v2689_v45 = vmul.f32 %v2676_v63, %v6781_v19  ;;  %v2690_v22 = vmul.f32 %v2680_v21, %v6784_v9  ;;  %v2701_v25 = vrot.slane %v2681_v57, 2 }
 0x323   : >> { %v2702_v37 = vrot.slane %v2683_v2, 2  ;;  %v2704_v16 = vrot.slane %v2682_v31, 2  ;;  %v2705_v62 = vrot.slane %v2684_v17, 2  ;;  %v2707_v28 = vrot.slane %v2685_v23, 2 }
 0x324   : >> { %v2709_v36 = vrot.slane %v2686_v52, 2  ;;  %v2711_v55 = vrot.slane %v2687_v34, 2  ;;  %v2713_v40 = vrot.slane %v2688_v27, 2  ;;  %v2715_v11 = vrot.slane %v2689_v45, 2 }
 0x325   : >> { %v2703_v12 = vsel %vm1731_vm1, %v2701_v25, %v2702_v37  ;;  %v2706_v53 = vsel %vm1731_vm1, %v2704_v16, %v2705_v62  ;;  %v2708_v5 = vsel %vm1731_vm1, %v2702_v37, %v2707_v28  ;;  %v2717_v39 = vrot.slane %v2690_v22, 2 }
 0x326   : >> { %v2710_v63 = vsel %vm1731_vm1, %v2705_v62, %v2709_v36  ;;  %v2712_v21 = vsel %vm1731_vm1, %v2707_v28, %v2711_v55  ;;  %v2714_v51 = vsel %vm1731_vm1, %v2709_v36, %v2713_v40  ;;  %v2716_v3 = vsel %vm1731_vm1, %v2711_v55, %v2715_v11 }
 0x327   : >> { %v2718_v60 = vsel %vm1731_vm1, %v2713_v40, %v2717_v39  ;;  %v2729_v56 = vadd.f32 %v2703_v12, %v2663_v46  ;;  %v2730_v48 = vadd.f32 %v2706_v53, %v2664_v50  ;;  %v2731_v61 = vadd.f32 %v2708_v5, %v2665_v20 }
 0x328   : >> { %v2732_v18 = vadd.f32 %v2710_v63, %v2666_v1  ;;  %v2733_v57 = vadd.f32 %v2712_v21, %v2667_v13  ;;  %v2734_v31 = vadd.f32 %v2714_v51, %v2668_v54  ;;  %v2735_v2 = vadd.f32 %v2716_v3, %v2669_v49 }
 0x329   : >> { %v2736_v17 = vadd.f32 %v2718_v60, %v2670_v44  ;;  %v2737_v23 = vadd.f32 %v2715_v11, %v2671_v32  ;;  %v2738_v52 = vadd.f32 %v2717_v39, %v2672_v10  ;;  %v2742_v34 = vrot.slane %v7438_v30, %v7432_v58 }
 0x32a   : >> { %v2746_v27 = vrot.slane %v7439_v35, %v7432_v58  ;;  %v2808_v45 = vrot.slane %v7438_v30, %v7434_v4  ;;  %v2812_v46 = vrot.slane %v7439_v35, %v7434_v4  ;;  %v6844_v50 = vrot.slane %v7438_v30, %v7435_v6 }
 0x32b   : >> { %v2747_v20 = vmul.f32 %v6735_v7, %v2742_v34  ;;  %v2749_v1 = vmul.f32 %v6740_v47, %v2742_v34  ;;  %v2751_v13 = vmul.f32 %v6745_v8, %v2742_v34  ;;  %v2753_v54 = vmul.f32 %v2742_v34, %v6567_v29 }
 0x32c   : >> { %v2748_v49 = vmul.f32 %v6758_v26, %v2746_v27  ;;  %v2750_v44 = vmul.f32 %v6762_v33, %v2746_v27  ;;  %v2752_v32 = vmul.f32 %v6766_v59, %v2746_v27  ;;  %v2754_v10 = vmul.f32 %v2746_v27, %v6582_v42 }
 0x32d   : >> { %v2755_v22 = vmul.f32 %v2742_v34, %v6781_v19  ;;  %v2756_v25 = vmul.f32 %v2746_v27, %v6784_v9  ;;  %v2767_v37 = vrot.slane %v2747_v20, 3  ;;  %v2768_v16 = vrot.slane %v2749_v1, 3 }
 0x32e   : >> { %v2770_v62 = vrot.slane %v2748_v49, 3  ;;  %v2771_v28 = vrot.slane %v2750_v44, 3  ;;  %v2773_v36 = vrot.slane %v2751_v13, 3  ;;  %v2775_v55 = vrot.slane %v2752_v32, 3 }
 0x32f   : >> { %v2769_v40 = vsel %vm1798_vm2, %v2767_v37, %v2768_v16  ;;  %v2777_v11 = vrot.slane %v2753_v54, 3  ;;  %v2779_v12 = vrot.slane %v2754_v10, 3  ;;  %v2781_v53 = vrot.slane %v2755_v22, 3 }
 0x330   : >> { %v2772_v5 = vsel %vm1798_vm2, %v2770_v62, %v2771_v28  ;;  %v2774_v39 = vsel %vm1798_vm2, %v2768_v16, %v2773_v36  ;;  %v2776_v63 = vsel %vm1798_vm2, %v2771_v28, %v2775_v55  ;;  %v2783_v21 = vrot.slane %v2756_v25, 3 }
 0x331   : >> { %v2778_v51 = vsel %vm1798_vm2, %v2773_v36, %v2777_v11  ;;  %v2780_v3 = vsel %vm1798_vm2, %v2775_v55, %v2779_v12  ;;  %v2782_v60 = vsel %vm1798_vm2, %v2777_v11, %v2781_v53  ;;  %v2795_v34 = vadd.f32 %v2769_v40, %v2729_v56 }
 0x332   : >> { %v2784_v27 = vsel %vm1798_vm2, %v2779_v12, %v2783_v21  ;;  %v2796_v20 = vadd.f32 %v2772_v5, %v2730_v48  ;;  %v2797_v1 = vadd.f32 %v2774_v39, %v2731_v61  ;;  %v2798_v13 = vadd.f32 %v2776_v63, %v2732_v18 }
 0x333   : >> { %v2799_v54 = vadd.f32 %v2778_v51, %v2733_v57  ;;  %v2800_v49 = vadd.f32 %v2780_v3, %v2734_v31  ;;  %v2801_v44 = vadd.f32 %v2782_v60, %v2735_v2  ;;  %v2802_v32 = vadd.f32 %v2784_v27, %v2736_v17 }
 0x334   : >> { %v2803_v10 = vadd.f32 %v2781_v53, %v2737_v23  ;;  %v2804_v22 = vadd.f32 %v2783_v21, %v2738_v52  ;;  %v2813_v25 = vmul.f32 %v6735_v7, %v2808_v45  ;;  %v2814_v37 = vmul.f32 %v6758_v26, %v2812_v46 }
 0x335   : >> { %v2815_v16 = vmul.f32 %v6740_v47, %v2808_v45  ;;  %v2816_v62 = vmul.f32 %v6762_v33, %v2812_v46  ;;  %v2817_v56 = vmul.f32 %v6745_v8, %v2808_v45  ;;  %v2818_v48 = vmul.f32 %v6766_v59, %v2812_v46 }
 0x336   : >> { %v2819_v61 = vmul.f32 %v2808_v45, %v6567_v29  ;;  %v2820_v18 = vmul.f32 %v2812_v46, %v6582_v42  ;;  %v2821_v57 = vmul.f32 %v2808_v45, %v6781_v19  ;;  %v2822_v31 = vmul.f32 %v2812_v46, %v6784_v9 }
 0x337   : >> { %v2833_v2 = vrot.slane %v2813_v25, 4  ;;  %v2834_v17 = vrot.slane %v2815_v16, 4  ;;  %v2836_v23 = vrot.slane %v2814_v37, 4  ;;  %v2837_v52 = vrot.slane %v2816_v62, 4 }
 0x338   : >> { %v2839_v28 = vrot.slane %v2817_v56, 4  ;;  %v2841_v36 = vrot.slane %v2818_v48, 4  ;;  %v2843_v55 = vrot.slane %v2819_v61, 4  ;;  %v2845_v40 = vrot.slane %v2820_v18, 4 }
 0x339   : >> { %v2835_v11 = vsel %vm1865_vm3, %v2833_v2, %v2834_v17  ;;  %v2838_v12 = vsel %vm1865_vm3, %v2836_v23, %v2837_v52  ;;  %v2847_v53 = vrot.slane %v2821_v57, 4  ;;  %v2849_v5 = vrot.slane %v2822_v31, 4 }
 0x33a   : >> { %v2840_v39 = vsel %vm1865_vm3, %v2834_v17, %v2839_v28  ;;  %v2842_v45 = vsel %vm1865_vm3, %v2837_v52, %v2841_v36  ;;  %v2844_v46 = vsel %vm1865_vm3, %v2839_v28, %v2843_v55  ;;  %v2846_v63 = vsel %vm1865_vm3, %v2841_v36, %v2845_v40 }
 0x33b   : >> { %v2848_v21 = vsel %vm1865_vm3, %v2843_v55, %v2847_v53  ;;  %v2850_v51 = vsel %vm1865_vm3, %v2845_v40, %v2849_v5  ;;  %v2861_v3 = vadd.f32 %v2835_v11, %v2795_v34  ;;  %v2862_v60 = vadd.f32 %v2838_v12, %v2796_v20 }
 0x33c   : >> { %v2863_v27 = vadd.f32 %v2840_v39, %v2797_v1  ;;  %v2864_v25 = vadd.f32 %v2842_v45, %v2798_v13  ;;  %v2865_v37 = vadd.f32 %v2844_v46, %v2799_v54  ;;  %v2866_v16 = vadd.f32 %v2846_v63, %v2800_v49 }
 0x33d   : >> { %v2867_v62 = vadd.f32 %v2848_v21, %v2801_v44  ;;  %v2868_v56 = vadd.f32 %v2850_v51, %v2802_v32  ;;  %v2869_v48 = vadd.f32 %v2847_v53, %v2803_v10  ;;  %v2870_v61 = vadd.f32 %v2849_v5, %v2804_v22 }
 0x33e   : >> { %v2878_v18 = vrot.slane %v7439_v35, %v7435_v6  ;;  %v2879_v57 = vmul.f32 %v6735_v7, %v6844_v50  ;;  %v2881_v31 = vmul.f32 %v6740_v47, %v6844_v50  ;;  %v2883_v34 = vmul.f32 %v6745_v8, %v6844_v50 }
 0x33f   : >> { %v2885_v20 = vmul.f32 %v6844_v50, %v6567_v29  ;;  %v2887_v1 = vmul.f32 %v6844_v50, %v6781_v19  ;;  %v2940_v13 = vrot.slane %v7438_v30, %v7436_v0  ;;  %v2944_v54 = vrot.slane %v7439_v35, %v7436_v0 }
 0x340   : >> { %v2880_v49 = vmul.f32 %v6758_v26, %v2878_v18  ;;  %v2882_v44 = vmul.f32 %v6762_v33, %v2878_v18  ;;  %v2884_v32 = vmul.f32 %v6766_v59, %v2878_v18  ;;  %v2886_v10 = vmul.f32 %v2878_v18, %v6582_v42 }
 0x341   : >> { %v2888_v22 = vmul.f32 %v2878_v18, %v6784_v9  ;;  %v2899_v29 = vrot.slane %v2879_v57, 5  ;;  %v2900_v2 = vrot.slane %v2881_v31, 5  ;;  %v2905_v17 = vrot.slane %v2883_v34, 5 }
 0x342   : >> { %v2902_v50 = vrot.slane %v2880_v49, 5  ;;  %v2903_v23 = vrot.slane %v2882_v44, 5  ;;  %v2907_v52 = vrot.slane %v2884_v32, 5  ;;  %v2909_v28 = vrot.slane %v2885_v20, 5 }
 0x343   : >> { %v2901_v36 = vsel %vm1932_vm4, %v2899_v29, %v2900_v2  ;;  %v2906_v55 = vsel %vm1932_vm4, %v2900_v2, %v2905_v17  ;;  %v2911_v40 = vrot.slane %v2886_v10, 5  ;;  %v2913_v11 = vrot.slane %v2887_v1, 5 }
 0x344   : >> { %v2904_v12 = vsel %vm1932_vm4, %v2902_v50, %v2903_v23  ;;  %v2908_v53 = vsel %vm1932_vm4, %v2903_v23, %v2907_v52  ;;  %v2910_v42 = vsel %vm1932_vm4, %v2905_v17, %v2909_v28  ;;  %v2915_v5 = vrot.slane %v2888_v22, 5  ;;  %v6918_v22 = vld [vmem:[%s6328_s22 + $0x50] sm:$0xff] }
 0x345   : >> { %v2912_v39 = vsel %vm1932_vm4, %v2907_v52, %v2911_v40  ;;  %v2914_v45 = vsel %vm1932_vm4, %v2909_v28, %v2913_v11  ;;  %v2927_v46 = vadd.f32 %v2901_v36, %v2861_v3  ;;  %v2928_v63 = vadd.f32 %v2904_v12, %v2862_v60 }
 0x346   : >> { %v2916_v21 = vsel %vm1932_vm4, %v2911_v40, %v2915_v5  ;;  %v2929_v51 = vadd.f32 %v2906_v55, %v2863_v27  ;;  %v2930_v18 = vadd.f32 %v2908_v53, %v2864_v25  ;;  %v2931_v57 = vadd.f32 %v2910_v42, %v2865_v37  ;;  %v6922_v37 = vld [vmem:[%s6328_s22 + $0x58] sm:$0xff] }
 0x347   : >> { %v2932_v31 = vadd.f32 %v2912_v39, %v2866_v16  ;;  %v2933_v34 = vadd.f32 %v2914_v45, %v2867_v62  ;;  %v2934_v20 = vadd.f32 %v2916_v21, %v2868_v56  ;;  %v2935_v1 = vadd.f32 %v2913_v11, %v2869_v48 }
 0x348   : >> { %v2936_v49 = vadd.f32 %v2915_v5, %v2870_v61  ;;  %v2945_v44 = vmul.f32 %v6735_v7, %v2940_v13  ;;  %v2946_v32 = vmul.f32 %v6758_v26, %v2944_v54  ;;  %v2947_v10 = vmul.f32 %v6740_v47, %v2940_v13 }
 0x349   : >> { %v2948_v3 = vmul.f32 %v6762_v33, %v2944_v54  ;;  %v2949_v60 = vmul.f32 %v6745_v8, %v2940_v13  ;;  %v2950_v27 = vmul.f32 %v6766_v59, %v2944_v54  ;;  %v2951_v25 = vmul.f32 %v6918_v22, %v2940_v13 }
 0x34a   : >> { %v2952_v16 = vmul.f32 %v6922_v37, %v2944_v54  ;;  %v2953_v7 = vmul.f32 %v2940_v13, %v6781_v19  ;;  %v2954_v26 = vmul.f32 %v2944_v54, %v6784_v9  ;;  %v2965_v62 = vrot.slane %v2945_v44, 6 }
 0x34b   : >> { %v2966_v56 = vrot.slane %v2947_v10, 6  ;;  %v2968_v48 = vrot.slane %v2946_v32, 6  ;;  %v2969_v61 = vrot.slane %v2948_v3, 6  ;;  %v2971_v29 = vrot.slane %v2949_v60, 6 }
 0x34c   : >> { %v2973_v2 = vrot.slane %v2950_v27, 6  ;;  %v2975_v17 = vrot.slane %v2951_v25, 6  ;;  %v2977_v50 = vrot.slane %v2952_v16, 6  ;;  %v2979_v23 = vrot.slane %v2953_v7, 6  ;;  %v7440_v25 = vld [vmem:[#allocation43_spill] sm:$0xff] }
 0x34d   : >> { %v2967_v52 = vsel %vm1999_vm5, %v2965_v62, %v2966_v56  ;;  %v2970_v28 = vsel %vm1999_vm5, %v2968_v48, %v2969_v61  ;;  %v2972_v36 = vsel %vm1999_vm5, %v2966_v56, %v2971_v29  ;;  %v2981_v55 = vrot.slane %v2954_v26, 6 }
 0x34e   : >> { %v2974_v13 = vsel %vm1999_vm5, %v2969_v61, %v2973_v2  ;;  %v2976_v54 = vsel %vm1999_vm5, %v2971_v29, %v2975_v17  ;;  %v2978_v40 = vsel %vm1999_vm5, %v2973_v2, %v2977_v50  ;;  %v2980_v11 = vsel %vm1999_vm5, %v2975_v17, %v2979_v23 }
 0x34f   : >> { %v2982_v12 = vsel %vm1999_vm5, %v2977_v50, %v2981_v55  ;;  %v2993_v53 = vadd.f32 %v2967_v52, %v2927_v46  ;;  %v2994_v42 = vadd.f32 %v2970_v28, %v2928_v63  ;;  %v2995_v5 = vadd.f32 %v2972_v36, %v2929_v51  ;;  %v7441_v46 = vld [vmem:[#allocation44_spill] sm:$0xff] }
 0x350   : >> { %v2996_v39 = vadd.f32 %v2974_v13, %v2930_v18  ;;  %v2997_v45 = vadd.f32 %v2976_v54, %v2931_v57  ;;  %v2998_v21 = vadd.f32 %v2978_v40, %v2932_v31  ;;  %v2999_v44 = vadd.f32 %v2980_v11, %v2933_v34 }
 0x351   : >> { %v3000_v32 = vadd.f32 %v2982_v12, %v2934_v20  ;;  %v3001_v10 = vadd.f32 %v2979_v23, %v2935_v1  ;;  %v3002_v3 = vadd.f32 %v2981_v55, %v2936_v49  ;;  %v3006_v60 = vrot.slane %v7438_v30, %v7437_v41 }
 0x352   : >> { %v3010_v27 = vrot.slane %v7439_v35, %v7437_v41  ;;  %v3064_v16 = vrot.slane %v7440_v25, %v6009_v43  ;;  %v3068_v63 = vrot.slane %v7441_v46, %v6009_v43  ;;  %v3092_v51 = vrot.slane %v7440_v25, %v7426_v38 }
 0x353   : >> { %v3011_v18 = vmul.f32 %v6740_v47, %v3006_v60  ;;  %v3013_v57 = vmul.f32 %v6745_v8, %v3006_v60  ;;  %v3015_v31 = vmul.f32 %v6918_v22, %v3006_v60  ;;  %v3017_v34 = vmul.f32 %v3006_v60, %v6781_v19 }
 0x354   : >> { %v3012_v20 = vmul.f32 %v6762_v33, %v3010_v27  ;;  %v3014_v41 = vmul.f32 %v6766_v59, %v3010_v27  ;;  %v3016_v1 = vmul.f32 %v6922_v37, %v3010_v27  ;;  %v3018_v49 = vmul.f32 %v3010_v27, %v6784_v9 }
 0x355   : >> { %v3027_v7 = vrot.slane %v3011_v18, 7  ;;  %v3029_v26 = vrot.slane %v3013_v57, 7  ;;  %v3033_v62 = vrot.slane %v3015_v31, 7  ;;  %v3037_v56 = vrot.slane %v3017_v34, 7 }
 0x356   : >> { %v3028_v48 = vrot.slane %v3012_v20, 7  ;;  %v3031_v61 = vrot.slane %v3014_v41, 7  ;;  %v3035_v29 = vrot.slane %v3016_v1, 7  ;;  %v3039_v2 = vrot.slane %v3018_v49, 7  ;;  %v6964_v41 = vld [vmem:[%s6328_s22 + $0x70] sm:$0xff]  ;;  %v6967_v1 = vld [vmem:[%s6328_s22 + $0x78] sm:$0xff] }
 0x357   : >> { %v3030_v17 = vsel %vm2062_vm6, %v3027_v7, %v3029_v26  ;;  %v3034_v50 = vsel %vm2062_vm6, %v3029_v26, %v3033_v62  ;;  %v3038_v23 = vsel %vm2062_vm6, %v3033_v62, %v3037_v56  ;;  %v3051_v52 = vadd.f32 %v3027_v7, %v2993_v53 }
 0x358   : >> { %v3032_v28 = vsel %vm2062_vm6, %v3028_v48, %v3031_v61  ;;  %v3036_v36 = vsel %vm2062_vm6, %v3031_v61, %v3035_v29  ;;  %v3040_v55 = vsel %vm2062_vm6, %v3035_v29, %v3039_v2  ;;  %v3052_v13 = vadd.f32 %v3028_v48, %v2994_v42 }
 0x359   : >> { %v3053_v54 = vadd.f32 %v3030_v17, %v2995_v5  ;;  %v3054_v40 = vadd.f32 %v3032_v28, %v2996_v39  ;;  %v3055_v11 = vadd.f32 %v3034_v50, %v2997_v45  ;;  %v3056_v12 = vadd.f32 %v3036_v36, %v2998_v21 }
 0x35a   : >> { %v3057_v60 = vadd.f32 %v3038_v23, %v2999_v44  ;;  %v3058_v27 = vadd.f32 %v3040_v55, %v3000_v32  ;;  %v3059_v18 = vadd.f32 %v3037_v56, %v3001_v10  ;;  %v3060_v57 = vadd.f32 %v3039_v2, %v3002_v3 }
 0x35b   : >> { %v3069_v31 = vmul.f32 %v6740_v47, %v3064_v16  ;;  %v3070_v53 = vmul.f32 %v6762_v33, %v3068_v63  ;;  %v3071_v34 = vmul.f32 %v6745_v8, %v3064_v16  ;;  %v3072_v20 = vmul.f32 %v6766_v59, %v3068_v63 }
 0x35c   : >> { %v3073_v42 = vmul.f32 %v6918_v22, %v3064_v16  ;;  %v3074_v5 = vmul.f32 %v6922_v37, %v3068_v63  ;;  %v3075_v39 = vmul.f32 %v3064_v16, %v6781_v19  ;;  %v3076_v45 = vmul.f32 %v3068_v63, %v6784_v9 }
 0x35d   : >> { %v3077_v21 = vmul.f32 %v3064_v16, %v6964_v41  ;;  %v3078_v44 = vmul.f32 %v3068_v63, %v6967_v1  ;;  %v3079_v32 = vadd.f32 %v3069_v31, %v3051_v52  ;;  %v3080_v10 = vadd.f32 %v3070_v53, %v3052_v13 }
 0x35e   : >> { %v3081_v3 = vadd.f32 %v3071_v34, %v3053_v54  ;;  %v3082_v49 = vadd.f32 %v3072_v20, %v3054_v40  ;;  %v3083_v7 = vadd.f32 %v3073_v42, %v3055_v11  ;;  %v3084_v26 = vadd.f32 %v3074_v5, %v3056_v12 }
 0x35f   : >> { %v3085_v62 = vadd.f32 %v3075_v39, %v3057_v60  ;;  %v3086_v56 = vadd.f32 %v3076_v45, %v3058_v27  ;;  %v3087_v48 = vadd.f32 %v3077_v21, %v3059_v18  ;;  %v3088_v61 = vadd.f32 %v3078_v44, %v3060_v57 }
 0x360   : >> { %v3096_v29 = vrot.slane %v7441_v46, %v7426_v38  ;;  %v3097_v2 = vmul.f32 %v6740_v47, %v3092_v51  ;;  %v3099_v17 = vmul.f32 %v6745_v8, %v3092_v51  ;;  %v3101_v16 = vmul.f32 %v6918_v22, %v3092_v51 }
 0x361   : >> { %v3103_v63 = vmul.f32 %v3092_v51, %v6781_v19  ;;  %v3105_v50 = vmul.f32 %v3092_v51, %v6964_v41  ;;  %v3158_v23 = vrot.slane %v7440_v25, %v7429_v24  ;;  %v3162_v52 = vrot.slane %v7441_v46, %v7429_v24  ;;  %v4874_v24 = vld [vmem:[#allocation13 + $0x40] sm:$0xff] (%p1592_p13)  }
 0x362   : >> { %v3098_v28 = vmul.f32 %v6762_v33, %v3096_v29  ;;  %v3100_v36 = vmul.f32 %v6766_v59, %v3096_v29  ;;  %v3102_v55 = vmul.f32 %v6922_v37, %v3096_v29  ;;  %v3104_v13 = vmul.f32 %v3096_v29, %v6784_v9 }
 0x363   : >> { %v3106_v54 = vmul.f32 %v3096_v29, %v6967_v1  ;;  %v3117_v40 = vrot.slane %v3097_v2, 1  ;;  %v3118_v11 = vrot.slane %v3099_v17, 1  ;;  %v3123_v12 = vrot.slane %v3101_v16, 1 }
 0x364   : >> { %v3120_v51 = vrot.slane %v3098_v28, 1  ;;  %v3121_v60 = vrot.slane %v3100_v36, 1  ;;  %v3125_v27 = vrot.slane %v3102_v55, 1  ;;  %v3127_v18 = vrot.slane %v3103_v63, 1 }
 0x365   : >> { %v3119_v57 = vsel %vm1664_vm0, %v3117_v40, %v3118_v11  ;;  %v3124_v31 = vsel %vm1664_vm0, %v3118_v11, %v3123_v12  ;;  %v3129_v53 = vrot.slane %v3104_v13, 1  ;;  %v3131_v34 = vrot.slane %v3105_v50, 1 }
 0x366   : >> { %v3122_v20 = vsel %vm1664_vm0, %v3120_v51, %v3121_v60  ;;  %v3126_v42 = vsel %vm1664_vm0, %v3121_v60, %v3125_v27  ;;  %v3128_v5 = vsel %vm1664_vm0, %v3123_v12, %v3127_v18  ;;  %v3133_v39 = vrot.slane %v3106_v54, 1 }
 0x367   : >> { %v3130_v45 = vsel %vm1664_vm0, %v3125_v27, %v3129_v53  ;;  %v3132_v21 = vsel %vm1664_vm0, %v3127_v18, %v3131_v34  ;;  %v3145_v44 = vadd.f32 %v3119_v57, %v3079_v32  ;;  %v3146_v29 = vadd.f32 %v3122_v20, %v3080_v10 }
 0x368   : >> { %v3134_v2 = vsel %vm1664_vm0, %v3129_v53, %v3133_v39  ;;  %v3147_v17 = vadd.f32 %v3124_v31, %v3081_v3  ;;  %v3148_v16 = vadd.f32 %v3126_v42, %v3082_v49  ;;  %v3149_v63 = vadd.f32 %v3128_v5, %v3083_v7 }
 0x369   : >> { %v3150_v28 = vadd.f32 %v3130_v45, %v3084_v26  ;;  %v3151_v50 = vadd.f32 %v3132_v21, %v3085_v62  ;;  %v3152_v36 = vadd.f32 %v3134_v2, %v3086_v56  ;;  %v3153_v55 = vadd.f32 %v3131_v34, %v3087_v48 }
 0x36a   : >> { %v3154_v13 = vadd.f32 %v3133_v39, %v3088_v61  ;;  %v3163_v40 = vmul.f32 %v6740_v47, %v3158_v23  ;;  %v3164_v54 = vmul.f32 %v6762_v33, %v3162_v52  ;;  %v3165_v11 = vmul.f32 %v6745_v8, %v3158_v23 }
 0x36b   : >> { %v3166_v12 = vmul.f32 %v6766_v59, %v3162_v52  ;;  %v3167_v32 = vmul.f32 %v6918_v22, %v3158_v23  ;;  %v3168_v10 = vmul.f32 %v6922_v37, %v3162_v52  ;;  %v3169_v3 = vmul.f32 %v3158_v23, %v6781_v19 }
 0x36c   : >> { %v3170_v49 = vmul.f32 %v3162_v52, %v6784_v9  ;;  %v3171_v7 = vmul.f32 %v3158_v23, %v6964_v41  ;;  %v3172_v26 = vmul.f32 %v3162_v52, %v6967_v1  ;;  %v3183_v62 = vrot.slane %v3163_v40, 2 }
 0x36d   : >> { %v3184_v56 = vrot.slane %v3165_v11, 2  ;;  %v3186_v48 = vrot.slane %v3164_v54, 2  ;;  %v3187_v61 = vrot.slane %v3166_v12, 2  ;;  %v3189_v51 = vrot.slane %v3167_v32, 2 }
 0x36e   : >> { %v3191_v60 = vrot.slane %v3168_v10, 2  ;;  %v3193_v27 = vrot.slane %v3169_v3, 2  ;;  %v3195_v18 = vrot.slane %v3170_v49, 2  ;;  %v3197_v57 = vrot.slane %v3171_v7, 2 }
 0x36f   : >> { %v3185_v31 = vsel %vm1731_vm1, %v3183_v62, %v3184_v56  ;;  %v3188_v53 = vsel %vm1731_vm1, %v3186_v48, %v3187_v61  ;;  %v3190_v34 = vsel %vm1731_vm1, %v3184_v56, %v3189_v51  ;;  %v3199_v20 = vrot.slane %v3172_v26, 2 }
 0x370   : >> { %v3192_v23 = vsel %vm1731_vm1, %v3187_v61, %v3191_v60  ;;  %v3194_v52 = vsel %vm1731_vm1, %v3189_v51, %v3193_v27  ;;  %v3196_v42 = vsel %vm1731_vm1, %v3191_v60, %v3195_v18  ;;  %v3198_v5 = vsel %vm1731_vm1, %v3193_v27, %v3197_v57 }
 0x371   : >> { %v3200_v39 = vsel %vm1731_vm1, %v3195_v18, %v3199_v20  ;;  %v3211_v45 = vadd.f32 %v3185_v31, %v3145_v44  ;;  %v3212_v21 = vadd.f32 %v3188_v53, %v3146_v29  ;;  %v3213_v2 = vadd.f32 %v3190_v34, %v3147_v17 }
 0x372   : >> { %v3214_v40 = vadd.f32 %v3192_v23, %v3148_v16  ;;  %v3215_v54 = vadd.f32 %v3194_v52, %v3149_v63  ;;  %v3216_v11 = vadd.f32 %v3196_v42, %v3150_v28  ;;  %v3217_v12 = vadd.f32 %v3198_v5, %v3151_v50 }
 0x373   : >> { %v3218_v32 = vadd.f32 %v3200_v39, %v3152_v36  ;;  %v3219_v10 = vadd.f32 %v3197_v57, %v3153_v55  ;;  %v3220_v3 = vadd.f32 %v3199_v20, %v3154_v13  ;;  %v3224_v49 = vrot.slane %v7440_v25, %v7432_v58 }
 0x374   : >> { %v3228_v7 = vrot.slane %v7441_v46, %v7432_v58  ;;  %v3290_v26 = vrot.slane %v7440_v25, %v7434_v4  ;;  %v3294_v44 = vrot.slane %v7441_v46, %v7434_v4  ;;  %v7027_v29 = vrot.slane %v7440_v25, %v7435_v6  ;;  %v4875_v58 = vld [vmem:[#allocation13] sm:$0xff] (%p1592_p13)  }
 0x375   : >> { %v3229_v17 = vmul.f32 %v6740_v47, %v3224_v49  ;;  %v3231_v16 = vmul.f32 %v6745_v8, %v3224_v49  ;;  %v3233_v63 = vmul.f32 %v6918_v22, %v3224_v49  ;;  %v3235_v28 = vmul.f32 %v3224_v49, %v6781_v19 }
 0x376   : >> { %v3230_v50 = vmul.f32 %v6762_v33, %v3228_v7  ;;  %v3232_v36 = vmul.f32 %v6766_v59, %v3228_v7  ;;  %v3234_v55 = vmul.f32 %v6922_v37, %v3228_v7  ;;  %v3236_v4 = vmul.f32 %v3228_v7, %v6784_v9 }
 0x377   : >> { %v3237_v13 = vmul.f32 %v3224_v49, %v6964_v41  ;;  %v3238_v62 = vmul.f32 %v3228_v7, %v6967_v1  ;;  %v3249_v56 = vrot.slane %v3229_v17, 3  ;;  %v3250_v48 = vrot.slane %v3231_v16, 3 }
 0x378   : >> { %v3252_v61 = vrot.slane %v3230_v50, 3  ;;  %v3253_v51 = vrot.slane %v3232_v36, 3  ;;  %v3255_v60 = vrot.slane %v3233_v63, 3  ;;  %v3257_v27 = vrot.slane %v3234_v55, 3 }
 0x379   : >> { %v3251_v18 = vsel %vm1798_vm2, %v3249_v56, %v3250_v48  ;;  %v3259_v57 = vrot.slane %v3235_v28, 3  ;;  %v3261_v31 = vrot.slane %v3236_v4, 3  ;;  %v3263_v53 = vrot.slane %v3237_v13, 3 }
 0x37a   : >> { %v3254_v34 = vsel %vm1798_vm2, %v3252_v61, %v3253_v51  ;;  %v3256_v20 = vsel %vm1798_vm2, %v3250_v48, %v3255_v60  ;;  %v3258_v23 = vsel %vm1798_vm2, %v3253_v51, %v3257_v27  ;;  %v3265_v52 = vrot.slane %v3238_v62, 3 }
 0x37b   : >> { %v3260_v42 = vsel %vm1798_vm2, %v3255_v60, %v3259_v57  ;;  %v3262_v5 = vsel %vm1798_vm2, %v3257_v27, %v3261_v31  ;;  %v3264_v39 = vsel %vm1798_vm2, %v3259_v57, %v3263_v53  ;;  %v3277_v49 = vadd.f32 %v3251_v18, %v3211_v45 }
 0x37c   : >> { %v3266_v7 = vsel %vm1798_vm2, %v3261_v31, %v3265_v52  ;;  %v3278_v17 = vadd.f32 %v3254_v34, %v3212_v21  ;;  %v3279_v16 = vadd.f32 %v3256_v20, %v3213_v2  ;;  %v3280_v63 = vadd.f32 %v3258_v23, %v3214_v40 }
 0x37d   : >> { %v3281_v28 = vadd.f32 %v3260_v42, %v3215_v54  ;;  %v3282_v50 = vadd.f32 %v3262_v5, %v3216_v11  ;;  %v3283_v36 = vadd.f32 %v3264_v39, %v3217_v12  ;;  %v3284_v55 = vadd.f32 %v3266_v7, %v3218_v32 }
 0x37e   : >> { %v3285_v4 = vadd.f32 %v3263_v53, %v3219_v10  ;;  %v3286_v13 = vadd.f32 %v3265_v52, %v3220_v3  ;;  %v3295_v62 = vmul.f32 %v6740_v47, %v3290_v26  ;;  %v3296_v56 = vmul.f32 %v6762_v33, %v3294_v44 }
 0x37f   : >> { %v3297_v48 = vmul.f32 %v6745_v8, %v3290_v26  ;;  %v3298_v61 = vmul.f32 %v6766_v59, %v3294_v44  ;;  %v3299_v45 = vmul.f32 %v6918_v22, %v3290_v26  ;;  %v3300_v21 = vmul.f32 %v6922_v37, %v3294_v44 }
 0x380   : >> { %v3301_v2 = vmul.f32 %v3290_v26, %v6781_v19  ;;  %v3302_v40 = vmul.f32 %v3294_v44, %v6784_v9  ;;  %v3303_v54 = vmul.f32 %v3290_v26, %v6964_v41  ;;  %v3304_v11 = vmul.f32 %v3294_v44, %v6967_v1 }
 0x381   : >> { %v3315_v12 = vrot.slane %v3295_v62, 4  ;;  %v3316_v47 = vrot.slane %v3297_v48, 4  ;;  %v3318_v32 = vrot.slane %v3296_v56, 4  ;;  %v3319_v33 = vrot.slane %v3298_v61, 4 }
 0x382   : >> { %v3321_v10 = vrot.slane %v3299_v45, 4  ;;  %v3323_v8 = vrot.slane %v3300_v21, 4  ;;  %v3325_v3 = vrot.slane %v3301_v2, 4  ;;  %v3327_v59 = vrot.slane %v3302_v40, 4  ;;  %v4854_v45 = vld [vmem:[%s6328_s22 + $0x30] sm:$0xff]  ;;  %v4855_v2 = vld [vmem:[%s6328_s22 + $0x40] sm:$0xff] }
 0x383   : >> { %v3317_v51 = vsel %vm1865_vm3, %v3315_v12, %v3316_v47  ;;  %v3320_v60 = vsel %vm1865_vm3, %v3318_v32, %v3319_v33  ;;  %v3329_v27 = vrot.slane %v3303_v54, 4  ;;  %v3331_v18 = vrot.slane %v3304_v11, 4 }
 0x384   : >> { %v3322_v57 = vsel %vm1865_vm3, %v3316_v47, %v3321_v10  ;;  %v3324_v26 = vsel %vm1865_vm3, %v3319_v33, %v3323_v8  ;;  %v3326_v44 = vsel %vm1865_vm3, %v3321_v10, %v3325_v3  ;;  %v3328_v31 = vsel %vm1865_vm3, %v3323_v8, %v3327_v59 }
 0x385   : >> { %v3330_v53 = vsel %vm1865_vm3, %v3325_v3, %v3329_v27  ;;  %v3332_v34 = vsel %vm1865_vm3, %v3327_v59, %v3331_v18  ;;  %v3343_v20 = vadd.f32 %v3317_v51, %v3277_v49  ;;  %v3344_v23 = vadd.f32 %v3320_v60, %v3278_v17 }
 0x386   : >> { %v3345_v52 = vadd.f32 %v3322_v57, %v3279_v16  ;;  %v3346_v42 = vadd.f32 %v3324_v26, %v3280_v63  ;;  %v3347_v5 = vadd.f32 %v3326_v44, %v3281_v28  ;;  %v3348_v39 = vadd.f32 %v3328_v31, %v3282_v50  ;;  %v4856_v50 = vld [vmem:[%s6328_s22 + $0x38] sm:$0xff] }
 0x387   : >> { %v3349_v7 = vadd.f32 %v3330_v53, %v3283_v36  ;;  %v3350_v62 = vadd.f32 %v3332_v34, %v3284_v55  ;;  %v3351_v56 = vadd.f32 %v3329_v27, %v3285_v4  ;;  %v3352_v48 = vadd.f32 %v3331_v18, %v3286_v13  ;;  %v4857_v55 = vld [vmem:[%s6328_s22 + $0x48] sm:$0xff] }
 0x388   : >> { %v3360_v61 = vrot.slane %v7441_v46, %v7435_v6  ;;  %v3361_v21 = vmul.f32 %v4854_v45, %v7027_v29  ;;  %v3363_v49 = vmul.f32 %v4855_v2, %v7027_v29  ;;  %v3365_v17 = vmul.f32 %v6918_v22, %v7027_v29 }
 0x389   : >> { %v3367_v16 = vmul.f32 %v7027_v29, %v6781_v19  ;;  %v3369_v63 = vmul.f32 %v7027_v29, %v6964_v41  ;;  %v3422_v28 = vrot.slane %v7440_v25, %v7436_v0  ;;  %v3426_v6 = vrot.slane %v7441_v46, %v7436_v0 }
 0x38a   : >> { %v3362_v36 = vmul.f32 %v4856_v50, %v3360_v61  ;;  %v3364_v4 = vmul.f32 %v4857_v55, %v3360_v61  ;;  %v3366_v13 = vmul.f32 %v6922_v37, %v3360_v61  ;;  %v3368_v40 = vmul.f32 %v3360_v61, %v6784_v9 }
 0x38b   : >> { %v3370_v54 = vmul.f32 %v3360_v61, %v6967_v1  ;;  %v3381_v19 = vrot.slane %v3361_v21, 5  ;;  %v3382_v11 = vrot.slane %v3363_v49, 5  ;;  %v3387_v12 = vrot.slane %v3365_v17, 5 }
 0x38c   : >> { %v3384_v29 = vrot.slane %v3362_v36, 5  ;;  %v3385_v47 = vrot.slane %v3364_v4, 5  ;;  %v3389_v32 = vrot.slane %v3366_v13, 5  ;;  %v3391_v33 = vrot.slane %v3367_v16, 5 }
 0x38d   : >> { %v3383_v10 = vsel %vm1932_vm4, %v3381_v19, %v3382_v11  ;;  %v3388_v0 = vsel %vm1932_vm4, %v3382_v11, %v3387_v12  ;;  %v3393_v8 = vrot.slane %v3368_v40, 5  ;;  %v3395_v3 = vrot.slane %v3369_v63, 5  ;;  %v4859_v19 = vld [vmem:[%s6328_s22 + $0x68] sm:$0xff] }
 0x38e   : >> { %v3386_v59 = vsel %vm1932_vm4, %v3384_v29, %v3385_v47  ;;  %v3390_v51 = vsel %vm1932_vm4, %v3385_v47, %v3389_v32  ;;  %v3392_v9 = vsel %vm1932_vm4, %v3387_v12, %v3391_v33  ;;  %v3397_v60 = vrot.slane %v3370_v54, 5 }
 0x38f   : >> { %v3394_v27 = vsel %vm1932_vm4, %v3389_v32, %v3393_v8  ;;  %v3396_v18 = vsel %vm1932_vm4, %v3391_v33, %v3395_v3  ;;  %v3409_v57 = vadd.f32 %v3383_v10, %v3343_v20  ;;  %v3410_v26 = vadd.f32 %v3386_v59, %v3344_v23  ;;  %v4858_v23 = vld [vmem:[%s6328_s22 + $0x60] sm:$0xff]  ;;  %s5062_s22 = scalar_lea.vmem (%p1592_p13), %s7193_s13, 2048 }
 0x390   : >> { %v3398_v44 = vsel %vm1932_vm4, %v3393_v8, %v3397_v60  ;;  %v3411_v31 = vadd.f32 %v3388_v0, %v3345_v52  ;;  %v3412_v53 = vadd.f32 %v3390_v51, %v3346_v42  ;;  %v3413_v34 = vadd.f32 %v3392_v9, %v3347_v5  ;;  %p5063_p7 = scmp.ne.s32.totalorder (%p1592_p13), %s7193_s13, %s5062_s22 }
 0x391   : >> { %v3414_v61 = vadd.f32 %v3394_v27, %v3348_v39  ;;  %v3415_v21 = vadd.f32 %v3396_v18, %v3349_v7  ;;  %v3416_v49 = vadd.f32 %v3398_v44, %v3350_v62  ;;  %v3417_v17 = vadd.f32 %v3395_v3, %v3351_v56  ;;  %v7443_v44 = vld [vmem:[#allocation46_spill] sm:$0xff] }
 0x392   : >> { %v3418_v16 = vadd.f32 %v3397_v60, %v3352_v48  ;;  %v3427_v63 = vmul.f32 %v4854_v45, %v3422_v28  ;;  %v3428_v36 = vmul.f32 %v4856_v50, %v3426_v6  ;;  %v3429_v4 = vmul.f32 %v4855_v2, %v3422_v28  ;;  %v7442_v60 = vld [vmem:[#allocation45_spill] sm:$0xff]  ;;  %p5064_p2 = pnand (%p1592_p13), %p5063_p7, %p7450_p11 }
 0x393   : >> { %v3430_v13 = vmul.f32 %v4857_v55, %v3426_v6  ;;  %v3431_v40 = vmul.f32 %v6918_v22, %v3422_v28  ;;  %v3432_v20 = vmul.f32 %v6922_v37, %v3426_v6  ;;  %v3433_v54 = vmul.f32 %v4858_v23, %v3422_v28 }
 0x394   : >> { %v3434_v52 = vmul.f32 %v4859_v19, %v3426_v6  ;;  %v3435_v42 = vmul.f32 %v3422_v28, %v6964_v41  ;;  %v3436_v5 = vmul.f32 %v3426_v6, %v6967_v1  ;;  %v3447_v39 = vrot.slane %v3427_v63, 6  ;;  %p5065_p6 = pneg (%p1592_p13), %p5064_p2 }
 0x395   : >> { %v3448_v7 = vrot.slane %v3429_v4, 6  ;;  %v3450_v62 = vrot.slane %v3428_v36, 6  ;;  %v3451_v56 = vrot.slane %v3430_v13, 6  ;;  %v3453_v48 = vrot.slane %v3431_v40, 6 }
 0x396   : >> { %v3455_v45 = vrot.slane %v3432_v20, 6  ;;  %v3457_v2 = vrot.slane %v3433_v54, 6  ;;  %v3459_v50 = vrot.slane %v3434_v52, 6  ;;  %v3461_v55 = vrot.slane %v3435_v42, 6 }
 0x397   : >> { %v3449_v22 = vsel %vm1999_vm5, %v3447_v39, %v3448_v7  ;;  %v3452_v37 = vsel %vm1999_vm5, %v3450_v62, %v3451_v56  ;;  %v3454_v11 = vsel %vm1999_vm5, %v3448_v7, %v3453_v48  ;;  %v3463_v12 = vrot.slane %v3436_v5, 6 }
 0x398   : >> { %v3456_v41 = vsel %vm1999_vm5, %v3451_v56, %v3455_v45  ;;  %v3458_v1 = vsel %vm1999_vm5, %v3453_v48, %v3457_v2  ;;  %v3460_v28 = vsel %vm1999_vm5, %v3455_v45, %v3459_v50  ;;  %v3462_v6 = vsel %vm1999_vm5, %v3457_v2, %v3461_v55 }
 0x399   : >> { %v3464_v29 = vsel %vm1999_vm5, %v3459_v50, %v3463_v12  ;;  %v3475_v47 = vadd.f32 %v3449_v22, %v3409_v57  ;;  %v3476_v32 = vadd.f32 %v3452_v37, %v3410_v26  ;;  %v3477_v33 = vadd.f32 %v3454_v11, %v3411_v31 }
 0x39a   : >> { %v3478_v10 = vadd.f32 %v3456_v41, %v3412_v53  ;;  %v3479_v0 = vadd.f32 %v3458_v1, %v3413_v34  ;;  %v3480_v8 = vadd.f32 %v3460_v28, %v3414_v61  ;;  %v3481_v3 = vadd.f32 %v3462_v6, %v3415_v21 }
 0x39b   : >> { %v3482_v59 = vadd.f32 %v3464_v29, %v3416_v49  ;;  %v3483_v51 = vadd.f32 %v3461_v55, %v3417_v17  ;;  %v3484_v9 = vadd.f32 %v3463_v12, %v3418_v16  ;;  %v3489_v27 = vrot.slane %v7442_v60, %v6009_v43 }
 0x39c   : >> { %v3493_v18 = vrot.slane %v7442_v60, %v7426_v38  ;;  %v3520_v63 = vrot.slane %v7443_v44, %v6009_v43  ;;  %v3524_v57 = vrot.slane %v7443_v44, %v7426_v38  ;;  %vm3574_vm1 = vsmask.f32 3328  ;;  %v4873_v38 = vld [vmem:[#allocation13 + $0x8] sm:$0xff] (%p1592_p13)  }
 0x39d   : >> { %v3496_v26 = vadd.f32 %v3489_v27, %v3475_v47  ;;  %v3498_v31 = vadd.f32 %v3489_v27, %v3477_v33  ;;  %v3500_v53 = vadd.f32 %v3489_v27, %v3479_v0  ;;  %v3502_v34 = vadd.f32 %v3489_v27, %v3481_v3 }
 0x39e   : >> { %v3497_v61 = vadd.f32 %v3493_v18, %v3476_v32  ;;  %v3499_v21 = vadd.f32 %v3493_v18, %v3478_v10  ;;  %v3501_v49 = vadd.f32 %v3493_v18, %v3480_v8  ;;  %v3503_v17 = vadd.f32 %v3493_v18, %v3482_v59 }
 0x39f   : >> { %v3504_v16 = vadd.f32 %v3489_v27, %v3483_v51  ;;  %v3505_v36 = vadd.f32 %v3493_v18, %v3484_v9  ;;  %vm3506_vm7 = vcmp.gt.f32.partialorder %v3496_v26, 0.0  ;;  %vm3508_vm8 = vcmp.gt.f32.partialorder %v3498_v31, 0.0 }
 0x3a0   : >> { %vm3507_vm9 = vcmp.gt.f32.partialorder %v3497_v61, 0.0  ;;  %vm3509_vm10 = vcmp.gt.f32.partialorder %v3499_v21, 0.0  ;;  %vm3510_vm11 = vcmp.gt.f32.partialorder %v3500_v53, 0.0  ;;  %vm3511_vm12 = vcmp.gt.f32.partialorder %v3501_v49, 0.0 }
 0x3a1   : >> { %vm3512_vm13 = vcmp.gt.f32.partialorder %v3502_v34, 0.0  ;;  %vm3513_vm14 = vcmp.gt.f32.partialorder %v3503_v17, 0.0  ;;  %vm3514_vm15 = vcmp.gt.f32.partialorder %v3504_v16, 0.0  ;;  %vm3515_vm0 = vcmp.gt.f32.partialorder %v3505_v36, 0.0 }
 0x3a2   : >> { %v3527_v4 = vmul.f32 %v3520_v63, %v3496_v26  ;;  %v3528_v13 = vmul.f32 %v3524_v57, %v3497_v61  ;;  %v3529_v40 = vmul.f32 %v3520_v63, %v3498_v31  ;;  %v3530_v20 = vmul.f32 %v3524_v57, %v3499_v21 }
 0x3a3   : >> { %v3531_v23 = vmul.f32 %v3520_v63, %v3500_v53  ;;  %v3532_v54 = vmul.f32 %v3524_v57, %v3501_v49  ;;  %v3533_v19 = vmul.f32 %v3520_v63, %v3502_v34  ;;  %v3534_v52 = vmul.f32 %v3524_v57, %v3503_v17 }
 0x3a4   : >> { %v3535_v42 = vmul.f32 %v3520_v63, %v3504_v16  ;;  %v3536_v5 = vmul.f32 %v3524_v57, %v3505_v36  ;;  %v3537_v39 = vsel %vm3506_vm7, %v3496_v26, %v3527_v4  ;;  %v3538_v7 = vsel %vm3507_vm9, %v3497_v61, %v3528_v13 }
 0x3a5   : >> { %v3539_v62 = vsel %vm3508_vm8, %v3498_v31, %v3529_v40  ;;  %v3540_v56 = vsel %vm3509_vm10, %v3499_v21, %v3530_v20  ;;  %v3541_v48 = vsel %vm3510_vm11, %v3500_v53, %v3531_v23  ;;  %v3542_v45 = vsel %vm3511_vm12, %v3501_v49, %v3532_v54  ;;  %v4860_v20 = vld [vmem:[#allocation13 + $0x78] sm:$0xff] (%p1592_p13)   ;;  %v4862_v54 = vld [vmem:[#allocation13 + $0x70] sm:$0xff] (%p1592_p13)  }
 0x3a6   : >> { %v3543_v2 = vsel %vm3512_vm13, %v3502_v34, %v3533_v19  ;;  %v3544_v50 = vsel %vm3513_vm14, %v3503_v17, %v3534_v52  ;;  %v3545_v55 = vsel %vm3514_vm15, %v3504_v16, %v3535_v42  ;;  %v3546_v22 = vsel %vm3515_vm0, %v3505_v36, %v3536_v5  ;;  %v4861_v23 = vld [vmem:[#allocation13 + $0x38] sm:$0xff] (%p1592_p13)   ;;  %4367 = vmatprep.subr.bf16.mxu0 (%p1592_p13), %v4860_v20  ;;  %v4863_v19 = vld [vmem:[#allocation13 + $0x30] sm:$0xff] (%p1592_p13)   ;;  %v4864_v52 = vld [vmem:[#allocation13 + $0x68] sm:$0xff] (%p1592_p13)  }
 0x3a7   : >> { %v4361_v37 = vpack.c.bf16 %v3538_v7, %v3537_v39  ;;  %v4362_v11 = vpack.c.bf16 %v3540_v56, %v3539_v62  ;;  %v4363_v12 = vpack.c.bf16 %v3542_v45, %v3541_v48  ;;  %v4364_v41 = vpack.c.bf16 %v3544_v50, %v3543_v2  ;;  %4368 = vmatpush3.bf16.msra.mxu0 (%p1592_p13), %v4861_v23  ;;  %v4865_v42 = vld [vmem:[#allocation13 + $0x28] sm:$0xff] (%p1592_p13)   ;;  %v4866_v5 = vld [vmem:[#allocation13 + $0x60] sm:$0xff] (%p1592_p13)   ;;  %v4868_v7 = vld [vmem:[#allocation13 + $0x58] sm:$0xff] (%p1592_p13)  }
 0x3a8   : >> { %v4365_v1 = vpack.c.bf16 %v3546_v22, %v3545_v55  ;;  %vm3575_vm2 = vsmask.f32 7440  ;;  %4369 = vmatprep.subr.bf16.mxu0 (%p1592_p13), %v4862_v54  ;;  %v4867_v39 = vld [vmem:[#allocation13 + $0x20] sm:$0xff] (%p1592_p13)   ;;  %v4869_v62 = vld [vmem:[#allocation13 + $0x18] sm:$0xff] (%p1592_p13)   ;;  %v4870_v56 = vld [vmem:[#allocation13 + $0x50] sm:$0xff] (%p1592_p13)  }
 0x3a9   : >> { %v3578_v28 = vshrl.u32 %v4361_v37, 16  ;;  %v3581_v6 = vshll.u32 %v4361_v37, 16  ;;  %v3587_v29 = vshll.u32 %v4362_v11, 16  ;;  %v3591_v47 = vshrl.u32 %v4362_v11, 16  ;;  %vm3576_vm3 = vmor %vm3574_vm1, %vm3575_vm2  ;;  %v3964_v54 = vld [vmem:[%s5624_s2 + $0x28] sm:$0xff] (%p1592_p13) }
 0x3aa   : >> { %v3597_v32 = vshll.u32 %v4363_v12, 16  ;;  %v3601_v33 = vshrl.u32 %v4363_v12, 16  ;;  %v3607_v10 = vshll.u32 %v4364_v41, 16  ;;  %v3611_v0 = vshrl.u32 %v4364_v41, 16 }
 0x3ab   : >> { %v3580_v8 = vrot.slane %v3578_v28, 4  ;;  %v3583_v3 = vrot.slane %v3581_v6, 5  ;;  %v3589_v59 = vrot.slane %v3587_v29, 5  ;;  %v3593_v51 = vrot.slane %v3591_v47, 4  ;;  %4370 = vmatpush3.bf16.msra.mxu0 (%p1592_p13), %v4863_v19  ;;  %v3959_v29 = vld [vmem:[%s5624_s2] sm:$0xff] (%p1592_p13) }
 0x3ac   : >> { %v3599_v9 = vrot.slane %v3597_v32, 5  ;;  %v3603_v27 = vrot.slane %v3601_v33, 4  ;;  %v3609_v18 = vrot.slane %v3607_v10, 5  ;;  %v3613_v63 = vrot.slane %v3611_v0, 4  ;;  %4371 = vmatprep.subr.bf16.mxu0 (%p1592_p13), %v4864_v52 }
 0x3ad   : >> { %v3584_v57 = vor.u32 %v3583_v3, %v3580_v8  ;;  %v3594_v26 = vor.u32 %v3593_v51, %v3589_v59  ;;  %v3617_v31 = vshll.u32 %v4365_v1, 16  ;;  %v7136_v1 = vld [vmem:[%s7444_s27] ss:$0 sm:$0xff] (%p1592_p13)  ;;  %v3960_v8 = vld [vmem:[%s5624_s2 + $0x8] sm:$0xff] (%p1592_p13) }
 0x3ae   : >> { %v3604_v53 = vor.u32 %v3603_v27, %v3599_v9  ;;  %v3614_v34 = vor.u32 %v3613_v63, %v3609_v18 }
 0x3af   : >> { %v3585_v61 = vrot.slane %v3584_v57, 4  ;;  %v3595_v21 = vrot.slane %v3594_v26, 4  ;;  %v3619_v49 = vrot.slane %v3617_v31, 5  ;;  %1594 = sbr.rel (!%p1592_p13) target bundleno = 635 (0x27b), region = 158  ;;  %4372 = vmatpush3.bf16.msra.mxu0 (%p1592_p13), %v4865_v42 }
 0x3b0   : >> { %v3605_v17 = vrot.slane %v3604_v53, 4  ;;  %v3615_v16 = vrot.slane %v3614_v34, 4  ;;  %4373 = vmatprep.subr.bf16.mxu0 (%p1592_p13), %v4866_v5  ;;  %v3962_v34 = vld [vmem:[%s5624_s2 + $0x18] sm:$0xff] (%p1592_p13) }
 0x3b1   : >> { %v3590_v36 = vsel %vm3576_vm3, %v3585_v61, %v3589_v59  ;;  %v3600_v4 = vsel %vm3576_vm3, %v3595_v21, %v3599_v9 }
 0x3b2   : >> { %v3610_v13 = vsel %vm3576_vm3, %v3605_v17, %v3609_v18  ;;  %v3620_v40 = vsel %vm3576_vm3, %v3615_v16, %v3619_v49  ;;  %3627 = vst [vmem:[%s3626_s1] sm:$0xff] %v3590_v36  ;;  %3628 = vst [vmem:[%s3626_s1 + $0x8] sm:$0xff] %v3600_v4  ;;  %v3961_v18 = vld [vmem:[%s5624_s2 + $0x10] sm:$0xff] (%p1592_p13)  ;;  %v3963_v36 = vld [vmem:[%s5624_s2 + $0x20] sm:$0xff] (%p1592_p13) }
 0x3b3   : >> { %3629 = vst [vmem:[%s3626_s1 + $0x10] sm:$0xff] %v3610_v13  ;;  %3630 = vst [vmem:[%s3626_s1 + $0x18] sm:$0xff] %v3620_v40  ;;  %4374 = vmatpush3.bf16.msra.mxu0 (%p1592_p13), %v4867_v39 }
 0x3b4   : > { %4375 = vmatprep.subr.bf16.mxu0 %v4868_v7  ;;  %v3965_v7 = vld [vmem:[%s5624_s2 + $0x30] sm:$0xff] }
 0x3b7   : > { %4376 = vmatpush3.bf16.msra.mxu0 %v4869_v62 }
 0x3b8   : > { %4377 = vmatprep.subr.bf16.mxu0 %v4870_v56 }
 0x3ba   : > { %v4878_v43 = vld [vmem:[#allocation3 + $0x4] ss:$8 sps:$4 sm:$0xff]   ;;  %v4876_v30 = vld [vmem:[#allocation3] ss:$8 sps:$4 sm:$0xff]   ;;  %v4879_v35 = vld [vmem:[#allocation3 + $0x14] ss:$8 sps:$4 sm:$0xff]  }
 0x3bb   : > { %3894 = vmatprep.mubr.bf16.mxu0 %v4878_v43  ;;  %4378 = vmatpush3.bf16.msra.mxu0 %v4871_v15  ;;  %v4881_v25 = vld [vmem:[#allocation3 + $0x10] ss:$8 sps:$4 sm:$0xff]   ;;  %v4882_v46 = vld [vmem:[#allocation3 + $0x24] ss:$8 sps:$4 sm:$0xff]   ;;  %v4884_v60 = vld [vmem:[#allocation3 + $0x20] ss:$8 sps:$4 sm:$0xff]  }
 0x3bc   : > { %4379 = vmatprep.subr.bf16.mxu0 %v4872_v14  ;;  %v4885_v44 = vld [vmem:[#allocation3 + $0x34] ss:$8 sps:$4 sm:$0xff]   ;;  %v4887_v48 = vld [vmem:[#allocation3 + $0x30] ss:$8 sps:$4 sm:$0xff]   ;;  %v4888_v45 = vld [vmem:[#allocation3 + $0x44] ss:$8 sps:$4 sm:$0xff]  }
 0x3bd   : > { %v4890_v2 = vld [vmem:[#allocation3 + $0x40] ss:$8 sps:$4 sm:$0xff]   ;;  %v4891_v50 = vld [vmem:[#allocation3 + $0x54] ss:$8 sps:$4 sm:$0xff]   ;;  %v4893_v55 = vld [vmem:[#allocation3 + $0x50] ss:$8 sps:$4 sm:$0xff]  }
 0x3be   : > { %v4894_v22 = vld [vmem:[#allocation3 + $0x64] ss:$8 sps:$4 sm:$0xff]   ;;  %v4896_v37 = vld [vmem:[#allocation3 + $0x60] ss:$8 sps:$4 sm:$0xff]   ;;  %v4897_v11 = vld [vmem:[#allocation3 + $0x74] ss:$8 sps:$4 sm:$0xff]  }
 0x3bf   : > { %4380 = vmatpush3.bf16.msra.mxu0 %v4873_v38  ;;  %v4899_v12 = vld [vmem:[#allocation3 + $0x70] ss:$8 sps:$4 sm:$0xff]  }
 0x3c0   : > { %4381 = vmatprep.subr.bf16.mxu0 %v4874_v24  ;;  %v3966_v38 = vld [vmem:[%s5624_s2 + $0x38] sm:$0xff] }
 0x3c3   : > { %4382 = vmatpush3.bf16.msra.mxu0 %v4875_v58 }
 0x3c6   : > { %3895 = vmatmul.mubr.bf16.vlgmr.msra.gmra.mxu0 %v4876_v30 }
 0x3c7   : > { %3902 = vmatprep.mubr.bf16.mxu0 %v4879_v35 }
 0x3ce   : > { %3903 = vmatmul.mubr.bf16.gmra.mxu0 %v4881_v25 }
 0x3cf   : > { %3910 = vmatprep.mubr.bf16.mxu0 %v4882_v46  ;;  %v3967_v46 = vld [vmem:[%s5624_s2 + $0x40] sm:$0xff] }
 0x3d6   : > { %3911 = vmatmul.mubr.bf16.gmra.mxu0 %v4884_v60 }
 0x3d7   : > { %3918 = vmatprep.mubr.bf16.mxu0 %v4885_v44 }
 0x3de   : > { %3919 = vmatmul.mubr.bf16.gmra.mxu0 %v4887_v48 }
 0x3df   : > { %3926 = vmatprep.mubr.bf16.mxu0 %v4888_v45 }
 0x3e6   : > { %3927 = vmatmul.mubr.bf16.gmra.mxu0 %v4890_v2 }
 0x3e7   : > { %3934 = vmatprep.mubr.bf16.mxu0 %v4891_v50  ;;  %v3968_v50 = vld [vmem:[%s5624_s2 + $0x48] sm:$0xff] }
 0x3ee   : > { %3935 = vmatmul.mubr.bf16.gmra.mxu0 %v4893_v55 }
 0x3ef   : > { %3942 = vmatprep.mubr.bf16.mxu0 %v4894_v22 }
 0x3f6   : > { %3943 = vmatmul.mubr.bf16.gmra.mxu0 %v4896_v37 }
 0x3f7   : > { %3950 = vmatprep.mubr.bf16.mxu0 %v4897_v11 }
 0x3fe   : > { %3951 = vmatmul.mubr.bf16.gmra.mxu0 %v4899_v12 }
 0x486   : > { %v4383_v41 = vpop.f32.mrf.mxu0 }
 0x488   : > { %v4384_v28 = vpop.f32.mrf.mxu0 }
 0x489   : > { %v4385_v6 = vadd.f32 %v4384_v28, %v4383_v41  ;;  %v3969_v41 = vld [vmem:[%s5624_s2 + $0x50] sm:$0xff] }
 0x48a   : > { %v4386_v47 = vpop.f32.mrf.mxu0 }
 0x48b   : > { %v3897_v32 = vadd.f32 %v4385_v6, %v7136_v1 }
 0x48c   : > { %v4387_v33 = vpop.f32.mrf.mxu0 }
 0x48d   : > { %v3975_v10 = vadd.f32 %v3959_v29, %v3897_v32  ;;  %v4388_v0 = vadd.f32 %v4387_v33, %v4386_v47  ;;  %v3970_v33 = vld [vmem:[%s5624_s2 + $0x58] sm:$0xff] }
 0x48e   : > { %v4389_v3 = vpop.f32.mrf.mxu0 }
 0x48f   : > { %3991 = vst [vmem:[%s6234_s9] sm:$0xff] %v3975_v10  ;;  %v3900_v59 = vadd.f32 %v4388_v0, %v7136_v1 }
 0x490   : > { %v4390_v51 = vpop.f32.mrf.mxu0 }
 0x491   : > { %v3976_v9 = vadd.f32 %v3960_v8, %v3900_v59  ;;  %v4391_v27 = vadd.f32 %v4390_v51, %v4389_v3  ;;  %v3971_v51 = vld [vmem:[%s5624_s2 + $0x60] sm:$0xff] }
 0x492   : > { %v4392_v63 = vpop.f32.mrf.mxu0 }
 0x493   : > { %3992 = vst [vmem:[%s6234_s9 + $0x8] sm:$0xff] %v3976_v9  ;;  %v3905_v57 = vadd.f32 %v4391_v27, %v7136_v1 }
 0x494   : > { %v4393_v26 = vpop.f32.mrf.mxu0 }
 0x495   : > { %v3977_v31 = vadd.f32 %v3961_v18, %v3905_v57  ;;  %v4394_v53 = vadd.f32 %v4393_v26, %v4392_v63  ;;  %v3972_v26 = vld [vmem:[%s5624_s2 + $0x68] sm:$0xff] }
 0x496   : > { %v4395_v61 = vpop.f32.mrf.mxu0 }
 0x497   : > { %3993 = vst [vmem:[%s6234_s9 + $0x10] sm:$0xff] %v3977_v31  ;;  %v3908_v21 = vadd.f32 %v4394_v53, %v7136_v1 }
 0x498   : > { %v4396_v49 = vpop.f32.mrf.mxu0 }
 0x499   : > { %v3978_v17 = vadd.f32 %v3962_v34, %v3908_v21  ;;  %v4397_v16 = vadd.f32 %v4396_v49, %v4395_v61  ;;  %v3973_v49 = vld [vmem:[%s5624_s2 + $0x70] sm:$0xff] }
 0x49a   : > { %v4398_v4 = vpop.f32.mrf.mxu0 }
 0x49b   : > { %3994 = vst [vmem:[%s6234_s9 + $0x18] sm:$0xff] %v3978_v17  ;;  %v3913_v13 = vadd.f32 %v4397_v16, %v7136_v1 }
 0x49c   : > { %v4399_v40 = vpop.f32.mrf.mxu0 }
 0x49d   : > { %v3979_v20 = vadd.f32 %v3963_v36, %v3913_v13  ;;  %v4400_v23 = vadd.f32 %v4399_v40, %v4398_v4  ;;  %v3974_v40 = vld [vmem:[%s5624_s2 + $0x78] sm:$0xff]  ;;  %s5247_s2 = smov [#allocation15]  }
 0x49e   : > { %v4401_v19 = vpop.f32.mrf.mxu0  ;;  %s5066_s1 = sshll.u32 %s5247_s2, 4  ;;  %s5067_s1 = int_to_ptr.vmem [resolvable:$false] %s5066_s1 }
 0x49f   : > { %3995 = vst [vmem:[%s6234_s9 + $0x20] sm:$0xff] %v3979_v20  ;;  %v3916_v52 = vadd.f32 %v4400_v23, %v7136_v1  ;;  %s5068_s11 = scalar_lea.vmem %s5067_s1, 4096  ;;  %p5069_p9 = scmp.lt.s32.totalorder %s7193_s13, %s5067_s1 }
 0x4a0   : > { %v4402_v42 = vpop.f32.mrf.mxu0  ;;  %p5070_p5 = scmp.lt.s32.totalorder %s5068_s11, %s5062_s22 }
 0x4a1   : > { %v3980_v5 = vadd.f32 %v3964_v54, %v3916_v52  ;;  %v4403_v39 = vadd.f32 %v4402_v42, %v4401_v19 }
 0x4a2   : > { %v4404_v62 = vpop.f32.mrf.mxu0  ;;  %p5071_p4 = por %p5070_p5, %p5069_p9 }
 0x4a3   : > { %3996 = vst [vmem:[%s6234_s9 + $0x28] sm:$0xff] %v3980_v5  ;;  %v3921_v56 = vadd.f32 %v4403_v39, %v7136_v1 }
 0x4a4   : > { %v4405_v43 = vpop.f32.mrf.mxu0  ;;  %p5072_p1 = pnand %p5071_p4, %p5065_p6 }
 0x4a5   : > { %v3981_v15 = vadd.f32 %v3965_v7, %v3921_v56  ;;  %v4406_v14 = vadd.f32 %v4405_v43, %v4404_v62 }
 0x4a6   : > { %v4407_v24 = vpop.f32.mrf.mxu0 }
 0x4a7   : > { %3997 = vst [vmem:[%s6234_s9 + $0x30] sm:$0xff] %v3981_v15  ;;  %v3924_v58 = vadd.f32 %v4406_v14, %v7136_v1 }
 0x4a8   : > { %v4408_v30 = vpop.f32.mrf.mxu0 }
 0x4a9   : > { %v3982_v35 = vadd.f32 %v3966_v38, %v3924_v58  ;;  %v4409_v25 = vadd.f32 %v4408_v30, %v4407_v24 }
 0x4aa   : > { %v4410_v60 = vpop.f32.mrf.mxu0 }
 0x4ab   : > { %3998 = vst [vmem:[%s6234_s9 + $0x38] sm:$0xff] %v3982_v35  ;;  %v3929_v44 = vadd.f32 %v4409_v25, %v7136_v1 }
 0x4ac   : > { %v4411_v48 = vpop.f32.mrf.mxu0 }
 0x4ad   : > { %v3983_v45 = vadd.f32 %v3967_v46, %v3929_v44  ;;  %v4412_v2 = vadd.f32 %v4411_v48, %v4410_v60 }
 0x4ae   : > { %v4413_v55 = vpop.f32.mrf.mxu0 }
 0x4af   : > { %3999 = vst [vmem:[%s6234_s9 + $0x40] sm:$0xff] %v3983_v45  ;;  %v3932_v22 = vadd.f32 %v4412_v2, %v7136_v1 }
 0x4b0   : > { %v4414_v37 = vpop.f32.mrf.mxu0 }
 0x4b1   : > { %v3984_v11 = vadd.f32 %v3968_v50, %v3932_v22  ;;  %v4415_v12 = vadd.f32 %v4414_v37, %v4413_v55 }
 0x4b2   : > { %v4416_v28 = vpop.f32.mrf.mxu0 }
 0x4b3   : > { %4000 = vst [vmem:[%s6234_s9 + $0x48] sm:$0xff] %v3984_v11  ;;  %v3937_v6 = vadd.f32 %v4415_v12, %v7136_v1 }
 0x4b4   : > { %v4417_v29 = vpop.f32.mrf.mxu0 }
 0x4b5   : > { %v3985_v47 = vadd.f32 %v3969_v41, %v3937_v6  ;;  %v4418_v32 = vadd.f32 %v4417_v29, %v4416_v28 }
 0x4b6   : > { %v4419_v10 = vpop.f32.mrf.mxu0 }
 0x4b7   : > { %4001 = vst [vmem:[%s6234_s9 + $0x50] sm:$0xff] %v3985_v47  ;;  %v3940_v0 = vadd.f32 %v4418_v32, %v7136_v1 }
 0x4b8   : > { %v4420_v8 = vpop.f32.mrf.mxu0 }
 0x4b9   : > { %v3986_v3 = vadd.f32 %v3970_v33, %v3940_v0  ;;  %v4421_v59 = vadd.f32 %v4420_v8, %v4419_v10 }
 0x4ba   : > { %v4422_v9 = vpop.f32.mrf.mxu0 }
 0x4bb   : > { %4002 = vst [vmem:[%s6234_s9 + $0x58] sm:$0xff] %v3986_v3  ;;  %v3945_v27 = vadd.f32 %v4421_v59, %v7136_v1 }
 0x4bc   : > { %v4423_v18 = vpop.f32.mrf.mxu0 }
 0x4bd   : > { %v3987_v63 = vadd.f32 %v3971_v51, %v3945_v27  ;;  %v4424_v57 = vadd.f32 %v4423_v18, %v4422_v9 }
 0x4be   : > { %v4425_v31 = vpop.f32.mrf.mxu0 }
 0x4bf   : > { %4003 = vst [vmem:[%s6234_s9 + $0x60] sm:$0xff] %v3987_v63  ;;  %v3948_v53 = vadd.f32 %v4424_v57, %v7136_v1 }
 0x4c0   : > { %v4426_v34 = vpop.f32.mrf.mxu0 }
 0x4c1   : > { %v3988_v61 = vadd.f32 %v3972_v26, %v3948_v53  ;;  %v4427_v21 = vadd.f32 %v4426_v34, %v4425_v31 }
 0x4c2   : > { %v4428_v17 = vpop.f32.mrf.mxu0 }
 0x4c3   : > { %4004 = vst [vmem:[%s6234_s9 + $0x68] sm:$0xff] %v3988_v61  ;;  %v3953_v16 = vadd.f32 %v4427_v21, %v7136_v1 }
 0x4c4   : > { %v4429_v36 = vpop.f32.mrf.mxu0 }
 0x4c5   : > { %v3989_v4 = vadd.f32 %v3973_v49, %v3953_v16  ;;  %v4430_v13 = vadd.f32 %v4429_v36, %v4428_v17 }
 0x4c7   : > { %4005 = vst [vmem:[%s6234_s9 + $0x70] sm:$0xff] %v3989_v4  ;;  %v3956_v20 = vadd.f32 %v4430_v13, %v7136_v1 }
 0x4c9   : > { %v3990_v23 = vadd.f32 %v3974_v40, %v3956_v20 }
 0x4cb   : > { %4006 = vst [vmem:[%s6234_s9 + $0x78] sm:$0xff] %v3990_v23 }
 0x4cc   : > { %5075 = shalt.err (!%p5072_p1)
}
 0x4cd   : > { %s5076_s28 = scalar_lea.hbm %s7191_s15, 2048  ;;  %s5080_s27 = scalar_lea.hbm %s7449_s8, 12288 }
 0x4ce   : > { %p5077_p8 = scmp.ne.s32.totalorder %s7191_s15, %s5076_s28  ;;  %p5081_p3 = scmp.lt.s32.totalorder %s7191_s15, %s7449_s8 }
 0x4cf   : > { %p5082_p10 = scmp.lt.s32.totalorder %s5080_s27, %s5076_s28 }
 0x4d0   : > { %p5078_p12 = pnand %p5077_p8, %p7450_p11 }
 0x4d1   : > { %p5083_p13 = por %p5082_p10, %p5081_p3 }
 0x4d2   : > { %p5079_p0 = pneg %p5078_p12 }
 0x4d4   : > { %p5084_p7 = pnand %p5083_p13, %p5079_p0 }
 0x4d6   : > { %5087 = shalt.err (!%p5084_p7)
}
 0x4d7   : > { %s5248_s17 = smov 128   ;;  %s5249_s0 = smov 8  }
 0x4d8   : > { %4469 = dma.vmem_to_hbm [thread:$0]  (%p7450_p11), %s7193_s13, 2048, %s7191_s15, %s7198_s4, %s5248_s17, %s5248_s17, %s5249_s0  }
 0x4d9 PF: > { %s7451_s7 = sld [smem:[#allocation25_spill]]  ;;  %p4502_p2 = scmp.ge.s32.totalorder %s5226_s26, 2 }
 0x4da   : > { %s7452_s23 = sld [smem:[#allocation33_spill]] }
 0x4df   : > { %s4038_s5 = sand.u32 1, %s7451_s7  }
 0x4e0   : > { %p7453_p6 = scmp.ne.s32.totalorder %s7452_s23, 0  ;;  %s4039_s30 = scalar_lea.sflag [#allocation6], %s4038_s5 }
 0x4e2   : > { %p4492_p9 = pnand %p4502_p2, %p7453_p6 }
 0x4e4   : > { %p4493_p5 = pneg %p4492_p9 }
 0x4e6   : > { %5169 = dma.done.wait (%p4493_p5), %s4039_s30, 2048  }
 0x4e7   : > { %5171 = vsyncadd (%p4493_p5), %s4039_s30, 4294965248  ;;  %s31_s26 = sadd.s32 1, %s5226_s26   ;;  %s7455_s13 = sld [smem:[#allocation23_spill]] }
 0x4e8   : > { %p7226_p4 = scmp.ge.s32.totalorder %s31_s26, 8   ;;  %s7456_s10 = sld [smem:[#allocation24_spill]] }
 0x4e9   : > { %s7457_s4 = sld [smem:[#allocation26_spill]]  ;;  %s7458_s22 = smov %s5536_s16 }
 0x4ea   : > { %s7459_s2 = smov %s5539_s14  ;;  %s7460_s1 = sld [smem:[#allocation30_spill]] }
 0x4eb   : > { %s7461_s11 = sld [smem:[#allocation34_spill]]  ;;  %s7463_s15 = smov %s7489_s6 }
 0x4ec   : > { %s7465_s17 = smov %s5194_s18  ;;  %s7466_s18 = smov %s7458_s22 }
 0x4ed   : > { %s7467_s19 = smov %s5202_s20  ;;  %s7468_s20 = smov %s5206_s21 }
 0x4ee   : > { %s7462_s14 = smov %s7456_s10  ;;  %s7469_s21 = smov %s7459_s2 }
 0x4ef   : > { %s7464_s16 = smov %s7457_s4  ;;  %s7470_s22 = smov %s5218_s24 }
 0x4f0   : > { %s7471_s23 = smov %s5222_s25  ;;  %s7472_s24 = smov %s7460_s1 }
 0x4f1   : > { %s7473_s25 = smov %s7461_s11  ;;  %30 = sbr.rel (!%p7226_p4) target bundleno = 26 (0x1a), region = 169 }
 0x4f6   :  { %4044 = vsyncpa [#allocation5], 1 }
 0x4f7   :  { %4046 = vsyncpa [#allocation5 + $0x1], 1 }
 0x4f8   :  { %4047 = vsyncpa [#allocation8], 1 }
 0x4f9   :  { %4049 = vsyncpa [#allocation8 + $0x1], 1 }
 0x4fa   :  { %4050 = vsyncpa [#allocation11], 1 }
 0x4fb   :  { %4051 = vsyncpa [#allocation14], 1 }
 0x4fc   :  { %4052 = vsyncpa [#allocation6], 1 }
 0x4fd   :  { %4054 = vsyncpa [#allocation6 + $0x1], 1 }

</bundles_post_ra>
